<compile_context>
chip_gen: v6e
topology: v6e:2x2x1
jax: 0.10.0
libtpu: 0.0.40
codegen_flags: <defaults>
</compile_context>

<pallas_src>
import functools
import math

import jax
import jax.numpy as jnp
from jax.experimental import pallas as pl
from jax.experimental.pallas import tpu as pltpu


# ----------------------------- fused kernel --------------------------------

def _saint_kernel(src_ref, tgt_ref, attnw_ref, ffnw_ref, vecs_ref, wbias_ref,
                  out_ref, *, nhead, num_layers):
    """One grid step processes TB batch elements.

    src_ref / tgt_ref : (TB, n, d) f32
    attnw_ref         : (4*E + 8*D, d, d)  bf16   -- wq, wk, wv, wo per attention
    ffnw_ref          : (2*(E+D), d, dff)  bf16   -- w1 (x@w1), w2 (contract last dims)
    vecs_ref          : (rows, d)          f32    -- biases / LN params / pred head
    wbias_ref         : (E+D, dff)         f32    -- linear1 biases
    out_ref           : (1, TB, n)         f32    -- sigmoid(pred)
    """
    TB, L, d = src_ref.shape
    M = TB * L
    dh = d // nhead
    scale = 1.0 / math.sqrt(dh)

    idx = {"a": 0, "f": 0, "v": 0, "w": 0}

    def A():                                   # next attention weight matrix (d, d)
        i = idx["a"]; idx["a"] += 1
        return attnw_ref[i]

    def F():                                   # next FFN weight matrix (d, dff)
        i = idx["f"]; idx["f"] += 1
        return ffnw_ref[i]

    def V():                                   # next small vector row (1, d)
        i = idx["v"]; idx["v"] += 1
        return vecs_ref[i:i + 1, :]

    def Wb():                                  # next wide (linear1) bias row (1, dff)
        i = idx["w"]; idx["w"] += 1
        return wbias_ref[i:i + 1, :]

    # Causal mask generated in-kernel; broadcast to the batch once (hoisted).
    rows = jax.lax.broadcasted_iota(jnp.int32, (L, L), 0)
    cols = jax.lax.broadcasted_iota(jnp.int32, (L, L), 1)
    causal = jnp.where(cols > rows, -1e30, 0.0).astype(jnp.float32)
    maskb = jnp.broadcast_to(causal[None, :, :], (TB, L, L))

    def layer_norm(h, g, b):                   # h: (M, d) f32, g/b: (1, d) f32
        mu = jnp.mean(h, axis=-1, keepdims=True)
        var = jnp.mean(jnp.square(h - mu), axis=-1, keepdims=True)
        return (h - mu) * jax.lax.rsqrt(var + 1e-5) * g + b

    def mha(q2d, kv2d):
        """q2d/kv2d: (M, d) f32.  Fused full-width projections in bf16; per-head
        attention cores batched over the folded batch dim; output projection fused
        into the head loop via aligned sublane slices of wo."""
        wq, wk, wv, wo = A(), A(), A(), A()
        bq, bk, bv, bo = V(), V(), V(), V()
        q = jnp.dot(q2d.astype(jnp.bfloat16), wq, preferred_element_type=jnp.float32) + bq
        k = jnp.dot(kv2d.astype(jnp.bfloat16), wk, preferred_element_type=jnp.float32) + bk
        v = jnp.dot(kv2d.astype(jnp.bfloat16), wv, preferred_element_type=jnp.float32) + bv
        q3 = q.reshape(TB, L, d)
        k3 = k.reshape(TB, L, d)
        v3 = v.reshape(TB, L, d)
        ctx = jnp.zeros((M, d), jnp.float32)
        for h in range(nhead):
            sl = slice(h * dh, (h + 1) * dh)
            s = jnp.einsum("bqd,bkd->bqk", q3[:, :, sl], k3[:, :, sl],
                           preferred_element_type=jnp.float32) * scale + maskb
            s = s - jnp.max(s, axis=-1, keepdims=True)
            p = jnp.exp(s)
            p = p * pl.reciprocal(jnp.sum(p, axis=-1, keepdims=True), approx=True)
            oh = jnp.einsum("bqk,bkd->bqd", p, v3[:, :, sl],
                            preferred_element_type=jnp.float32)
            ctx = ctx + jnp.dot(oh.reshape(M, dh).astype(jnp.bfloat16), wo[sl, :],
                                preferred_element_type=jnp.float32)
        return ctx + bo

    def ffn(h):
        w1, w2 = F(), F()                      # both stored as (d, dff)
        b1 = Wb()
        b2 = V()
        f = jnp.dot(h.astype(jnp.bfloat16), w1, preferred_element_type=jnp.float32) + b1
        f = jnp.maximum(f, 0.0)
        y = jax.lax.dot_general(f.astype(jnp.bfloat16), w2,
                                (((1,), (1,)), ((), ())),      # contract last dims
                                preferred_element_type=jnp.float32)
        return y + b2

    # ------------------------------ encoder --------------------------------
    x = src_ref[...].reshape(M, d)
    for _ in range(num_layers):
        x = layer_norm(x + mha(x, x), V(), V())
        x = layer_norm(x + ffn(x), V(), V())
    memory = layer_norm(x, V(), V())           # final encoder norm

    # ------------------------------ decoder --------------------------------
    y = tgt_ref[...].reshape(M, d)
    for _ in range(num_layers):
        y = layer_norm(y + mha(y, y), V(), V())          # self-attn (tgt_mask)
        y = layer_norm(y + mha(y, memory), V(), V())     # cross-attn (memory_mask)
        y = layer_norm(y + ffn(y), V(), V())
    y = layer_norm(y, V(), V())                # final decoder norm

    # ---------------------------- pred + sigmoid ---------------------------
    pw = V()                                   # (1, d)  pred weight row
    pb = V()[0:1, 0:1]                         # (1, 1)  pred bias
    y3 = y.reshape(TB, L, d)
    logits = jnp.sum(y3 * pw, axis=-1) + pb    # (TB, L)
    # numerically-stable sigmoid in f32 (exact divide keeps outputs in [0, 1])
    z = jnp.exp(-jnp.abs(logits))
    r = 1.0 / (1.0 + z)
    out_ref[0] = jnp.where(logits >= 0.0, r, z * r)


# ----------------------------- weight packing -------------------------------

def pack_params(params, weight_dtype=jnp.bfloat16):
    """Pre-transpose / pre-pack all transformer weights ONCE into 4 slabs.

    Packing order exactly mirrors the kernel's consumption order."""
    d = params["E"].shape[1]
    attn_mats, ffn_mats, vec_rows, wide_rows = [], [], [], []

    def row(v):
        return jnp.asarray(v, jnp.float32).reshape(1, -1)

    def add_attn(p):
        """torch MultiheadAttention -> full-width x@W layout; returns bias rows."""
        w, b = p["in_proj_weight"], p["in_proj_bias"]
        attn_mats.extend([w[:d].T, w[d:2 * d].T, w[2 * d:].T,
                          p["out_proj_weight"].T])
        return [row(b[:d]), row(b[d:2 * d]), row(b[2 * d:]), row(p["out_proj_bias"])]

    for ep in params["encoder_layers"]:
        vec_rows += add_attn(ep["self_attn"])                       # bq,bk,bv,bo
        vec_rows += [row(ep["norm1_w"]), row(ep["norm1_b"])]
        ffn_mats += [ep["linear1_w"].T, ep["linear2_w"]]            # (d,dff), (d,dff)
        wide_rows += [row(ep["linear1_b"])]
        vec_rows += [row(ep["linear2_b"]), row(ep["norm2_w"]), row(ep["norm2_b"])]
    vec_rows += [row(params["encoder_norm_w"]), row(params["encoder_norm_b"])]

    for dp in params["decoder_layers"]:
        vec_rows += add_attn(dp["self_attn"])
        vec_rows += [row(dp["norm1_w"]), row(dp["norm1_b"])]
        vec_rows += add_attn(dp["cross_attn"])
        vec_rows += [row(dp["norm2_w"]), row(dp["norm2_b"])]
        ffn_mats += [dp["linear1_w"].T, dp["linear2_w"]]
        wide_rows += [row(dp["linear1_b"])]
        vec_rows += [row(dp["linear2_b"]), row(dp["norm3_w"]), row(dp["norm3_b"])]
    vec_rows += [row(params["decoder_norm_w"]), row(params["decoder_norm_b"])]

    vec_rows += [row(params["pred_w"]),
                 jnp.full((1, d), jnp.asarray(params["pred_b"], jnp.float32)[0],
                          jnp.float32)]

    attnw = jnp.stack([jnp.asarray(m, jnp.float32) for m in attn_mats]).astype(weight_dtype)
    ffnw = jnp.stack([jnp.asarray(m, jnp.float32) for m in ffn_mats]).astype(weight_dtype)
    vecs = jnp.concatenate(vec_rows, axis=0).astype(jnp.float32)
    wbias = jnp.concatenate(wide_rows, axis=0).astype(jnp.float32)

    E, D = len(params["encoder_layers"]), len(params["decoder_layers"])
    assert attnw.shape[0] == 4 * E + 8 * D
    assert ffnw.shape[0] == 2 * (E + D)
    assert vecs.shape[0] == 9 * E + 15 * D + 6
    assert wbias.shape[0] == E + D

    return {"E": params["E"], "R": params["R"], "P": params["P"], "S": params["S"],
            "attnw": attnw, "ffnw": ffnw, "vecs": vecs, "wbias": wbias}


# ----------------------------- forward pass ---------------------------------

def saint_forward(packed, q_tokens, r_tokens, *, nhead, num_layers, block_batch=None):
    B, n = q_tokens.shape
    d = packed["E"].shape[1]
    assert d % nhead == 0

    # Embedding lookups + positional add in plain JAX (gathers), batch-first (B, n, d).
    E = packed["E"][q_tokens]                             # (B, n, d)
    Remb = packed["R"][r_tokens[:, :-1]]                  # (B, n-1, d)
    S = jnp.broadcast_to(packed["S"][None, :, :], (B, 1, d))
    Rseq = jnp.concatenate([S, Remb], axis=1)             # (B, n, d)
    P = packed["P"][None, :, :]                           # (1, n, d)
    src = (E + P).astype(jnp.float32)
    tgt = (Rseq + P).astype(jnp.float32)

    # Batch folding: aim for ~256 folded rows per grid step (fills the 256-row MXU on
    # v6e/v7x; at small B we just take the whole batch in one step).
    TB = block_batch if block_batch is not None else min(B, max(1, 256 // n))
    grid = pl.cdiv(B, TB)
    Bp = grid * TB
    if Bp != B:
        pad = Bp - B
        src = jnp.pad(src, ((0, pad), (0, 0), (0, 0)))
        tgt = jnp.pad(tgt, ((0, pad), (0, 0), (0, 0)))

    attnw, ffnw = packed["attnw"], packed["ffnw"]
    vecs, wbias = packed["vecs"], packed["wbias"]

    out = pl.pallas_call(
        functools.partial(_saint_kernel, nhead=nhead, num_layers=num_layers),
        out_shape=jax.ShapeDtypeStruct((grid, TB, n), jnp.float32),
        grid=(grid,),
        in_specs=[
            pl.BlockSpec((TB, n, d), lambda b: (b, 0, 0)),
            pl.BlockSpec((TB, n, d), lambda b: (b, 0, 0)),
            # constant index maps: weights DMA'd once, resident across grid steps
            pl.BlockSpec(attnw.shape, lambda b: (0, 0, 0)),
            pl.BlockSpec(ffnw.shape, lambda b: (0, 0, 0)),
            pl.BlockSpec(vecs.shape, lambda b: (0, 0)),
            pl.BlockSpec(wbias.shape, lambda b: (0, 0)),
        ],
        out_specs=pl.BlockSpec((1, TB, n), lambda b: (b, 0, 0)),
        compiler_params=pltpu.CompilerParams(dimension_semantics=("parallel",)),
    )(src, tgt, attnw, ffnw, vecs, wbias)

    return out.reshape(Bp, n)[:B]


# ----------------------------- parameter init -------------------------------

def init_params(key, num_q, n, d, nhead, dff, num_layers):
    ki = iter(jax.random.split(key, 128))

    def nrm(shape, scale=0.1):
        return scale * jax.random.normal(next(ki), shape, dtype=jnp.float32)

    def attn():
        return {"in_proj_weight": nrm((3 * d, d)), "in_proj_bias": nrm((3 * d,)),
                "out_proj_weight": nrm((d, d)), "out_proj_bias": nrm((d,))}

    def enc_layer():
        return {"self_attn": attn(),
                "linear1_w": nrm((dff, d)), "linear1_b": nrm((dff,)),
                "linear2_w": nrm((d, dff)), "linear2_b": nrm((d,)),
                "norm1_w": jnp.ones((d,), jnp.float32), "norm1_b": jnp.zeros((d,), jnp.float32),
                "norm2_w": jnp.ones((d,), jnp.float32), "norm2_b": jnp.zeros((d,), jnp.float32)}

    def dec_layer():
        return {"self_attn": attn(), "cross_attn": attn(),
                "linear1_w": nrm((dff, d)), "linear1_b": nrm((dff,)),
                "linear2_w": nrm((d, dff)), "linear2_b": nrm((d,)),
                "norm1_w": jnp.ones((d,), jnp.float32), "norm1_b": jnp.zeros((d,), jnp.float32),
                "norm2_w": jnp.ones((d,), jnp.float32), "norm2_b": jnp.zeros((d,), jnp.float32),
                "norm3_w": jnp.ones((d,), jnp.float32), "norm3_b": jnp.zeros((d,), jnp.float32)}

    return {
        "E": jax.random.normal(next(ki), (num_q, d), dtype=jnp.float32),
        "R": jax.random.normal(next(ki), (2, d), dtype=jnp.float32),
        "P": jax.random.normal(next(ki), (n, d), dtype=jnp.float32),
        "S": jax.random.normal(next(ki), (1, d), dtype=jnp.float32),
        "encoder_layers": [enc_layer() for _ in range(num_layers)],
        "decoder_layers": [dec_layer() for _ in range(num_layers)],
        "encoder_norm_w": jnp.ones((d,), jnp.float32), "encoder_norm_b": jnp.zeros((d,), jnp.float32),
        "decoder_norm_w": jnp.ones((d,), jnp.float32), "decoder_norm_b": jnp.zeros((d,), jnp.float32),
        "pred_w": nrm((1, d)), "pred_b": nrm((1,)),
        # e_layer / a_layer exist in SAINT.__init__ but are unused in forward() -> omitted.
    }


# ----------------------------- main ------------------------------------------

if __name__ == "__main__":
    num_q, n, d, nhead = 10, 8, 32, 4
    dff = 2048            # nn.Transformer default dim_feedforward
    batch = 2
    num_layers = 1

    key = jax.random.PRNGKey(0)
    pkey, qkey, rkey = jax.random.split(key, 3)
    params = init_params(pkey, num_q=num_q, n=n, d=d, nhead=nhead, dff=dff,
                         num_layers=num_layers)
    packed = pack_params(params)                       # pre-transpose/pack weights once

    q_tokens = jax.random.randint(qkey, (batch, n), 0, num_q)   # question ids
    r_tokens = jax.random.randint(rkey, (batch, n), 0, 2)       # responses in {0,1}

    fwd = jax.jit(functools.partial(saint_forward, nhead=nhead, num_layers=num_layers))
    out = jax.block_until_ready(fwd(packed, q_tokens, r_tokens))

    assert out.shape == (batch, n), out.shape
    assert bool(jnp.all(jnp.isfinite(out)))
    assert bool(jnp.all((out >= 0.0) & (out <= 1.0)))
    print("KERNEL_OK")
</pallas_src>

<mosaic_0001>
module attributes {stable_mosaic.version = 11 : i64} {
  func.func @_saint_kernel(%arg0: i32, %arg1: memref<2x8x32xf32, #tpu.memory_space<vmem>>, %arg2: memref<2x8x32xf32, #tpu.memory_space<vmem>>, %arg3: memref<12x32x32xbf16, #tpu.memory_space<vmem>>, %arg4: memref<4x32x2048xbf16, #tpu.memory_space<vmem>>, %arg5: memref<30x32xf32, #tpu.memory_space<vmem>>, %arg6: memref<2x2048xf32, #tpu.memory_space<vmem>>, %arg7: memref<1x2x8xf32, #tpu.memory_space<vmem>>) attributes {dimension_semantics = [#tpu.dimension_semantics<parallel>], iteration_bounds = array<i64: 1>, scalar_prefetch = 0 : i64, scratch_operands = 0 : i64, tpu.core_type = #tpu.core_type<tc>, window_params = [{transform_indices = @transform_0, window_bounds = array<i64: 2, 8, 32>}, {transform_indices = @transform_1, window_bounds = array<i64: 2, 8, 32>}, {pipeline_mode = #tpu.pipeline_mode<synchronous>, transform_indices = @transform_2, window_bounds = array<i64: 12, 32, 32>}, {pipeline_mode = #tpu.pipeline_mode<synchronous>, transform_indices = @transform_3, window_bounds = array<i64: 4, 32, 2048>}, {pipeline_mode = #tpu.pipeline_mode<synchronous>, transform_indices = @transform_4, window_bounds = array<i64: 30, 32>}, {pipeline_mode = #tpu.pipeline_mode<synchronous>, transform_indices = @transform_5, window_bounds = array<i64: 2, 2048>}, {transform_indices = @transform_6, window_bounds = array<i64: 1, 2, 8>}]} {
    %0 = tpu.iota {dimensions = array<i32: 0>} : vector<8x8xi32>
    %1 = tpu.iota {dimensions = array<i32: 1>} : vector<8x8xi32>
    %2 = arith.cmpi sgt, %1, %0 : vector<8x8xi32>
    %cst = arith.constant -1.000000e+30 : f32
    %cst_0 = arith.constant 0.000000e+00 : f32
    %3 = vector.broadcast %cst : f32 to vector<8x8xf32>
    %4 = vector.broadcast %cst_0 : f32 to vector<8x8xf32>
    %5 = arith.select %2, %3, %4 : vector<8x8xi1>, vector<8x8xf32>
    %6 = vector.shape_cast %5 : vector<8x8xf32> to vector<1x8x8xf32>
    %7 = vector.shape_cast %6 : vector<1x8x8xf32> to vector<1x8x8xf32>
    %8 = vector.broadcast %7 : vector<1x8x8xf32> to vector<2x8x8xf32>
    %c0 = arith.constant 0 : index
    %c0_1 = arith.constant 0 : index
    %c0_2 = arith.constant 0 : index
    %9 = vector.load %arg1[%c0, %c0_1, %c0_2] : memref<2x8x32xf32, #tpu.memory_space<vmem>>, vector<2x8x32xf32>
    %10 = vector.shape_cast %9 : vector<2x8x32xf32> to vector<16x32xf32>
    %c0_3 = arith.constant 0 : index
    %c0_4 = arith.constant 0 : index
    %c0_5 = arith.constant 0 : index
    %11 = vector.load %arg3[%c0_3, %c0_4, %c0_5] : memref<12x32x32xbf16, #tpu.memory_space<vmem>>, vector<1x32x32xbf16>
    %12 = vector.shape_cast %11 : vector<1x32x32xbf16> to vector<32x32xbf16>
    %c1 = arith.constant 1 : index
    %c0_6 = arith.constant 0 : index
    %c0_7 = arith.constant 0 : index
    %13 = vector.load %arg3[%c1, %c0_6, %c0_7] : memref<12x32x32xbf16, #tpu.memory_space<vmem>>, vector<1x32x32xbf16>
    %14 = vector.shape_cast %13 : vector<1x32x32xbf16> to vector<32x32xbf16>
    %c2 = arith.constant 2 : index
    %c0_8 = arith.constant 0 : index
    %c0_9 = arith.constant 0 : index
    %15 = vector.load %arg3[%c2, %c0_8, %c0_9] : memref<12x32x32xbf16, #tpu.memory_space<vmem>>, vector<1x32x32xbf16>
    %16 = vector.shape_cast %15 : vector<1x32x32xbf16> to vector<32x32xbf16>
    %c3 = arith.constant 3 : index
    %c0_10 = arith.constant 0 : index
    %c0_11 = arith.constant 0 : index
    %17 = vector.load %arg3[%c3, %c0_10, %c0_11] : memref<12x32x32xbf16, #tpu.memory_space<vmem>>, vector<1x32x32xbf16>
    %18 = vector.shape_cast %17 : vector<1x32x32xbf16> to vector<32x32xbf16>
    %c0_12 = arith.constant 0 : index
    %c0_13 = arith.constant 0 : index
    %19 = vector.load %arg5[%c0_12, %c0_13] : memref<30x32xf32, #tpu.memory_space<vmem>>, vector<1x32xf32>
    %c1_14 = arith.constant 1 : index
    %c0_15 = arith.constant 0 : index
    %20 = vector.load %arg5[%c1_14, %c0_15] : memref<30x32xf32, #tpu.memory_space<vmem>>, vector<1x32xf32>
    %c2_16 = arith.constant 2 : index
    %c0_17 = arith.constant 0 : index
    %21 = vector.load %arg5[%c2_16, %c0_17] : memref<30x32xf32, #tpu.memory_space<vmem>>, vector<1x32xf32>
    %c3_18 = arith.constant 3 : index
    %c0_19 = arith.constant 0 : index
    %22 = vector.load %arg5[%c3_18, %c0_19] : memref<30x32xf32, #tpu.memory_space<vmem>>, vector<1x32xf32>
    %23 = arith.truncf %10 : vector<16x32xf32> to vector<16x32xbf16>
    %cst_20 = arith.constant dense<0.000000e+00> : vector<16x32xf32>
    %24 = tpu.matmul %23, %12, %cst_20 {dimension_numbers = #tpu.dot_dimension_numbers<[1], [0], [0], [1], [0, 0, 1, 1], [], []>} : vector<16x32xbf16>, vector<32x32xbf16>, vector<16x32xf32> -> vector<16x32xf32>
    %25 = vector.broadcast %19 : vector<1x32xf32> to vector<16x32xf32>
    %26 = arith.addf %24, %25 : vector<16x32xf32>
    %27 = arith.truncf %10 : vector<16x32xf32> to vector<16x32xbf16>
    %cst_21 = arith.constant dense<0.000000e+00> : vector<16x32xf32>
    %28 = tpu.matmul %27, %14, %cst_21 {dimension_numbers = #tpu.dot_dimension_numbers<[1], [0], [0], [1], [0, 0, 1, 1], [], []>} : vector<16x32xbf16>, vector<32x32xbf16>, vector<16x32xf32> -> vector<16x32xf32>
    %29 = vector.broadcast %20 : vector<1x32xf32> to vector<16x32xf32>
    %30 = arith.addf %28, %29 : vector<16x32xf32>
    %31 = arith.truncf %10 : vector<16x32xf32> to vector<16x32xbf16>
    %cst_22 = arith.constant dense<0.000000e+00> : vector<16x32xf32>
    %32 = tpu.matmul %31, %16, %cst_22 {dimension_numbers = #tpu.dot_dimension_numbers<[1], [0], [0], [1], [0, 0, 1, 1], [], []>} : vector<16x32xbf16>, vector<32x32xbf16>, vector<16x32xf32> -> vector<16x32xf32>
    %33 = vector.broadcast %21 : vector<1x32xf32> to vector<16x32xf32>
    %34 = arith.addf %32, %33 : vector<16x32xf32>
    %35 = vector.shape_cast %26 : vector<16x32xf32> to vector<2x8x32xf32>
    %36 = vector.shape_cast %30 : vector<16x32xf32> to vector<2x8x32xf32>
    %37 = vector.shape_cast %34 : vector<16x32xf32> to vector<2x8x32xf32>
    %cst_23 = arith.constant 0.000000e+00 : f32
    %38 = vector.broadcast %cst_23 : f32 to vector<16x32xf32>
    %39 = vector.extract_strided_slice %35 {offsets = [0, 0, 0], sizes = [2, 8, 8], strides = [1, 1, 1]} : vector<2x8x32xf32> to vector<2x8x8xf32>
    %40 = vector.extract_strided_slice %36 {offsets = [0, 0, 0], sizes = [2, 8, 8], strides = [1, 1, 1]} : vector<2x8x32xf32> to vector<2x8x8xf32>
    "tpu.trace_start"() <{level = 10 : i32, message = "bqd,bkd->bqk"}> : () -> ()
    %cst_24 = arith.constant dense<0.000000e+00> : vector<2x8x8xf32>
    %41 = tpu.matmul %39, %40, %cst_24 {dimension_numbers = #tpu.dot_dimension_numbers<[2], [2], [1], [1], [0, 0, 0, 1, 1, 1], [0], [0]>} : vector<2x8x8xf32>, vector<2x8x8xf32>, vector<2x8x8xf32> -> vector<2x8x8xf32>
    "tpu.trace_stop"() : () -> ()
    %cst_25 = arith.constant 0.353553385 : f32
    %42 = vector.broadcast %cst_25 : f32 to vector<2x8x8xf32>
    %43 = arith.mulf %41, %42 : vector<2x8x8xf32>
    %44 = arith.addf %43, %8 : vector<2x8x8xf32>
    %cst_26 = arith.constant dense<0xFF800000> : vector<2x8xf32>
    %45 = vector.multi_reduction <maximumf>, %44, %cst_26 [2] : vector<2x8x8xf32> to vector<2x8xf32>
    %46 = vector.shape_cast %45 : vector<2x8xf32> to vector<2x8x1xf32>
    %47 = vector.broadcast %46 : vector<2x8x1xf32> to vector<2x8x8xf32>
    %48 = arith.subf %44, %47 : vector<2x8x8xf32>
    %49 = math.exp %48 : vector<2x8x8xf32>
    %cst_27 = arith.constant dense<0.000000e+00> : vector<2x8xf32>
    %50 = vector.multi_reduction <add>, %49, %cst_27 [2] : vector<2x8x8xf32> to vector<2x8xf32>
    %51 = vector.shape_cast %50 : vector<2x8xf32> to vector<2x8x1xf32>
    %52 = tpu.reciprocal %51 {approx = true} : vector<2x8x1xf32> -> vector<2x8x1xf32>
    %53 = vector.broadcast %52 : vector<2x8x1xf32> to vector<2x8x8xf32>
    %54 = arith.mulf %49, %53 : vector<2x8x8xf32>
    %55 = vector.extract_strided_slice %37 {offsets = [0, 0, 0], sizes = [2, 8, 8], strides = [1, 1, 1]} : vector<2x8x32xf32> to vector<2x8x8xf32>
    "tpu.trace_start"() <{level = 10 : i32, message = "bqk,bkd->bqd"}> : () -> ()
    %cst_28 = arith.constant dense<0.000000e+00> : vector<2x8x8xf32>
    %56 = tpu.matmul %54, %55, %cst_28 {dimension_numbers = #tpu.dot_dimension_numbers<[2], [1], [1], [2], [0, 0, 0, 1, 1, 2], [0], [0]>} : vector<2x8x8xf32>, vector<2x8x8xf32>, vector<2x8x8xf32> -> vector<2x8x8xf32>
    "tpu.trace_stop"() : () -> ()
    %57 = vector.shape_cast %56 : vector<2x8x8xf32> to vector<16x8xf32>
    %58 = arith.truncf %57 : vector<16x8xf32> to vector<16x8xbf16>
    %59 = vector.extract_strided_slice %18 {offsets = [0, 0], sizes = [8, 32], strides = [1, 1]} : vector<32x32xbf16> to vector<8x32xbf16>
    %cst_29 = arith.constant dense<0.000000e+00> : vector<16x32xf32>
    %60 = tpu.matmul %58, %59, %cst_29 {dimension_numbers = #tpu.dot_dimension_numbers<[1], [0], [0], [1], [0, 0, 1, 1], [], []>} : vector<16x8xbf16>, vector<8x32xbf16>, vector<16x32xf32> -> vector<16x32xf32>
    %61 = arith.addf %38, %60 : vector<16x32xf32>
    %62 = vector.extract_strided_slice %35 {offsets = [0, 0, 8], sizes = [2, 8, 8], strides = [1, 1, 1]} : vector<2x8x32xf32> to vector<2x8x8xf32>
    %63 = vector.extract_strided_slice %36 {offsets = [0, 0, 8], sizes = [2, 8, 8], strides = [1, 1, 1]} : vector<2x8x32xf32> to vector<2x8x8xf32>
    "tpu.trace_start"() <{level = 10 : i32, message = "bqd,bkd->bqk"}> : () -> ()
    %cst_30 = arith.constant dense<0.000000e+00> : vector<2x8x8xf32>
    %64 = tpu.matmul %62, %63, %cst_30 {dimension_numbers = #tpu.dot_dimension_numbers<[2], [2], [1], [1], [0, 0, 0, 1, 1, 1], [0], [0]>} : vector<2x8x8xf32>, vector<2x8x8xf32>, vector<2x8x8xf32> -> vector<2x8x8xf32>
    "tpu.trace_stop"() : () -> ()
    %cst_31 = arith.constant 0.353553385 : f32
    %65 = vector.broadcast %cst_31 : f32 to vector<2x8x8xf32>
    %66 = arith.mulf %64, %65 : vector<2x8x8xf32>
    %67 = arith.addf %66, %8 : vector<2x8x8xf32>
    %cst_32 = arith.constant dense<0xFF800000> : vector<2x8xf32>
    %68 = vector.multi_reduction <maximumf>, %67, %cst_32 [2] : vector<2x8x8xf32> to vector<2x8xf32>
    %69 = vector.shape_cast %68 : vector<2x8xf32> to vector<2x8x1xf32>
    %70 = vector.broadcast %69 : vector<2x8x1xf32> to vector<2x8x8xf32>
    %71 = arith.subf %67, %70 : vector<2x8x8xf32>
    %72 = math.exp %71 : vector<2x8x8xf32>
    %cst_33 = arith.constant dense<0.000000e+00> : vector<2x8xf32>
    %73 = vector.multi_reduction <add>, %72, %cst_33 [2] : vector<2x8x8xf32> to vector<2x8xf32>
    %74 = vector.shape_cast %73 : vector<2x8xf32> to vector<2x8x1xf32>
    %75 = tpu.reciprocal %74 {approx = true} : vector<2x8x1xf32> -> vector<2x8x1xf32>
    %76 = vector.broadcast %75 : vector<2x8x1xf32> to vector<2x8x8xf32>
    %77 = arith.mulf %72, %76 : vector<2x8x8xf32>
    %78 = vector.extract_strided_slice %37 {offsets = [0, 0, 8], sizes = [2, 8, 8], strides = [1, 1, 1]} : vector<2x8x32xf32> to vector<2x8x8xf32>
    "tpu.trace_start"() <{level = 10 : i32, message = "bqk,bkd->bqd"}> : () -> ()
    %cst_34 = arith.constant dense<0.000000e+00> : vector<2x8x8xf32>
    %79 = tpu.matmul %77, %78, %cst_34 {dimension_numbers = #tpu.dot_dimension_numbers<[2], [1], [1], [2], [0, 0, 0, 1, 1, 2], [0], [0]>} : vector<2x8x8xf32>, vector<2x8x8xf32>, vector<2x8x8xf32> -> vector<2x8x8xf32>
    "tpu.trace_stop"() : () -> ()
    %80 = vector.shape_cast %79 : vector<2x8x8xf32> to vector<16x8xf32>
    %81 = arith.truncf %80 : vector<16x8xf32> to vector<16x8xbf16>
    %82 = vector.extract_strided_slice %18 {offsets = [8, 0], sizes = [8, 32], strides = [1, 1]} : vector<32x32xbf16> to vector<8x32xbf16>
    %cst_35 = arith.constant dense<0.000000e+00> : vector<16x32xf32>
    %83 = tpu.matmul %81, %82, %cst_35 {dimension_numbers = #tpu.dot_dimension_numbers<[1], [0], [0], [1], [0, 0, 1, 1], [], []>} : vector<16x8xbf16>, vector<8x32xbf16>, vector<16x32xf32> -> vector<16x32xf32>
    %84 = arith.addf %61, %83 : vector<16x32xf32>
    %85 = vector.extract_strided_slice %35 {offsets = [0, 0, 16], sizes = [2, 8, 8], strides = [1, 1, 1]} : vector<2x8x32xf32> to vector<2x8x8xf32>
    %86 = vector.extract_strided_slice %36 {offsets = [0, 0, 16], sizes = [2, 8, 8], strides = [1, 1, 1]} : vector<2x8x32xf32> to vector<2x8x8xf32>
    "tpu.trace_start"() <{level = 10 : i32, message = "bqd,bkd->bqk"}> : () -> ()
    %cst_36 = arith.constant dense<0.000000e+00> : vector<2x8x8xf32>
    %87 = tpu.matmul %85, %86, %cst_36 {dimension_numbers = #tpu.dot_dimension_numbers<[2], [2], [1], [1], [0, 0, 0, 1, 1, 1], [0], [0]>} : vector<2x8x8xf32>, vector<2x8x8xf32>, vector<2x8x8xf32> -> vector<2x8x8xf32>
    "tpu.trace_stop"() : () -> ()
    %cst_37 = arith.constant 0.353553385 : f32
    %88 = vector.broadcast %cst_37 : f32 to vector<2x8x8xf32>
    %89 = arith.mulf %87, %88 : vector<2x8x8xf32>
    %90 = arith.addf %89, %8 : vector<2x8x8xf32>
    %cst_38 = arith.constant dense<0xFF800000> : vector<2x8xf32>
    %91 = vector.multi_reduction <maximumf>, %90, %cst_38 [2] : vector<2x8x8xf32> to vector<2x8xf32>
    %92 = vector.shape_cast %91 : vector<2x8xf32> to vector<2x8x1xf32>
    %93 = vector.broadcast %92 : vector<2x8x1xf32> to vector<2x8x8xf32>
    %94 = arith.subf %90, %93 : vector<2x8x8xf32>
    %95 = math.exp %94 : vector<2x8x8xf32>
    %cst_39 = arith.constant dense<0.000000e+00> : vector<2x8xf32>
    %96 = vector.multi_reduction <add>, %95, %cst_39 [2] : vector<2x8x8xf32> to vector<2x8xf32>
    %97 = vector.shape_cast %96 : vector<2x8xf32> to vector<2x8x1xf32>
    %98 = tpu.reciprocal %97 {approx = true} : vector<2x8x1xf32> -> vector<2x8x1xf32>
    %99 = vector.broadcast %98 : vector<2x8x1xf32> to vector<2x8x8xf32>
    %100 = arith.mulf %95, %99 : vector<2x8x8xf32>
    %101 = vector.extract_strided_slice %37 {offsets = [0, 0, 16], sizes = [2, 8, 8], strides = [1, 1, 1]} : vector<2x8x32xf32> to vector<2x8x8xf32>
    "tpu.trace_start"() <{level = 10 : i32, message = "bqk,bkd->bqd"}> : () -> ()
    %cst_40 = arith.constant dense<0.000000e+00> : vector<2x8x8xf32>
    %102 = tpu.matmul %100, %101, %cst_40 {dimension_numbers = #tpu.dot_dimension_numbers<[2], [1], [1], [2], [0, 0, 0, 1, 1, 2], [0], [0]>} : vector<2x8x8xf32>, vector<2x8x8xf32>, vector<2x8x8xf32> -> vector<2x8x8xf32>
    "tpu.trace_stop"() : () -> ()
    %103 = vector.shape_cast %102 : vector<2x8x8xf32> to vector<16x8xf32>
    %104 = arith.truncf %103 : vector<16x8xf32> to vector<16x8xbf16>
    %105 = vector.extract_strided_slice %18 {offsets = [16, 0], sizes = [8, 32], strides = [1, 1]} : vector<32x32xbf16> to vector<8x32xbf16>
    %cst_41 = arith.constant dense<0.000000e+00> : vector<16x32xf32>
    %106 = tpu.matmul %104, %105, %cst_41 {dimension_numbers = #tpu.dot_dimension_numbers<[1], [0], [0], [1], [0, 0, 1, 1], [], []>} : vector<16x8xbf16>, vector<8x32xbf16>, vector<16x32xf32> -> vector<16x32xf32>
    %107 = arith.addf %84, %106 : vector<16x32xf32>
    %108 = vector.extract_strided_slice %35 {offsets = [0, 0, 24], sizes = [2, 8, 8], strides = [1, 1, 1]} : vector<2x8x32xf32> to vector<2x8x8xf32>
    %109 = vector.extract_strided_slice %36 {offsets = [0, 0, 24], sizes = [2, 8, 8], strides = [1, 1, 1]} : vector<2x8x32xf32> to vector<2x8x8xf32>
    "tpu.trace_start"() <{level = 10 : i32, message = "bqd,bkd->bqk"}> : () -> ()
    %cst_42 = arith.constant dense<0.000000e+00> : vector<2x8x8xf32>
    %110 = tpu.matmul %108, %109, %cst_42 {dimension_numbers = #tpu.dot_dimension_numbers<[2], [2], [1], [1], [0, 0, 0, 1, 1, 1], [0], [0]>} : vector<2x8x8xf32>, vector<2x8x8xf32>, vector<2x8x8xf32> -> vector<2x8x8xf32>
    "tpu.trace_stop"() : () -> ()
    %cst_43 = arith.constant 0.353553385 : f32
    %111 = vector.broadcast %cst_43 : f32 to vector<2x8x8xf32>
    %112 = arith.mulf %110, %111 : vector<2x8x8xf32>
    %113 = arith.addf %112, %8 : vector<2x8x8xf32>
    %cst_44 = arith.constant dense<0xFF800000> : vector<2x8xf32>
    %114 = vector.multi_reduction <maximumf>, %113, %cst_44 [2] : vector<2x8x8xf32> to vector<2x8xf32>
    %115 = vector.shape_cast %114 : vector<2x8xf32> to vector<2x8x1xf32>
    %116 = vector.broadcast %115 : vector<2x8x1xf32> to vector<2x8x8xf32>
    %117 = arith.subf %113, %116 : vector<2x8x8xf32>
    %118 = math.exp %117 : vector<2x8x8xf32>
    %cst_45 = arith.constant dense<0.000000e+00> : vector<2x8xf32>
    %119 = vector.multi_reduction <add>, %118, %cst_45 [2] : vector<2x8x8xf32> to vector<2x8xf32>
    %120 = vector.shape_cast %119 : vector<2x8xf32> to vector<2x8x1xf32>
    %121 = tpu.reciprocal %120 {approx = true} : vector<2x8x1xf32> -> vector<2x8x1xf32>
    %122 = vector.broadcast %121 : vector<2x8x1xf32> to vector<2x8x8xf32>
    %123 = arith.mulf %118, %122 : vector<2x8x8xf32>
    %124 = vector.extract_strided_slice %37 {offsets = [0, 0, 24], sizes = [2, 8, 8], strides = [1, 1, 1]} : vector<2x8x32xf32> to vector<2x8x8xf32>
    "tpu.trace_start"() <{level = 10 : i32, message = "bqk,bkd->bqd"}> : () -> ()
    %cst_46 = arith.constant dense<0.000000e+00> : vector<2x8x8xf32>
    %125 = tpu.matmul %123, %124, %cst_46 {dimension_numbers = #tpu.dot_dimension_numbers<[2], [1], [1], [2], [0, 0, 0, 1, 1, 2], [0], [0]>} : vector<2x8x8xf32>, vector<2x8x8xf32>, vector<2x8x8xf32> -> vector<2x8x8xf32>
    "tpu.trace_stop"() : () -> ()
    %126 = vector.shape_cast %125 : vector<2x8x8xf32> to vector<16x8xf32>
    %127 = arith.truncf %126 : vector<16x8xf32> to vector<16x8xbf16>
    %128 = vector.extract_strided_slice %18 {offsets = [24, 0], sizes = [8, 32], strides = [1, 1]} : vector<32x32xbf16> to vector<8x32xbf16>
    %cst_47 = arith.constant dense<0.000000e+00> : vector<16x32xf32>
    %129 = tpu.matmul %127, %128, %cst_47 {dimension_numbers = #tpu.dot_dimension_numbers<[1], [0], [0], [1], [0, 0, 1, 1], [], []>} : vector<16x8xbf16>, vector<8x32xbf16>, vector<16x32xf32> -> vector<16x32xf32>
    %130 = arith.addf %107, %129 : vector<16x32xf32>
    %131 = vector.broadcast %22 : vector<1x32xf32> to vector<16x32xf32>
    %132 = arith.addf %130, %131 : vector<16x32xf32>
    %133 = arith.addf %10, %132 : vector<16x32xf32>
    %c4 = arith.constant 4 : index
    %c0_48 = arith.constant 0 : index
    %134 = vector.load %arg5[%c4, %c0_48] : memref<30x32xf32, #tpu.memory_space<vmem>>, vector<1x32xf32>
    %c5 = arith.constant 5 : index
    %c0_49 = arith.constant 0 : index
    %135 = vector.load %arg5[%c5, %c0_49] : memref<30x32xf32, #tpu.memory_space<vmem>>, vector<1x32xf32>
    %cst_50 = arith.constant dense<0.000000e+00> : vector<16xf32>
    %136 = vector.multi_reduction <add>, %133, %cst_50 [1] : vector<16x32xf32> to vector<16xf32>
    %137 = vector.shape_cast %136 : vector<16xf32> to vector<16x1xf32>
    %cst_51 = arith.constant 3.200000e+01 : f32
    %138 = vector.broadcast %cst_51 : f32 to vector<16x1xf32>
    %139 = arith.divf %137, %138 : vector<16x1xf32>
    %140 = vector.broadcast %139 : vector<16x1xf32> to vector<16x32xf32>
    %141 = arith.subf %133, %140 : vector<16x32xf32>
    %142 = arith.mulf %141, %141 : vector<16x32xf32>
    %cst_52 = arith.constant dense<0.000000e+00> : vector<16xf32>
    %143 = vector.multi_reduction <add>, %142, %cst_52 [1] : vector<16x32xf32> to vector<16xf32>
    %144 = vector.shape_cast %143 : vector<16xf32> to vector<16x1xf32>
    %cst_53 = arith.constant 3.200000e+01 : f32
    %145 = vector.broadcast %cst_53 : f32 to vector<16x1xf32>
    %146 = arith.divf %144, %145 : vector<16x1xf32>
    %147 = vector.broadcast %139 : vector<16x1xf32> to vector<16x32xf32>
    %148 = arith.subf %133, %147 : vector<16x32xf32>
    %cst_54 = arith.constant 9.99999974E-6 : f32
    %149 = vector.broadcast %cst_54 : f32 to vector<16x1xf32>
    %150 = arith.addf %146, %149 : vector<16x1xf32>
    %151 = math.rsqrt %150 : vector<16x1xf32>
    %152 = vector.broadcast %151 : vector<16x1xf32> to vector<16x32xf32>
    %153 = arith.mulf %148, %152 : vector<16x32xf32>
    %154 = vector.broadcast %134 : vector<1x32xf32> to vector<16x32xf32>
    %155 = arith.mulf %153, %154 : vector<16x32xf32>
    %156 = vector.broadcast %135 : vector<1x32xf32> to vector<16x32xf32>
    %157 = arith.addf %155, %156 : vector<16x32xf32>
    %c0_55 = arith.constant 0 : index
    %c0_56 = arith.constant 0 : index
    %c0_57 = arith.constant 0 : index
    %158 = vector.load %arg4[%c0_55, %c0_56, %c0_57] : memref<4x32x2048xbf16, #tpu.memory_space<vmem>>, vector<1x32x2048xbf16>
    %159 = vector.shape_cast %158 : vector<1x32x2048xbf16> to vector<32x2048xbf16>
    %c1_58 = arith.constant 1 : index
    %c0_59 = arith.constant 0 : index
    %c0_60 = arith.constant 0 : index
    %160 = vector.load %arg4[%c1_58, %c0_59, %c0_60] : memref<4x32x2048xbf16, #tpu.memory_space<vmem>>, vector<1x32x2048xbf16>
    %161 = vector.shape_cast %160 : vector<1x32x2048xbf16> to vector<32x2048xbf16>
    %c0_61 = arith.constant 0 : index
    %c0_62 = arith.constant 0 : index
    %162 = vector.load %arg6[%c0_61, %c0_62] : memref<2x2048xf32, #tpu.memory_space<vmem>>, vector<1x2048xf32>
    %c6 = arith.constant 6 : index
    %c0_63 = arith.constant 0 : index
    %163 = vector.load %arg5[%c6, %c0_63] : memref<30x32xf32, #tpu.memory_space<vmem>>, vector<1x32xf32>
    %164 = arith.truncf %157 : vector<16x32xf32> to vector<16x32xbf16>
    %cst_64 = arith.constant dense<0.000000e+00> : vector<16x2048xf32>
    %165 = tpu.matmul %164, %159, %cst_64 {dimension_numbers = #tpu.dot_dimension_numbers<[1], [0], [0], [1], [0, 0, 1, 1], [], []>} : vector<16x32xbf16>, vector<32x2048xbf16>, vector<16x2048xf32> -> vector<16x2048xf32>
    %166 = vector.broadcast %162 : vector<1x2048xf32> to vector<16x2048xf32>
    %167 = arith.addf %165, %166 : vector<16x2048xf32>
    %cst_65 = arith.constant 0.000000e+00 : f32
    %168 = vector.broadcast %cst_65 : f32 to vector<16x2048xf32>
    %169 = arith.maximumf %167, %168 : vector<16x2048xf32>
    %170 = arith.truncf %169 : vector<16x2048xf32> to vector<16x2048xbf16>
    %cst_66 = arith.constant dense<0.000000e+00> : vector<16x32xf32>
    %171 = tpu.matmul %170, %161, %cst_66 {dimension_numbers = #tpu.dot_dimension_numbers<[1], [1], [0], [0], [0, 0, 1, 0], [], []>} : vector<16x2048xbf16>, vector<32x2048xbf16>, vector<16x32xf32> -> vector<16x32xf32>
    %172 = vector.broadcast %163 : vector<1x32xf32> to vector<16x32xf32>
    %173 = arith.addf %171, %172 : vector<16x32xf32>
    %174 = arith.addf %157, %173 : vector<16x32xf32>
    %c7 = arith.constant 7 : index
    %c0_67 = arith.constant 0 : index
    %175 = vector.load %arg5[%c7, %c0_67] : memref<30x32xf32, #tpu.memory_space<vmem>>, vector<1x32xf32>
    %c8 = arith.constant 8 : index
    %c0_68 = arith.constant 0 : index
    %176 = vector.load %arg5[%c8, %c0_68] : memref<30x32xf32, #tpu.memory_space<vmem>>, vector<1x32xf32>
    %cst_69 = arith.constant dense<0.000000e+00> : vector<16xf32>
    %177 = vector.multi_reduction <add>, %174, %cst_69 [1] : vector<16x32xf32> to vector<16xf32>
    %178 = vector.shape_cast %177 : vector<16xf32> to vector<16x1xf32>
    %cst_70 = arith.constant 3.200000e+01 : f32
    %179 = vector.broadcast %cst_70 : f32 to vector<16x1xf32>
    %180 = arith.divf %178, %179 : vector<16x1xf32>
    %181 = vector.broadcast %180 : vector<16x1xf32> to vector<16x32xf32>
    %182 = arith.subf %174, %181 : vector<16x32xf32>
    %183 = arith.mulf %182, %182 : vector<16x32xf32>
    %cst_71 = arith.constant dense<0.000000e+00> : vector<16xf32>
    %184 = vector.multi_reduction <add>, %183, %cst_71 [1] : vector<16x32xf32> to vector<16xf32>
    %185 = vector.shape_cast %184 : vector<16xf32> to vector<16x1xf32>
    %cst_72 = arith.constant 3.200000e+01 : f32
    %186 = vector.broadcast %cst_72 : f32 to vector<16x1xf32>
    %187 = arith.divf %185, %186 : vector<16x1xf32>
    %188 = vector.broadcast %180 : vector<16x1xf32> to vector<16x32xf32>
    %189 = arith.subf %174, %188 : vector<16x32xf32>
    %cst_73 = arith.constant 9.99999974E-6 : f32
    %190 = vector.broadcast %cst_73 : f32 to vector<16x1xf32>
    %191 = arith.addf %187, %190 : vector<16x1xf32>
    %192 = math.rsqrt %191 : vector<16x1xf32>
    %193 = vector.broadcast %192 : vector<16x1xf32> to vector<16x32xf32>
    %194 = arith.mulf %189, %193 : vector<16x32xf32>
    %195 = vector.broadcast %175 : vector<1x32xf32> to vector<16x32xf32>
    %196 = arith.mulf %194, %195 : vector<16x32xf32>
    %197 = vector.broadcast %176 : vector<1x32xf32> to vector<16x32xf32>
    %198 = arith.addf %196, %197 : vector<16x32xf32>
    %c9 = arith.constant 9 : index
    %c0_74 = arith.constant 0 : index
    %199 = vector.load %arg5[%c9, %c0_74] : memref<30x32xf32, #tpu.memory_space<vmem>>, vector<1x32xf32>
    %c10 = arith.constant 10 : index
    %c0_75 = arith.constant 0 : index
    %200 = vector.load %arg5[%c10, %c0_75] : memref<30x32xf32, #tpu.memory_space<vmem>>, vector<1x32xf32>
    %cst_76 = arith.constant dense<0.000000e+00> : vector<16xf32>
    %201 = vector.multi_reduction <add>, %198, %cst_76 [1] : vector<16x32xf32> to vector<16xf32>
    %202 = vector.shape_cast %201 : vector<16xf32> to vector<16x1xf32>
    %cst_77 = arith.constant 3.200000e+01 : f32
    %203 = vector.broadcast %cst_77 : f32 to vector<16x1xf32>
    %204 = arith.divf %202, %203 : vector<16x1xf32>
    %205 = vector.broadcast %204 : vector<16x1xf32> to vector<16x32xf32>
    %206 = arith.subf %198, %205 : vector<16x32xf32>
    %207 = arith.mulf %206, %206 : vector<16x32xf32>
    %cst_78 = arith.constant dense<0.000000e+00> : vector<16xf32>
    %208 = vector.multi_reduction <add>, %207, %cst_78 [1] : vector<16x32xf32> to vector<16xf32>
    %209 = vector.shape_cast %208 : vector<16xf32> to vector<16x1xf32>
    %cst_79 = arith.constant 3.200000e+01 : f32
    %210 = vector.broadcast %cst_79 : f32 to vector<16x1xf32>
    %211 = arith.divf %209, %210 : vector<16x1xf32>
    %212 = vector.broadcast %204 : vector<16x1xf32> to vector<16x32xf32>
    %213 = arith.subf %198, %212 : vector<16x32xf32>
    %cst_80 = arith.constant 9.99999974E-6 : f32
    %214 = vector.broadcast %cst_80 : f32 to vector<16x1xf32>
    %215 = arith.addf %211, %214 : vector<16x1xf32>
    %216 = math.rsqrt %215 : vector<16x1xf32>
    %217 = vector.broadcast %216 : vector<16x1xf32> to vector<16x32xf32>
    %218 = arith.mulf %213, %217 : vector<16x32xf32>
    %219 = vector.broadcast %199 : vector<1x32xf32> to vector<16x32xf32>
    %220 = arith.mulf %218, %219 : vector<16x32xf32>
    %221 = vector.broadcast %200 : vector<1x32xf32> to vector<16x32xf32>
    %222 = arith.addf %220, %221 : vector<16x32xf32>
    %c0_81 = arith.constant 0 : index
    %c0_82 = arith.constant 0 : index
    %c0_83 = arith.constant 0 : index
    %223 = vector.load %arg2[%c0_81, %c0_82, %c0_83] : memref<2x8x32xf32, #tpu.memory_space<vmem>>, vector<2x8x32xf32>
    %224 = vector.shape_cast %223 : vector<2x8x32xf32> to vector<16x32xf32>
    %c4_84 = arith.constant 4 : index
    %c0_85 = arith.constant 0 : index
    %c0_86 = arith.constant 0 : index
    %225 = vector.load %arg3[%c4_84, %c0_85, %c0_86] : memref<12x32x32xbf16, #tpu.memory_space<vmem>>, vector<1x32x32xbf16>
    %226 = vector.shape_cast %225 : vector<1x32x32xbf16> to vector<32x32xbf16>
    %c5_87 = arith.constant 5 : index
    %c0_88 = arith.constant 0 : index
    %c0_89 = arith.constant 0 : index
    %227 = vector.load %arg3[%c5_87, %c0_88, %c0_89] : memref<12x32x32xbf16, #tpu.memory_space<vmem>>, vector<1x32x32xbf16>
    %228 = vector.shape_cast %227 : vector<1x32x32xbf16> to vector<32x32xbf16>
    %c6_90 = arith.constant 6 : index
    %c0_91 = arith.constant 0 : index
    %c0_92 = arith.constant 0 : index
    %229 = vector.load %arg3[%c6_90, %c0_91, %c0_92] : memref<12x32x32xbf16, #tpu.memory_space<vmem>>, vector<1x32x32xbf16>
    %230 = vector.shape_cast %229 : vector<1x32x32xbf16> to vector<32x32xbf16>
    %c7_93 = arith.constant 7 : index
    %c0_94 = arith.constant 0 : index
    %c0_95 = arith.constant 0 : index
    %231 = vector.load %arg3[%c7_93, %c0_94, %c0_95] : memref<12x32x32xbf16, #tpu.memory_space<vmem>>, vector<1x32x32xbf16>
    %232 = vector.shape_cast %231 : vector<1x32x32xbf16> to vector<32x32xbf16>
    %c11 = arith.constant 11 : index
    %c0_96 = arith.constant 0 : index
    %233 = vector.load %arg5[%c11, %c0_96] : memref<30x32xf32, #tpu.memory_space<vmem>>, vector<1x32xf32>
    %c12 = arith.constant 12 : index
    %c0_97 = arith.constant 0 : index
    %234 = vector.load %arg5[%c12, %c0_97] : memref<30x32xf32, #tpu.memory_space<vmem>>, vector<1x32xf32>
    %c13 = arith.constant 13 : index
    %c0_98 = arith.constant 0 : index
    %235 = vector.load %arg5[%c13, %c0_98] : memref<30x32xf32, #tpu.memory_space<vmem>>, vector<1x32xf32>
    %c14 = arith.constant 14 : index
    %c0_99 = arith.constant 0 : index
    %236 = vector.load %arg5[%c14, %c0_99] : memref<30x32xf32, #tpu.memory_space<vmem>>, vector<1x32xf32>
    %237 = arith.truncf %224 : vector<16x32xf32> to vector<16x32xbf16>
    %cst_100 = arith.constant dense<0.000000e+00> : vector<16x32xf32>
    %238 = tpu.matmul %237, %226, %cst_100 {dimension_numbers = #tpu.dot_dimension_numbers<[1], [0], [0], [1], [0, 0, 1, 1], [], []>} : vector<16x32xbf16>, vector<32x32xbf16>, vector<16x32xf32> -> vector<16x32xf32>
    %239 = vector.broadcast %233 : vector<1x32xf32> to vector<16x32xf32>
    %240 = arith.addf %238, %239 : vector<16x32xf32>
    %241 = arith.truncf %224 : vector<16x32xf32> to vector<16x32xbf16>
    %cst_101 = arith.constant dense<0.000000e+00> : vector<16x32xf32>
    %242 = tpu.matmul %241, %228, %cst_101 {dimension_numbers = #tpu.dot_dimension_numbers<[1], [0], [0], [1], [0, 0, 1, 1], [], []>} : vector<16x32xbf16>, vector<32x32xbf16>, vector<16x32xf32> -> vector<16x32xf32>
    %243 = vector.broadcast %234 : vector<1x32xf32> to vector<16x32xf32>
    %244 = arith.addf %242, %243 : vector<16x32xf32>
    %245 = arith.truncf %224 : vector<16x32xf32> to vector<16x32xbf16>
    %cst_102 = arith.constant dense<0.000000e+00> : vector<16x32xf32>
    %246 = tpu.matmul %245, %230, %cst_102 {dimension_numbers = #tpu.dot_dimension_numbers<[1], [0], [0], [1], [0, 0, 1, 1], [], []>} : vector<16x32xbf16>, vector<32x32xbf16>, vector<16x32xf32> -> vector<16x32xf32>
    %247 = vector.broadcast %235 : vector<1x32xf32> to vector<16x32xf32>
    %248 = arith.addf %246, %247 : vector<16x32xf32>
    %249 = vector.shape_cast %240 : vector<16x32xf32> to vector<2x8x32xf32>
    %250 = vector.shape_cast %244 : vector<16x32xf32> to vector<2x8x32xf32>
    %251 = vector.shape_cast %248 : vector<16x32xf32> to vector<2x8x32xf32>
    %cst_103 = arith.constant 0.000000e+00 : f32
    %252 = vector.broadcast %cst_103 : f32 to vector<16x32xf32>
    %253 = vector.extract_strided_slice %249 {offsets = [0, 0, 0], sizes = [2, 8, 8], strides = [1, 1, 1]} : vector<2x8x32xf32> to vector<2x8x8xf32>
    %254 = vector.extract_strided_slice %250 {offsets = [0, 0, 0], sizes = [2, 8, 8], strides = [1, 1, 1]} : vector<2x8x32xf32> to vector<2x8x8xf32>
    "tpu.trace_start"() <{level = 10 : i32, message = "bqd,bkd->bqk"}> : () -> ()
    %cst_104 = arith.constant dense<0.000000e+00> : vector<2x8x8xf32>
    %255 = tpu.matmul %253, %254, %cst_104 {dimension_numbers = #tpu.dot_dimension_numbers<[2], [2], [1], [1], [0, 0, 0, 1, 1, 1], [0], [0]>} : vector<2x8x8xf32>, vector<2x8x8xf32>, vector<2x8x8xf32> -> vector<2x8x8xf32>
    "tpu.trace_stop"() : () -> ()
    %cst_105 = arith.constant 0.353553385 : f32
    %256 = vector.broadcast %cst_105 : f32 to vector<2x8x8xf32>
    %257 = arith.mulf %255, %256 : vector<2x8x8xf32>
    %258 = arith.addf %257, %8 : vector<2x8x8xf32>
    %cst_106 = arith.constant dense<0xFF800000> : vector<2x8xf32>
    %259 = vector.multi_reduction <maximumf>, %258, %cst_106 [2] : vector<2x8x8xf32> to vector<2x8xf32>
    %260 = vector.shape_cast %259 : vector<2x8xf32> to vector<2x8x1xf32>
    %261 = vector.broadcast %260 : vector<2x8x1xf32> to vector<2x8x8xf32>
    %262 = arith.subf %258, %261 : vector<2x8x8xf32>
    %263 = math.exp %262 : vector<2x8x8xf32>
    %cst_107 = arith.constant dense<0.000000e+00> : vector<2x8xf32>
    %264 = vector.multi_reduction <add>, %263, %cst_107 [2] : vector<2x8x8xf32> to vector<2x8xf32>
    %265 = vector.shape_cast %264 : vector<2x8xf32> to vector<2x8x1xf32>
    %266 = tpu.reciprocal %265 {approx = true} : vector<2x8x1xf32> -> vector<2x8x1xf32>
    %267 = vector.broadcast %266 : vector<2x8x1xf32> to vector<2x8x8xf32>
    %268 = arith.mulf %263, %267 : vector<2x8x8xf32>
    %269 = vector.extract_strided_slice %251 {offsets = [0, 0, 0], sizes = [2, 8, 8], strides = [1, 1, 1]} : vector<2x8x32xf32> to vector<2x8x8xf32>
    "tpu.trace_start"() <{level = 10 : i32, message = "bqk,bkd->bqd"}> : () -> ()
    %cst_108 = arith.constant dense<0.000000e+00> : vector<2x8x8xf32>
    %270 = tpu.matmul %268, %269, %cst_108 {dimension_numbers = #tpu.dot_dimension_numbers<[2], [1], [1], [2], [0, 0, 0, 1, 1, 2], [0], [0]>} : vector<2x8x8xf32>, vector<2x8x8xf32>, vector<2x8x8xf32> -> vector<2x8x8xf32>
    "tpu.trace_stop"() : () -> ()
    %271 = vector.shape_cast %270 : vector<2x8x8xf32> to vector<16x8xf32>
    %272 = arith.truncf %271 : vector<16x8xf32> to vector<16x8xbf16>
    %273 = vector.extract_strided_slice %232 {offsets = [0, 0], sizes = [8, 32], strides = [1, 1]} : vector<32x32xbf16> to vector<8x32xbf16>
    %cst_109 = arith.constant dense<0.000000e+00> : vector<16x32xf32>
    %274 = tpu.matmul %272, %273, %cst_109 {dimension_numbers = #tpu.dot_dimension_numbers<[1], [0], [0], [1], [0, 0, 1, 1], [], []>} : vector<16x8xbf16>, vector<8x32xbf16>, vector<16x32xf32> -> vector<16x32xf32>
    %275 = arith.addf %252, %274 : vector<16x32xf32>
    %276 = vector.extract_strided_slice %249 {offsets = [0, 0, 8], sizes = [2, 8, 8], strides = [1, 1, 1]} : vector<2x8x32xf32> to vector<2x8x8xf32>
    %277 = vector.extract_strided_slice %250 {offsets = [0, 0, 8], sizes = [2, 8, 8], strides = [1, 1, 1]} : vector<2x8x32xf32> to vector<2x8x8xf32>
    "tpu.trace_start"() <{level = 10 : i32, message = "bqd,bkd->bqk"}> : () -> ()
    %cst_110 = arith.constant dense<0.000000e+00> : vector<2x8x8xf32>
    %278 = tpu.matmul %276, %277, %cst_110 {dimension_numbers = #tpu.dot_dimension_numbers<[2], [2], [1], [1], [0, 0, 0, 1, 1, 1], [0], [0]>} : vector<2x8x8xf32>, vector<2x8x8xf32>, vector<2x8x8xf32> -> vector<2x8x8xf32>
    "tpu.trace_stop"() : () -> ()
    %cst_111 = arith.constant 0.353553385 : f32
    %279 = vector.broadcast %cst_111 : f32 to vector<2x8x8xf32>
    %280 = arith.mulf %278, %279 : vector<2x8x8xf32>
    %281 = arith.addf %280, %8 : vector<2x8x8xf32>
    %cst_112 = arith.constant dense<0xFF800000> : vector<2x8xf32>
    %282 = vector.multi_reduction <maximumf>, %281, %cst_112 [2] : vector<2x8x8xf32> to vector<2x8xf32>
    %283 = vector.shape_cast %282 : vector<2x8xf32> to vector<2x8x1xf32>
    %284 = vector.broadcast %283 : vector<2x8x1xf32> to vector<2x8x8xf32>
    %285 = arith.subf %281, %284 : vector<2x8x8xf32>
    %286 = math.exp %285 : vector<2x8x8xf32>
    %cst_113 = arith.constant dense<0.000000e+00> : vector<2x8xf32>
    %287 = vector.multi_reduction <add>, %286, %cst_113 [2] : vector<2x8x8xf32> to vector<2x8xf32>
    %288 = vector.shape_cast %287 : vector<2x8xf32> to vector<2x8x1xf32>
    %289 = tpu.reciprocal %288 {approx = true} : vector<2x8x1xf32> -> vector<2x8x1xf32>
    %290 = vector.broadcast %289 : vector<2x8x1xf32> to vector<2x8x8xf32>
    %291 = arith.mulf %286, %290 : vector<2x8x8xf32>
    %292 = vector.extract_strided_slice %251 {offsets = [0, 0, 8], sizes = [2, 8, 8], strides = [1, 1, 1]} : vector<2x8x32xf32> to vector<2x8x8xf32>
    "tpu.trace_start"() <{level = 10 : i32, message = "bqk,bkd->bqd"}> : () -> ()
    %cst_114 = arith.constant dense<0.000000e+00> : vector<2x8x8xf32>
    %293 = tpu.matmul %291, %292, %cst_114 {dimension_numbers = #tpu.dot_dimension_numbers<[2], [1], [1], [2], [0, 0, 0, 1, 1, 2], [0], [0]>} : vector<2x8x8xf32>, vector<2x8x8xf32>, vector<2x8x8xf32> -> vector<2x8x8xf32>
    "tpu.trace_stop"() : () -> ()
    %294 = vector.shape_cast %293 : vector<2x8x8xf32> to vector<16x8xf32>
    %295 = arith.truncf %294 : vector<16x8xf32> to vector<16x8xbf16>
    %296 = vector.extract_strided_slice %232 {offsets = [8, 0], sizes = [8, 32], strides = [1, 1]} : vector<32x32xbf16> to vector<8x32xbf16>
    %cst_115 = arith.constant dense<0.000000e+00> : vector<16x32xf32>
    %297 = tpu.matmul %295, %296, %cst_115 {dimension_numbers = #tpu.dot_dimension_numbers<[1], [0], [0], [1], [0, 0, 1, 1], [], []>} : vector<16x8xbf16>, vector<8x32xbf16>, vector<16x32xf32> -> vector<16x32xf32>
    %298 = arith.addf %275, %297 : vector<16x32xf32>
    %299 = vector.extract_strided_slice %249 {offsets = [0, 0, 16], sizes = [2, 8, 8], strides = [1, 1, 1]} : vector<2x8x32xf32> to vector<2x8x8xf32>
    %300 = vector.extract_strided_slice %250 {offsets = [0, 0, 16], sizes = [2, 8, 8], strides = [1, 1, 1]} : vector<2x8x32xf32> to vector<2x8x8xf32>
    "tpu.trace_start"() <{level = 10 : i32, message = "bqd,bkd->bqk"}> : () -> ()
    %cst_116 = arith.constant dense<0.000000e+00> : vector<2x8x8xf32>
    %301 = tpu.matmul %299, %300, %cst_116 {dimension_numbers = #tpu.dot_dimension_numbers<[2], [2], [1], [1], [0, 0, 0, 1, 1, 1], [0], [0]>} : vector<2x8x8xf32>, vector<2x8x8xf32>, vector<2x8x8xf32> -> vector<2x8x8xf32>
    "tpu.trace_stop"() : () -> ()
    %cst_117 = arith.constant 0.353553385 : f32
    %302 = vector.broadcast %cst_117 : f32 to vector<2x8x8xf32>
    %303 = arith.mulf %301, %302 : vector<2x8x8xf32>
    %304 = arith.addf %303, %8 : vector<2x8x8xf32>
    %cst_118 = arith.constant dense<0xFF800000> : vector<2x8xf32>
    %305 = vector.multi_reduction <maximumf>, %304, %cst_118 [2] : vector<2x8x8xf32> to vector<2x8xf32>
    %306 = vector.shape_cast %305 : vector<2x8xf32> to vector<2x8x1xf32>
    %307 = vector.broadcast %306 : vector<2x8x1xf32> to vector<2x8x8xf32>
    %308 = arith.subf %304, %307 : vector<2x8x8xf32>
    %309 = math.exp %308 : vector<2x8x8xf32>
    %cst_119 = arith.constant dense<0.000000e+00> : vector<2x8xf32>
    %310 = vector.multi_reduction <add>, %309, %cst_119 [2] : vector<2x8x8xf32> to vector<2x8xf32>
    %311 = vector.shape_cast %310 : vector<2x8xf32> to vector<2x8x1xf32>
    %312 = tpu.reciprocal %311 {approx = true} : vector<2x8x1xf32> -> vector<2x8x1xf32>
    %313 = vector.broadcast %312 : vector<2x8x1xf32> to vector<2x8x8xf32>
    %314 = arith.mulf %309, %313 : vector<2x8x8xf32>
    %315 = vector.extract_strided_slice %251 {offsets = [0, 0, 16], sizes = [2, 8, 8], strides = [1, 1, 1]} : vector<2x8x32xf32> to vector<2x8x8xf32>
    "tpu.trace_start"() <{level = 10 : i32, message = "bqk,bkd->bqd"}> : () -> ()
    %cst_120 = arith.constant dense<0.000000e+00> : vector<2x8x8xf32>
    %316 = tpu.matmul %314, %315, %cst_120 {dimension_numbers = #tpu.dot_dimension_numbers<[2], [1], [1], [2], [0, 0, 0, 1, 1, 2], [0], [0]>} : vector<2x8x8xf32>, vector<2x8x8xf32>, vector<2x8x8xf32> -> vector<2x8x8xf32>
    "tpu.trace_stop"() : () -> ()
    %317 = vector.shape_cast %316 : vector<2x8x8xf32> to vector<16x8xf32>
    %318 = arith.truncf %317 : vector<16x8xf32> to vector<16x8xbf16>
    %319 = vector.extract_strided_slice %232 {offsets = [16, 0], sizes = [8, 32], strides = [1, 1]} : vector<32x32xbf16> to vector<8x32xbf16>
    %cst_121 = arith.constant dense<0.000000e+00> : vector<16x32xf32>
    %320 = tpu.matmul %318, %319, %cst_121 {dimension_numbers = #tpu.dot_dimension_numbers<[1], [0], [0], [1], [0, 0, 1, 1], [], []>} : vector<16x8xbf16>, vector<8x32xbf16>, vector<16x32xf32> -> vector<16x32xf32>
    %321 = arith.addf %298, %320 : vector<16x32xf32>
    %322 = vector.extract_strided_slice %249 {offsets = [0, 0, 24], sizes = [2, 8, 8], strides = [1, 1, 1]} : vector<2x8x32xf32> to vector<2x8x8xf32>
    %323 = vector.extract_strided_slice %250 {offsets = [0, 0, 24], sizes = [2, 8, 8], strides = [1, 1, 1]} : vector<2x8x32xf32> to vector<2x8x8xf32>
    "tpu.trace_start"() <{level = 10 : i32, message = "bqd,bkd->bqk"}> : () -> ()
    %cst_122 = arith.constant dense<0.000000e+00> : vector<2x8x8xf32>
    %324 = tpu.matmul %322, %323, %cst_122 {dimension_numbers = #tpu.dot_dimension_numbers<[2], [2], [1], [1], [0, 0, 0, 1, 1, 1], [0], [0]>} : vector<2x8x8xf32>, vector<2x8x8xf32>, vector<2x8x8xf32> -> vector<2x8x8xf32>
    "tpu.trace_stop"() : () -> ()
    %cst_123 = arith.constant 0.353553385 : f32
    %325 = vector.broadcast %cst_123 : f32 to vector<2x8x8xf32>
    %326 = arith.mulf %324, %325 : vector<2x8x8xf32>
    %327 = arith.addf %326, %8 : vector<2x8x8xf32>
    %cst_124 = arith.constant dense<0xFF800000> : vector<2x8xf32>
    %328 = vector.multi_reduction <maximumf>, %327, %cst_124 [2] : vector<2x8x8xf32> to vector<2x8xf32>
    %329 = vector.shape_cast %328 : vector<2x8xf32> to vector<2x8x1xf32>
    %330 = vector.broadcast %329 : vector<2x8x1xf32> to vector<2x8x8xf32>
    %331 = arith.subf %327, %330 : vector<2x8x8xf32>
    %332 = math.exp %331 : vector<2x8x8xf32>
    %cst_125 = arith.constant dense<0.000000e+00> : vector<2x8xf32>
    %333 = vector.multi_reduction <add>, %332, %cst_125 [2] : vector<2x8x8xf32> to vector<2x8xf32>
    %334 = vector.shape_cast %333 : vector<2x8xf32> to vector<2x8x1xf32>
    %335 = tpu.reciprocal %334 {approx = true} : vector<2x8x1xf32> -> vector<2x8x1xf32>
    %336 = vector.broadcast %335 : vector<2x8x1xf32> to vector<2x8x8xf32>
    %337 = arith.mulf %332, %336 : vector<2x8x8xf32>
    %338 = vector.extract_strided_slice %251 {offsets = [0, 0, 24], sizes = [2, 8, 8], strides = [1, 1, 1]} : vector<2x8x32xf32> to vector<2x8x8xf32>
    "tpu.trace_start"() <{level = 10 : i32, message = "bqk,bkd->bqd"}> : () -> ()
    %cst_126 = arith.constant dense<0.000000e+00> : vector<2x8x8xf32>
    %339 = tpu.matmul %337, %338, %cst_126 {dimension_numbers = #tpu.dot_dimension_numbers<[2], [1], [1], [2], [0, 0, 0, 1, 1, 2], [0], [0]>} : vector<2x8x8xf32>, vector<2x8x8xf32>, vector<2x8x8xf32> -> vector<2x8x8xf32>
    "tpu.trace_stop"() : () -> ()
    %340 = vector.shape_cast %339 : vector<2x8x8xf32> to vector<16x8xf32>
    %341 = arith.truncf %340 : vector<16x8xf32> to vector<16x8xbf16>
    %342 = vector.extract_strided_slice %232 {offsets = [24, 0], sizes = [8, 32], strides = [1, 1]} : vector<32x32xbf16> to vector<8x32xbf16>
    %cst_127 = arith.constant dense<0.000000e+00> : vector<16x32xf32>
    %343 = tpu.matmul %341, %342, %cst_127 {dimension_numbers = #tpu.dot_dimension_numbers<[1], [0], [0], [1], [0, 0, 1, 1], [], []>} : vector<16x8xbf16>, vector<8x32xbf16>, vector<16x32xf32> -> vector<16x32xf32>
    %344 = arith.addf %321, %343 : vector<16x32xf32>
    %345 = vector.broadcast %236 : vector<1x32xf32> to vector<16x32xf32>
    %346 = arith.addf %344, %345 : vector<16x32xf32>
    %347 = arith.addf %224, %346 : vector<16x32xf32>
    %c15 = arith.constant 15 : index
    %c0_128 = arith.constant 0 : index
    %348 = vector.load %arg5[%c15, %c0_128] : memref<30x32xf32, #tpu.memory_space<vmem>>, vector<1x32xf32>
    %c16 = arith.constant 16 : index
    %c0_129 = arith.constant 0 : index
    %349 = vector.load %arg5[%c16, %c0_129] : memref<30x32xf32, #tpu.memory_space<vmem>>, vector<1x32xf32>
    %cst_130 = arith.constant dense<0.000000e+00> : vector<16xf32>
    %350 = vector.multi_reduction <add>, %347, %cst_130 [1] : vector<16x32xf32> to vector<16xf32>
    %351 = vector.shape_cast %350 : vector<16xf32> to vector<16x1xf32>
    %cst_131 = arith.constant 3.200000e+01 : f32
    %352 = vector.broadcast %cst_131 : f32 to vector<16x1xf32>
    %353 = arith.divf %351, %352 : vector<16x1xf32>
    %354 = vector.broadcast %353 : vector<16x1xf32> to vector<16x32xf32>
    %355 = arith.subf %347, %354 : vector<16x32xf32>
    %356 = arith.mulf %355, %355 : vector<16x32xf32>
    %cst_132 = arith.constant dense<0.000000e+00> : vector<16xf32>
    %357 = vector.multi_reduction <add>, %356, %cst_132 [1] : vector<16x32xf32> to vector<16xf32>
    %358 = vector.shape_cast %357 : vector<16xf32> to vector<16x1xf32>
    %cst_133 = arith.constant 3.200000e+01 : f32
    %359 = vector.broadcast %cst_133 : f32 to vector<16x1xf32>
    %360 = arith.divf %358, %359 : vector<16x1xf32>
    %361 = vector.broadcast %353 : vector<16x1xf32> to vector<16x32xf32>
    %362 = arith.subf %347, %361 : vector<16x32xf32>
    %cst_134 = arith.constant 9.99999974E-6 : f32
    %363 = vector.broadcast %cst_134 : f32 to vector<16x1xf32>
    %364 = arith.addf %360, %363 : vector<16x1xf32>
    %365 = math.rsqrt %364 : vector<16x1xf32>
    %366 = vector.broadcast %365 : vector<16x1xf32> to vector<16x32xf32>
    %367 = arith.mulf %362, %366 : vector<16x32xf32>
    %368 = vector.broadcast %348 : vector<1x32xf32> to vector<16x32xf32>
    %369 = arith.mulf %367, %368 : vector<16x32xf32>
    %370 = vector.broadcast %349 : vector<1x32xf32> to vector<16x32xf32>
    %371 = arith.addf %369, %370 : vector<16x32xf32>
    %c8_135 = arith.constant 8 : index
    %c0_136 = arith.constant 0 : index
    %c0_137 = arith.constant 0 : index
    %372 = vector.load %arg3[%c8_135, %c0_136, %c0_137] : memref<12x32x32xbf16, #tpu.memory_space<vmem>>, vector<1x32x32xbf16>
    %373 = vector.shape_cast %372 : vector<1x32x32xbf16> to vector<32x32xbf16>
    %c9_138 = arith.constant 9 : index
    %c0_139 = arith.constant 0 : index
    %c0_140 = arith.constant 0 : index
    %374 = vector.load %arg3[%c9_138, %c0_139, %c0_140] : memref<12x32x32xbf16, #tpu.memory_space<vmem>>, vector<1x32x32xbf16>
    %375 = vector.shape_cast %374 : vector<1x32x32xbf16> to vector<32x32xbf16>
    %c10_141 = arith.constant 10 : index
    %c0_142 = arith.constant 0 : index
    %c0_143 = arith.constant 0 : index
    %376 = vector.load %arg3[%c10_141, %c0_142, %c0_143] : memref<12x32x32xbf16, #tpu.memory_space<vmem>>, vector<1x32x32xbf16>
    %377 = vector.shape_cast %376 : vector<1x32x32xbf16> to vector<32x32xbf16>
    %c11_144 = arith.constant 11 : index
    %c0_145 = arith.constant 0 : index
    %c0_146 = arith.constant 0 : index
    %378 = vector.load %arg3[%c11_144, %c0_145, %c0_146] : memref<12x32x32xbf16, #tpu.memory_space<vmem>>, vector<1x32x32xbf16>
    %379 = vector.shape_cast %378 : vector<1x32x32xbf16> to vector<32x32xbf16>
    %c17 = arith.constant 17 : index
    %c0_147 = arith.constant 0 : index
    %380 = vector.load %arg5[%c17, %c0_147] : memref<30x32xf32, #tpu.memory_space<vmem>>, vector<1x32xf32>
    %c18 = arith.constant 18 : index
    %c0_148 = arith.constant 0 : index
    %381 = vector.load %arg5[%c18, %c0_148] : memref<30x32xf32, #tpu.memory_space<vmem>>, vector<1x32xf32>
    %c19 = arith.constant 19 : index
    %c0_149 = arith.constant 0 : index
    %382 = vector.load %arg5[%c19, %c0_149] : memref<30x32xf32, #tpu.memory_space<vmem>>, vector<1x32xf32>
    %c20 = arith.constant 20 : index
    %c0_150 = arith.constant 0 : index
    %383 = vector.load %arg5[%c20, %c0_150] : memref<30x32xf32, #tpu.memory_space<vmem>>, vector<1x32xf32>
    %384 = arith.truncf %371 : vector<16x32xf32> to vector<16x32xbf16>
    %cst_151 = arith.constant dense<0.000000e+00> : vector<16x32xf32>
    %385 = tpu.matmul %384, %373, %cst_151 {dimension_numbers = #tpu.dot_dimension_numbers<[1], [0], [0], [1], [0, 0, 1, 1], [], []>} : vector<16x32xbf16>, vector<32x32xbf16>, vector<16x32xf32> -> vector<16x32xf32>
    %386 = vector.broadcast %380 : vector<1x32xf32> to vector<16x32xf32>
    %387 = arith.addf %385, %386 : vector<16x32xf32>
    %388 = arith.truncf %222 : vector<16x32xf32> to vector<16x32xbf16>
    %cst_152 = arith.constant dense<0.000000e+00> : vector<16x32xf32>
    %389 = tpu.matmul %388, %375, %cst_152 {dimension_numbers = #tpu.dot_dimension_numbers<[1], [0], [0], [1], [0, 0, 1, 1], [], []>} : vector<16x32xbf16>, vector<32x32xbf16>, vector<16x32xf32> -> vector<16x32xf32>
    %390 = vector.broadcast %381 : vector<1x32xf32> to vector<16x32xf32>
    %391 = arith.addf %389, %390 : vector<16x32xf32>
    %392 = arith.truncf %222 : vector<16x32xf32> to vector<16x32xbf16>
    %cst_153 = arith.constant dense<0.000000e+00> : vector<16x32xf32>
    %393 = tpu.matmul %392, %377, %cst_153 {dimension_numbers = #tpu.dot_dimension_numbers<[1], [0], [0], [1], [0, 0, 1, 1], [], []>} : vector<16x32xbf16>, vector<32x32xbf16>, vector<16x32xf32> -> vector<16x32xf32>
    %394 = vector.broadcast %382 : vector<1x32xf32> to vector<16x32xf32>
    %395 = arith.addf %393, %394 : vector<16x32xf32>
    %396 = vector.shape_cast %387 : vector<16x32xf32> to vector<2x8x32xf32>
    %397 = vector.shape_cast %391 : vector<16x32xf32> to vector<2x8x32xf32>
    %398 = vector.shape_cast %395 : vector<16x32xf32> to vector<2x8x32xf32>
    %cst_154 = arith.constant 0.000000e+00 : f32
    %399 = vector.broadcast %cst_154 : f32 to vector<16x32xf32>
    %400 = vector.extract_strided_slice %396 {offsets = [0, 0, 0], sizes = [2, 8, 8], strides = [1, 1, 1]} : vector<2x8x32xf32> to vector<2x8x8xf32>
    %401 = vector.extract_strided_slice %397 {offsets = [0, 0, 0], sizes = [2, 8, 8], strides = [1, 1, 1]} : vector<2x8x32xf32> to vector<2x8x8xf32>
    "tpu.trace_start"() <{level = 10 : i32, message = "bqd,bkd->bqk"}> : () -> ()
    %cst_155 = arith.constant dense<0.000000e+00> : vector<2x8x8xf32>
    %402 = tpu.matmul %400, %401, %cst_155 {dimension_numbers = #tpu.dot_dimension_numbers<[2], [2], [1], [1], [0, 0, 0, 1, 1, 1], [0], [0]>} : vector<2x8x8xf32>, vector<2x8x8xf32>, vector<2x8x8xf32> -> vector<2x8x8xf32>
    "tpu.trace_stop"() : () -> ()
    %cst_156 = arith.constant 0.353553385 : f32
    %403 = vector.broadcast %cst_156 : f32 to vector<2x8x8xf32>
    %404 = arith.mulf %402, %403 : vector<2x8x8xf32>
    %405 = arith.addf %404, %8 : vector<2x8x8xf32>
    %cst_157 = arith.constant dense<0xFF800000> : vector<2x8xf32>
    %406 = vector.multi_reduction <maximumf>, %405, %cst_157 [2] : vector<2x8x8xf32> to vector<2x8xf32>
    %407 = vector.shape_cast %406 : vector<2x8xf32> to vector<2x8x1xf32>
    %408 = vector.broadcast %407 : vector<2x8x1xf32> to vector<2x8x8xf32>
    %409 = arith.subf %405, %408 : vector<2x8x8xf32>
    %410 = math.exp %409 : vector<2x8x8xf32>
    %cst_158 = arith.constant dense<0.000000e+00> : vector<2x8xf32>
    %411 = vector.multi_reduction <add>, %410, %cst_158 [2] : vector<2x8x8xf32> to vector<2x8xf32>
    %412 = vector.shape_cast %411 : vector<2x8xf32> to vector<2x8x1xf32>
    %413 = tpu.reciprocal %412 {approx = true} : vector<2x8x1xf32> -> vector<2x8x1xf32>
    %414 = vector.broadcast %413 : vector<2x8x1xf32> to vector<2x8x8xf32>
    %415 = arith.mulf %410, %414 : vector<2x8x8xf32>
    %416 = vector.extract_strided_slice %398 {offsets = [0, 0, 0], sizes = [2, 8, 8], strides = [1, 1, 1]} : vector<2x8x32xf32> to vector<2x8x8xf32>
    "tpu.trace_start"() <{level = 10 : i32, message = "bqk,bkd->bqd"}> : () -> ()
    %cst_159 = arith.constant dense<0.000000e+00> : vector<2x8x8xf32>
    %417 = tpu.matmul %415, %416, %cst_159 {dimension_numbers = #tpu.dot_dimension_numbers<[2], [1], [1], [2], [0, 0, 0, 1, 1, 2], [0], [0]>} : vector<2x8x8xf32>, vector<2x8x8xf32>, vector<2x8x8xf32> -> vector<2x8x8xf32>
    "tpu.trace_stop"() : () -> ()
    %418 = vector.shape_cast %417 : vector<2x8x8xf32> to vector<16x8xf32>
    %419 = arith.truncf %418 : vector<16x8xf32> to vector<16x8xbf16>
    %420 = vector.extract_strided_slice %379 {offsets = [0, 0], sizes = [8, 32], strides = [1, 1]} : vector<32x32xbf16> to vector<8x32xbf16>
    %cst_160 = arith.constant dense<0.000000e+00> : vector<16x32xf32>
    %421 = tpu.matmul %419, %420, %cst_160 {dimension_numbers = #tpu.dot_dimension_numbers<[1], [0], [0], [1], [0, 0, 1, 1], [], []>} : vector<16x8xbf16>, vector<8x32xbf16>, vector<16x32xf32> -> vector<16x32xf32>
    %422 = arith.addf %399, %421 : vector<16x32xf32>
    %423 = vector.extract_strided_slice %396 {offsets = [0, 0, 8], sizes = [2, 8, 8], strides = [1, 1, 1]} : vector<2x8x32xf32> to vector<2x8x8xf32>
    %424 = vector.extract_strided_slice %397 {offsets = [0, 0, 8], sizes = [2, 8, 8], strides = [1, 1, 1]} : vector<2x8x32xf32> to vector<2x8x8xf32>
    "tpu.trace_start"() <{level = 10 : i32, message = "bqd,bkd->bqk"}> : () -> ()
    %cst_161 = arith.constant dense<0.000000e+00> : vector<2x8x8xf32>
    %425 = tpu.matmul %423, %424, %cst_161 {dimension_numbers = #tpu.dot_dimension_numbers<[2], [2], [1], [1], [0, 0, 0, 1, 1, 1], [0], [0]>} : vector<2x8x8xf32>, vector<2x8x8xf32>, vector<2x8x8xf32> -> vector<2x8x8xf32>
    "tpu.trace_stop"() : () -> ()
    %cst_162 = arith.constant 0.353553385 : f32
    %426 = vector.broadcast %cst_162 : f32 to vector<2x8x8xf32>
    %427 = arith.mulf %425, %426 : vector<2x8x8xf32>
    %428 = arith.addf %427, %8 : vector<2x8x8xf32>
    %cst_163 = arith.constant dense<0xFF800000> : vector<2x8xf32>
    %429 = vector.multi_reduction <maximumf>, %428, %cst_163 [2] : vector<2x8x8xf32> to vector<2x8xf32>
    %430 = vector.shape_cast %429 : vector<2x8xf32> to vector<2x8x1xf32>
    %431 = vector.broadcast %430 : vector<2x8x1xf32> to vector<2x8x8xf32>
    %432 = arith.subf %428, %431 : vector<2x8x8xf32>
    %433 = math.exp %432 : vector<2x8x8xf32>
    %cst_164 = arith.constant dense<0.000000e+00> : vector<2x8xf32>
    %434 = vector.multi_reduction <add>, %433, %cst_164 [2] : vector<2x8x8xf32> to vector<2x8xf32>
    %435 = vector.shape_cast %434 : vector<2x8xf32> to vector<2x8x1xf32>
    %436 = tpu.reciprocal %435 {approx = true} : vector<2x8x1xf32> -> vector<2x8x1xf32>
    %437 = vector.broadcast %436 : vector<2x8x1xf32> to vector<2x8x8xf32>
    %438 = arith.mulf %433, %437 : vector<2x8x8xf32>
    %439 = vector.extract_strided_slice %398 {offsets = [0, 0, 8], sizes = [2, 8, 8], strides = [1, 1, 1]} : vector<2x8x32xf32> to vector<2x8x8xf32>
    "tpu.trace_start"() <{level = 10 : i32, message = "bqk,bkd->bqd"}> : () -> ()
    %cst_165 = arith.constant dense<0.000000e+00> : vector<2x8x8xf32>
    %440 = tpu.matmul %438, %439, %cst_165 {dimension_numbers = #tpu.dot_dimension_numbers<[2], [1], [1], [2], [0, 0, 0, 1, 1, 2], [0], [0]>} : vector<2x8x8xf32>, vector<2x8x8xf32>, vector<2x8x8xf32> -> vector<2x8x8xf32>
    "tpu.trace_stop"() : () -> ()
    %441 = vector.shape_cast %440 : vector<2x8x8xf32> to vector<16x8xf32>
    %442 = arith.truncf %441 : vector<16x8xf32> to vector<16x8xbf16>
    %443 = vector.extract_strided_slice %379 {offsets = [8, 0], sizes = [8, 32], strides = [1, 1]} : vector<32x32xbf16> to vector<8x32xbf16>
    %cst_166 = arith.constant dense<0.000000e+00> : vector<16x32xf32>
    %444 = tpu.matmul %442, %443, %cst_166 {dimension_numbers = #tpu.dot_dimension_numbers<[1], [0], [0], [1], [0, 0, 1, 1], [], []>} : vector<16x8xbf16>, vector<8x32xbf16>, vector<16x32xf32> -> vector<16x32xf32>
    %445 = arith.addf %422, %444 : vector<16x32xf32>
    %446 = vector.extract_strided_slice %396 {offsets = [0, 0, 16], sizes = [2, 8, 8], strides = [1, 1, 1]} : vector<2x8x32xf32> to vector<2x8x8xf32>
    %447 = vector.extract_strided_slice %397 {offsets = [0, 0, 16], sizes = [2, 8, 8], strides = [1, 1, 1]} : vector<2x8x32xf32> to vector<2x8x8xf32>
    "tpu.trace_start"() <{level = 10 : i32, message = "bqd,bkd->bqk"}> : () -> ()
    %cst_167 = arith.constant dense<0.000000e+00> : vector<2x8x8xf32>
    %448 = tpu.matmul %446, %447, %cst_167 {dimension_numbers = #tpu.dot_dimension_numbers<[2], [2], [1], [1], [0, 0, 0, 1, 1, 1], [0], [0]>} : vector<2x8x8xf32>, vector<2x8x8xf32>, vector<2x8x8xf32> -> vector<2x8x8xf32>
    "tpu.trace_stop"() : () -> ()
    %cst_168 = arith.constant 0.353553385 : f32
    %449 = vector.broadcast %cst_168 : f32 to vector<2x8x8xf32>
    %450 = arith.mulf %448, %449 : vector<2x8x8xf32>
    %451 = arith.addf %450, %8 : vector<2x8x8xf32>
    %cst_169 = arith.constant dense<0xFF800000> : vector<2x8xf32>
    %452 = vector.multi_reduction <maximumf>, %451, %cst_169 [2] : vector<2x8x8xf32> to vector<2x8xf32>
    %453 = vector.shape_cast %452 : vector<2x8xf32> to vector<2x8x1xf32>
    %454 = vector.broadcast %453 : vector<2x8x1xf32> to vector<2x8x8xf32>
    %455 = arith.subf %451, %454 : vector<2x8x8xf32>
    %456 = math.exp %455 : vector<2x8x8xf32>
    %cst_170 = arith.constant dense<0.000000e+00> : vector<2x8xf32>
    %457 = vector.multi_reduction <add>, %456, %cst_170 [2] : vector<2x8x8xf32> to vector<2x8xf32>
    %458 = vector.shape_cast %457 : vector<2x8xf32> to vector<2x8x1xf32>
    %459 = tpu.reciprocal %458 {approx = true} : vector<2x8x1xf32> -> vector<2x8x1xf32>
    %460 = vector.broadcast %459 : vector<2x8x1xf32> to vector<2x8x8xf32>
    %461 = arith.mulf %456, %460 : vector<2x8x8xf32>
    %462 = vector.extract_strided_slice %398 {offsets = [0, 0, 16], sizes = [2, 8, 8], strides = [1, 1, 1]} : vector<2x8x32xf32> to vector<2x8x8xf32>
    "tpu.trace_start"() <{level = 10 : i32, message = "bqk,bkd->bqd"}> : () -> ()
    %cst_171 = arith.constant dense<0.000000e+00> : vector<2x8x8xf32>
    %463 = tpu.matmul %461, %462, %cst_171 {dimension_numbers = #tpu.dot_dimension_numbers<[2], [1], [1], [2], [0, 0, 0, 1, 1, 2], [0], [0]>} : vector<2x8x8xf32>, vector<2x8x8xf32>, vector<2x8x8xf32> -> vector<2x8x8xf32>
    "tpu.trace_stop"() : () -> ()
    %464 = vector.shape_cast %463 : vector<2x8x8xf32> to vector<16x8xf32>
    %465 = arith.truncf %464 : vector<16x8xf32> to vector<16x8xbf16>
    %466 = vector.extract_strided_slice %379 {offsets = [16, 0], sizes = [8, 32], strides = [1, 1]} : vector<32x32xbf16> to vector<8x32xbf16>
    %cst_172 = arith.constant dense<0.000000e+00> : vector<16x32xf32>
    %467 = tpu.matmul %465, %466, %cst_172 {dimension_numbers = #tpu.dot_dimension_numbers<[1], [0], [0], [1], [0, 0, 1, 1], [], []>} : vector<16x8xbf16>, vector<8x32xbf16>, vector<16x32xf32> -> vector<16x32xf32>
    %468 = arith.addf %445, %467 : vector<16x32xf32>
    %469 = vector.extract_strided_slice %396 {offsets = [0, 0, 24], sizes = [2, 8, 8], strides = [1, 1, 1]} : vector<2x8x32xf32> to vector<2x8x8xf32>
    %470 = vector.extract_strided_slice %397 {offsets = [0, 0, 24], sizes = [2, 8, 8], strides = [1, 1, 1]} : vector<2x8x32xf32> to vector<2x8x8xf32>
    "tpu.trace_start"() <{level = 10 : i32, message = "bqd,bkd->bqk"}> : () -> ()
    %cst_173 = arith.constant dense<0.000000e+00> : vector<2x8x8xf32>
    %471 = tpu.matmul %469, %470, %cst_173 {dimension_numbers = #tpu.dot_dimension_numbers<[2], [2], [1], [1], [0, 0, 0, 1, 1, 1], [0], [0]>} : vector<2x8x8xf32>, vector<2x8x8xf32>, vector<2x8x8xf32> -> vector<2x8x8xf32>
    "tpu.trace_stop"() : () -> ()
    %cst_174 = arith.constant 0.353553385 : f32
    %472 = vector.broadcast %cst_174 : f32 to vector<2x8x8xf32>
    %473 = arith.mulf %471, %472 : vector<2x8x8xf32>
    %474 = arith.addf %473, %8 : vector<2x8x8xf32>
    %cst_175 = arith.constant dense<0xFF800000> : vector<2x8xf32>
    %475 = vector.multi_reduction <maximumf>, %474, %cst_175 [2] : vector<2x8x8xf32> to vector<2x8xf32>
    %476 = vector.shape_cast %475 : vector<2x8xf32> to vector<2x8x1xf32>
    %477 = vector.broadcast %476 : vector<2x8x1xf32> to vector<2x8x8xf32>
    %478 = arith.subf %474, %477 : vector<2x8x8xf32>
    %479 = math.exp %478 : vector<2x8x8xf32>
    %cst_176 = arith.constant dense<0.000000e+00> : vector<2x8xf32>
    %480 = vector.multi_reduction <add>, %479, %cst_176 [2] : vector<2x8x8xf32> to vector<2x8xf32>
    %481 = vector.shape_cast %480 : vector<2x8xf32> to vector<2x8x1xf32>
    %482 = tpu.reciprocal %481 {approx = true} : vector<2x8x1xf32> -> vector<2x8x1xf32>
    %483 = vector.broadcast %482 : vector<2x8x1xf32> to vector<2x8x8xf32>
    %484 = arith.mulf %479, %483 : vector<2x8x8xf32>
    %485 = vector.extract_strided_slice %398 {offsets = [0, 0, 24], sizes = [2, 8, 8], strides = [1, 1, 1]} : vector<2x8x32xf32> to vector<2x8x8xf32>
    "tpu.trace_start"() <{level = 10 : i32, message = "bqk,bkd->bqd"}> : () -> ()
    %cst_177 = arith.constant dense<0.000000e+00> : vector<2x8x8xf32>
    %486 = tpu.matmul %484, %485, %cst_177 {dimension_numbers = #tpu.dot_dimension_numbers<[2], [1], [1], [2], [0, 0, 0, 1, 1, 2], [0], [0]>} : vector<2x8x8xf32>, vector<2x8x8xf32>, vector<2x8x8xf32> -> vector<2x8x8xf32>
    "tpu.trace_stop"() : () -> ()
    %487 = vector.shape_cast %486 : vector<2x8x8xf32> to vector<16x8xf32>
    %488 = arith.truncf %487 : vector<16x8xf32> to vector<16x8xbf16>
    %489 = vector.extract_strided_slice %379 {offsets = [24, 0], sizes = [8, 32], strides = [1, 1]} : vector<32x32xbf16> to vector<8x32xbf16>
    %cst_178 = arith.constant dense<0.000000e+00> : vector<16x32xf32>
    %490 = tpu.matmul %488, %489, %cst_178 {dimension_numbers = #tpu.dot_dimension_numbers<[1], [0], [0], [1], [0, 0, 1, 1], [], []>} : vector<16x8xbf16>, vector<8x32xbf16>, vector<16x32xf32> -> vector<16x32xf32>
    %491 = arith.addf %468, %490 : vector<16x32xf32>
    %492 = vector.broadcast %383 : vector<1x32xf32> to vector<16x32xf32>
    %493 = arith.addf %491, %492 : vector<16x32xf32>
    %494 = arith.addf %371, %493 : vector<16x32xf32>
    %c21 = arith.constant 21 : index
    %c0_179 = arith.constant 0 : index
    %495 = vector.load %arg5[%c21, %c0_179] : memref<30x32xf32, #tpu.memory_space<vmem>>, vector<1x32xf32>
    %c22 = arith.constant 22 : index
    %c0_180 = arith.constant 0 : index
    %496 = vector.load %arg5[%c22, %c0_180] : memref<30x32xf32, #tpu.memory_space<vmem>>, vector<1x32xf32>
    %cst_181 = arith.constant dense<0.000000e+00> : vector<16xf32>
    %497 = vector.multi_reduction <add>, %494, %cst_181 [1] : vector<16x32xf32> to vector<16xf32>
    %498 = vector.shape_cast %497 : vector<16xf32> to vector<16x1xf32>
    %cst_182 = arith.constant 3.200000e+01 : f32
    %499 = vector.broadcast %cst_182 : f32 to vector<16x1xf32>
    %500 = arith.divf %498, %499 : vector<16x1xf32>
    %501 = vector.broadcast %500 : vector<16x1xf32> to vector<16x32xf32>
    %502 = arith.subf %494, %501 : vector<16x32xf32>
    %503 = arith.mulf %502, %502 : vector<16x32xf32>
    %cst_183 = arith.constant dense<0.000000e+00> : vector<16xf32>
    %504 = vector.multi_reduction <add>, %503, %cst_183 [1] : vector<16x32xf32> to vector<16xf32>
    %505 = vector.shape_cast %504 : vector<16xf32> to vector<16x1xf32>
    %cst_184 = arith.constant 3.200000e+01 : f32
    %506 = vector.broadcast %cst_184 : f32 to vector<16x1xf32>
    %507 = arith.divf %505, %506 : vector<16x1xf32>
    %508 = vector.broadcast %500 : vector<16x1xf32> to vector<16x32xf32>
    %509 = arith.subf %494, %508 : vector<16x32xf32>
    %cst_185 = arith.constant 9.99999974E-6 : f32
    %510 = vector.broadcast %cst_185 : f32 to vector<16x1xf32>
    %511 = arith.addf %507, %510 : vector<16x1xf32>
    %512 = math.rsqrt %511 : vector<16x1xf32>
    %513 = vector.broadcast %512 : vector<16x1xf32> to vector<16x32xf32>
    %514 = arith.mulf %509, %513 : vector<16x32xf32>
    %515 = vector.broadcast %495 : vector<1x32xf32> to vector<16x32xf32>
    %516 = arith.mulf %514, %515 : vector<16x32xf32>
    %517 = vector.broadcast %496 : vector<1x32xf32> to vector<16x32xf32>
    %518 = arith.addf %516, %517 : vector<16x32xf32>
    %c2_186 = arith.constant 2 : index
    %c0_187 = arith.constant 0 : index
    %c0_188 = arith.constant 0 : index
    %519 = vector.load %arg4[%c2_186, %c0_187, %c0_188] : memref<4x32x2048xbf16, #tpu.memory_space<vmem>>, vector<1x32x2048xbf16>
    %520 = vector.shape_cast %519 : vector<1x32x2048xbf16> to vector<32x2048xbf16>
    %c3_189 = arith.constant 3 : index
    %c0_190 = arith.constant 0 : index
    %c0_191 = arith.constant 0 : index
    %521 = vector.load %arg4[%c3_189, %c0_190, %c0_191] : memref<4x32x2048xbf16, #tpu.memory_space<vmem>>, vector<1x32x2048xbf16>
    %522 = vector.shape_cast %521 : vector<1x32x2048xbf16> to vector<32x2048xbf16>
    %c1_192 = arith.constant 1 : index
    %c0_193 = arith.constant 0 : index
    %523 = vector.load %arg6[%c1_192, %c0_193] : memref<2x2048xf32, #tpu.memory_space<vmem>>, vector<1x2048xf32>
    %c23 = arith.constant 23 : index
    %c0_194 = arith.constant 0 : index
    %524 = vector.load %arg5[%c23, %c0_194] : memref<30x32xf32, #tpu.memory_space<vmem>>, vector<1x32xf32>
    %525 = arith.truncf %518 : vector<16x32xf32> to vector<16x32xbf16>
    %cst_195 = arith.constant dense<0.000000e+00> : vector<16x2048xf32>
    %526 = tpu.matmul %525, %520, %cst_195 {dimension_numbers = #tpu.dot_dimension_numbers<[1], [0], [0], [1], [0, 0, 1, 1], [], []>} : vector<16x32xbf16>, vector<32x2048xbf16>, vector<16x2048xf32> -> vector<16x2048xf32>
    %527 = vector.broadcast %523 : vector<1x2048xf32> to vector<16x2048xf32>
    %528 = arith.addf %526, %527 : vector<16x2048xf32>
    %cst_196 = arith.constant 0.000000e+00 : f32
    %529 = vector.broadcast %cst_196 : f32 to vector<16x2048xf32>
    %530 = arith.maximumf %528, %529 : vector<16x2048xf32>
    %531 = arith.truncf %530 : vector<16x2048xf32> to vector<16x2048xbf16>
    %cst_197 = arith.constant dense<0.000000e+00> : vector<16x32xf32>
    %532 = tpu.matmul %531, %522, %cst_197 {dimension_numbers = #tpu.dot_dimension_numbers<[1], [1], [0], [0], [0, 0, 1, 0], [], []>} : vector<16x2048xbf16>, vector<32x2048xbf16>, vector<16x32xf32> -> vector<16x32xf32>
    %533 = vector.broadcast %524 : vector<1x32xf32> to vector<16x32xf32>
    %534 = arith.addf %532, %533 : vector<16x32xf32>
    %535 = arith.addf %518, %534 : vector<16x32xf32>
    %c24 = arith.constant 24 : index
    %c0_198 = arith.constant 0 : index
    %536 = vector.load %arg5[%c24, %c0_198] : memref<30x32xf32, #tpu.memory_space<vmem>>, vector<1x32xf32>
    %c25 = arith.constant 25 : index
    %c0_199 = arith.constant 0 : index
    %537 = vector.load %arg5[%c25, %c0_199] : memref<30x32xf32, #tpu.memory_space<vmem>>, vector<1x32xf32>
    %cst_200 = arith.constant dense<0.000000e+00> : vector<16xf32>
    %538 = vector.multi_reduction <add>, %535, %cst_200 [1] : vector<16x32xf32> to vector<16xf32>
    %539 = vector.shape_cast %538 : vector<16xf32> to vector<16x1xf32>
    %cst_201 = arith.constant 3.200000e+01 : f32
    %540 = vector.broadcast %cst_201 : f32 to vector<16x1xf32>
    %541 = arith.divf %539, %540 : vector<16x1xf32>
    %542 = vector.broadcast %541 : vector<16x1xf32> to vector<16x32xf32>
    %543 = arith.subf %535, %542 : vector<16x32xf32>
    %544 = arith.mulf %543, %543 : vector<16x32xf32>
    %cst_202 = arith.constant dense<0.000000e+00> : vector<16xf32>
    %545 = vector.multi_reduction <add>, %544, %cst_202 [1] : vector<16x32xf32> to vector<16xf32>
    %546 = vector.shape_cast %545 : vector<16xf32> to vector<16x1xf32>
    %cst_203 = arith.constant 3.200000e+01 : f32
    %547 = vector.broadcast %cst_203 : f32 to vector<16x1xf32>
    %548 = arith.divf %546, %547 : vector<16x1xf32>
    %549 = vector.broadcast %541 : vector<16x1xf32> to vector<16x32xf32>
    %550 = arith.subf %535, %549 : vector<16x32xf32>
    %cst_204 = arith.constant 9.99999974E-6 : f32
    %551 = vector.broadcast %cst_204 : f32 to vector<16x1xf32>
    %552 = arith.addf %548, %551 : vector<16x1xf32>
    %553 = math.rsqrt %552 : vector<16x1xf32>
    %554 = vector.broadcast %553 : vector<16x1xf32> to vector<16x32xf32>
    %555 = arith.mulf %550, %554 : vector<16x32xf32>
    %556 = vector.broadcast %536 : vector<1x32xf32> to vector<16x32xf32>
    %557 = arith.mulf %555, %556 : vector<16x32xf32>
    %558 = vector.broadcast %537 : vector<1x32xf32> to vector<16x32xf32>
    %559 = arith.addf %557, %558 : vector<16x32xf32>
    %c26 = arith.constant 26 : index
    %c0_205 = arith.constant 0 : index
    %560 = vector.load %arg5[%c26, %c0_205] : memref<30x32xf32, #tpu.memory_space<vmem>>, vector<1x32xf32>
    %c27 = arith.constant 27 : index
    %c0_206 = arith.constant 0 : index
    %561 = vector.load %arg5[%c27, %c0_206] : memref<30x32xf32, #tpu.memory_space<vmem>>, vector<1x32xf32>
    %cst_207 = arith.constant dense<0.000000e+00> : vector<16xf32>
    %562 = vector.multi_reduction <add>, %559, %cst_207 [1] : vector<16x32xf32> to vector<16xf32>
    %563 = vector.shape_cast %562 : vector<16xf32> to vector<16x1xf32>
    %cst_208 = arith.constant 3.200000e+01 : f32
    %564 = vector.broadcast %cst_208 : f32 to vector<16x1xf32>
    %565 = arith.divf %563, %564 : vector<16x1xf32>
    %566 = vector.broadcast %565 : vector<16x1xf32> to vector<16x32xf32>
    %567 = arith.subf %559, %566 : vector<16x32xf32>
    %568 = arith.mulf %567, %567 : vector<16x32xf32>
    %cst_209 = arith.constant dense<0.000000e+00> : vector<16xf32>
    %569 = vector.multi_reduction <add>, %568, %cst_209 [1] : vector<16x32xf32> to vector<16xf32>
    %570 = vector.shape_cast %569 : vector<16xf32> to vector<16x1xf32>
    %cst_210 = arith.constant 3.200000e+01 : f32
    %571 = vector.broadcast %cst_210 : f32 to vector<16x1xf32>
    %572 = arith.divf %570, %571 : vector<16x1xf32>
    %573 = vector.broadcast %565 : vector<16x1xf32> to vector<16x32xf32>
    %574 = arith.subf %559, %573 : vector<16x32xf32>
    %cst_211 = arith.constant 9.99999974E-6 : f32
    %575 = vector.broadcast %cst_211 : f32 to vector<16x1xf32>
    %576 = arith.addf %572, %575 : vector<16x1xf32>
    %577 = math.rsqrt %576 : vector<16x1xf32>
    %578 = vector.broadcast %577 : vector<16x1xf32> to vector<16x32xf32>
    %579 = arith.mulf %574, %578 : vector<16x32xf32>
    %580 = vector.broadcast %560 : vector<1x32xf32> to vector<16x32xf32>
    %581 = arith.mulf %579, %580 : vector<16x32xf32>
    %582 = vector.broadcast %561 : vector<1x32xf32> to vector<16x32xf32>
    %583 = arith.addf %581, %582 : vector<16x32xf32>
    %c28 = arith.constant 28 : index
    %c0_212 = arith.constant 0 : index
    %584 = vector.load %arg5[%c28, %c0_212] : memref<30x32xf32, #tpu.memory_space<vmem>>, vector<1x32xf32>
    %c29 = arith.constant 29 : index
    %c0_213 = arith.constant 0 : index
    %585 = vector.load %arg5[%c29, %c0_213] : memref<30x32xf32, #tpu.memory_space<vmem>>, vector<1x32xf32>
    %586 = vector.extract_strided_slice %585 {offsets = [0, 0], sizes = [1, 1], strides = [1, 1]} : vector<1x32xf32> to vector<1x1xf32>
    %587 = vector.shape_cast %583 : vector<16x32xf32> to vector<2x8x32xf32>
    %588 = vector.shape_cast %584 : vector<1x32xf32> to vector<1x1x32xf32>
    %589 = vector.broadcast %588 : vector<1x1x32xf32> to vector<2x8x32xf32>
    %590 = arith.mulf %587, %589 : vector<2x8x32xf32>
    %cst_214 = arith.constant dense<0.000000e+00> : vector<2x8xf32>
    %591 = vector.multi_reduction <add>, %590, %cst_214 [2] : vector<2x8x32xf32> to vector<2x8xf32>
    %592 = vector.broadcast %586 : vector<1x1xf32> to vector<2x8xf32>
    %593 = arith.addf %591, %592 : vector<2x8xf32>
    %594 = math.absf %593 : vector<2x8xf32>
    %cst_215 = arith.constant 0.000000e+00 : f32
    %595 = vector.broadcast %cst_215 : f32 to vector<2x8xf32>
    %596 = arith.subf %595, %594 : vector<2x8xf32>
    %597 = math.exp %596 : vector<2x8xf32>
    %cst_216 = arith.constant 1.000000e+00 : f32
    %598 = vector.broadcast %cst_216 : f32 to vector<2x8xf32>
    %599 = arith.addf %598, %597 : vector<2x8xf32>
    %cst_217 = arith.constant 1.000000e+00 : f32
    %600 = vector.broadcast %cst_217 : f32 to vector<2x8xf32>
    %601 = arith.divf %600, %599 : vector<2x8xf32>
    %cst_218 = arith.constant 0.000000e+00 : f32
    %602 = vector.broadcast %cst_218 : f32 to vector<2x8xf32>
    %603 = arith.cmpf oge, %593, %602 : vector<2x8xf32>
    %604 = arith.mulf %597, %601 : vector<2x8xf32>
    %605 = arith.select %603, %601, %604 : vector<2x8xi1>, vector<2x8xf32>
    %c0_219 = arith.constant 0 : index
    %c0_220 = arith.constant 0 : index
    %c0_221 = arith.constant 0 : index
    %606 = vector.load %arg7[%c0_219, %c0_220, %c0_221] : memref<1x2x8xf32, #tpu.memory_space<vmem>>, vector<1x2x8xf32>
    %607 = vector.shape_cast %606 : vector<1x2x8xf32> to vector<2x8xf32>
    %608 = vector.shape_cast %605 : vector<2x8xf32> to vector<1x2x8xf32>
    tpu.vector_store %arg7[%c0_219, %c0_220, %c0_221], %608 {strides = array<i32>} : memref<1x2x8xf32, #tpu.memory_space<vmem>>, vector<1x2x8xf32>,
    return
  }
  func.func @transform_0(%arg0: i32) -> (i32, i32, i32) {
    %c0_i32 = arith.constant 0 : i32
    %c0_i32_0 = arith.constant 0 : i32
    %c0_i32_1 = arith.constant 0 : i32
    return %arg0, %c0_i32, %c0_i32_0 : i32, i32, i32
  }
  func.func @transform_1(%arg0: i32) -> (i32, i32, i32) {
    %c0_i32 = arith.constant 0 : i32
    %c0_i32_0 = arith.constant 0 : i32
    %c0_i32_1 = arith.constant 0 : i32
    return %arg0, %c0_i32, %c0_i32_0 : i32, i32, i32
  }
  func.func @transform_2(%arg0: i32) -> (i32, i32, i32) {
    %c0_i32 = arith.constant 0 : i32
    %c0_i32_0 = arith.constant 0 : i32
    %c0_i32_1 = arith.constant 0 : i32
    %c0_i32_2 = arith.constant 0 : i32
    return %c0_i32, %c0_i32_0, %c0_i32_1 : i32, i32, i32
  }
  func.func @transform_3(%arg0: i32) -> (i32, i32, i32) {
    %c0_i32 = arith.constant 0 : i32
    %c0_i32_0 = arith.constant 0 : i32
    %c0_i32_1 = arith.constant 0 : i32
    %c0_i32_2 = arith.constant 0 : i32
    return %c0_i32, %c0_i32_0, %c0_i32_1 : i32, i32, i32
  }
  func.func @transform_4(%arg0: i32) -> (i32, i32) {
    %c0_i32 = arith.constant 0 : i32
    %c0_i32_0 = arith.constant 0 : i32
    %c0_i32_1 = arith.constant 0 : i32
    return %c0_i32, %c0_i32_0 : i32, i32
  }
  func.func @transform_5(%arg0: i32) -> (i32, i32) {
    %c0_i32 = arith.constant 0 : i32
    %c0_i32_0 = arith.constant 0 : i32
    %c0_i32_1 = arith.constant 0 : i32
    return %c0_i32, %c0_i32_0 : i32, i32
  }
  func.func @transform_6(%arg0: i32) -> (i32, i32, i32) {
    %c0_i32 = arith.constant 0 : i32
    %c0_i32_0 = arith.constant 0 : i32
    %c0_i32_1 = arith.constant 0 : i32
    return %arg0, %c0_i32, %c0_i32_0 : i32, i32, i32
  }
}

</mosaic_0001>

<bundles_post_ra>
// kernel: saint_forward.1
= control target key start
LH: loop header
LB: loop body
LE: loop exit
PB: predicated region body
PF: predicated region fallthrough
CT: control target
= control target key end

     0   :  { %11 = vsyncpa [#allocation3], 0  ;;  %s10303_s0 = inlined_call_operand.vmem [shape: f32[2,8,32], index: 0, kind: input, shape index: {}]   ;;  %s10304_s1 = inlined_call_operand.vmem [shape: f32[2,8,32], index: 1, kind: input, shape index: {}]   ;;  %s10305_s2 = inlined_call_operand.vmem [shape: bf16[12,32,32], index: 2, kind: input, shape index: {}]   ;;  %s10306_s3 = inlined_call_operand.hbm [shape: bf16[4,32,2048], index: 3, kind: input, shape index: {}]   ;;  %s10307_s4 = inlined_call_operand.vmem [shape: f32[30,32], index: 4, kind: input, shape index: {}]   ;;  %s10308_s5 = inlined_call_operand.vmem [shape: f32[2,2048], index: 5, kind: input, shape index: {}]   ;;  %s10309_s6 = inlined_call_operand.hbm [shape: f32[1,2,8], index: 6, kind: output, shape index: {}]  }
   0x1   :  { %12 = vsyncpa [#allocation4], 0  ;;  %s9071_s21 = smov [#allocation2]  }
   0x2   :  { %s24_s22 = sshll.u32 %s9071_s21, 4  ;;  %s25_s22 = int_to_ptr.vmem [resolvable:$true] %s24_s22 }
   0x3   :  { %s9035_s23 = scalar_lea.vmem %s25_s22, 16384  ;;  %p9040_p1 = scmp.lt.s32.totalorder %s25_s22, %s25_s22 }
   0x4   :  { %p9036_p0 = scmp.ne.s32.totalorder %s25_s22, %s9035_s23  ;;  %p9041_p2 = scmp.lt.s32.totalorder %s9035_s23, %s9035_s23 }
   0x6   :  { %p9042_p3 = por %p9041_p2, %p9040_p1 }
   0x8   :  { %p9043_p4 = pnand %p9042_p3, %p9036_p0 }
   0xa   :  { %9046 = shalt.err (!%p9043_p4)
}
   0xb   :  { %s9072_s24 = smov 1024   ;;  %s9073_s25 = smov 64  }
   0xc   :  { %30 = dma.hbm_to_vmem [thread:$0]  %s10306_s3, 16384, %s25_s22, [#allocation3], %s9072_s24, %s9072_s24, %s9073_s25  }
   0xd   :  { %9067 = dma.done.wait [#allocation3], 16384  }
   0xe   :  { %9068 = vsyncadd [#allocation3], 4294950912  ;;  %v9074_v0 = vmov 0.0   ;;  %vm9075_vm0 = vmmov 0   ;;  %v8877_v1 = vld [vmem:[%s10305_s2 + $0x8] sm:$0xff]   ;;  %v8878_v2 = vld [vmem:[%s10305_s2 + $0x18] sm:$0xff]   ;;  %v39_v24 = vlaneseq }
   0xf   :  { %8481 = vmatprep.subr.bf16.mxu0 %v9074_v0  ;;  %8489 = vmatprep.subr.bf16.mxu1 %v9074_v0  ;;  %v8879_v3 = vld [vmem:[%s10305_s2] sm:$0xff]   ;;  %v8880_v4 = vld [vmem:[%s10305_s2 + $0x10] sm:$0xff]   ;;  %v9147_v6 = vld [vmem:[%s10303_s0 + $0x8] sm:$0xff]  ;;  %vm87_vm1 = vcmask 261120   ;;  %vm246_vm2 = vcmask 64512   ;;  %s9076_s18 = smov 120  }
  0x10   :  { %8485 = vmatprep.mubr.msk.bf16.mxu0 %vm9075_vm0, %v9074_v0  ;;  %8493 = vmatprep.mubr.msk.bf16.mxu1 %vm9075_vm0, %v9074_v0  ;;  %v9142_v5 = vld [vmem:[%s10303_s0] sm:$0xff]  ;;  %v8881_v22 = vld [vmem:[%s10305_s2 + $0x28] sm:$0xff]   ;;  %v9202_v25 = vshrl.u32 %v39_v24, 7  ;;  %v9204_v26 = vand.u32 127, %v39_v24  ;;  %s9077_s25 = smov 112   ;;  %s9078_s26 = smov 104  }
  0x11   :  { %8482 = vmatpush3.bf16.msra.mxu0 %v8877_v1  ;;  %8490 = vmatpush3.bf16.msra.mxu1 %v8878_v2  ;;  %v70_v7 = vpack.c.bf16 %v9147_v6, %v9142_v5  ;;  %v8019_v8 = vld [vmem:[%s10307_s4 + $0x1] ss:$0 sm:$0xff]  ;;  %v8015_v9 = vld [vmem:[%s10307_s4] ss:$0 sm:$0xff]  ;;  %v8023_v48 = vld [vmem:[%s10307_s4 + $0x2] ss:$0 sm:$0xff] }
  0x12   :  { %8483 = vmatprep.subr.bf16.mxu0 %v9074_v0  ;;  %8491 = vmatprep.subr.bf16.mxu1 %v9074_v0  ;;  %v8882_v23 = vld [vmem:[%s10305_s2 + $0x20] sm:$0xff]   ;;  %vm43_vm3 = vcmp.gt.s32.totalorder %v9204_v26, %v9202_v25  ;;  %vm912_vm4 = vcmask 1043456   ;;  %vm7983_vm7 = vcmask 1041409   ;;  %vm7986_vm8 = vcmask 58368  }
  0x13   :  { %v9209_v28 = vsel %vm43_vm3, -1e+30, %v9074_v0 }
  0x15   :  { %8484 = vmatpush3.bf16.msra.mxu0 %v8879_v3  ;;  %8492 = vmatpush3.bf16.msra.mxu1 %v8880_v4 }
  0x16   :  { %8497 = vmatprep.subr.bf16.mxu0 %v9074_v0  ;;  %8505 = vmatprep.subr.mxu1 %v9074_v0 }
  0x18   :  { %8486 = vmatmul.mubr.msk.bf16.vlgmr.msra.gmra.mxu0 %vm87_vm1, %v70_v7  ;;  %8494 = vmatmul.mubr.msk.bf16.vlgmr.msra.gmra.mxu1 %vm87_vm1, %v70_v7 }
  0x19   :  { %8501 = vmatprep.mubr.msk.bf16.mxu0 %vm9075_vm0, %v9074_v0  ;;  %8507 = vmatprep.mubr.msk.f32.mxu1 %vm9075_vm0, %v9074_v0 }
  0x1a   :  { %8498 = vmatpush3.bf16.msra.mxu0 %v8881_v22 }
  0x1b   :  { %8499 = vmatprep.subr.bf16.mxu0 %v9074_v0 }
  0x1e   :  { %8500 = vmatpush3.bf16.msra.mxu0 %v8882_v23 }
  0x1f   :  { %8515 = vmatprep.subr.mxu0 %v9074_v0 }
  0x21   :  { %8502 = vmatmul.mubr.msk.bf16.vlgmr.msra.gmra.mxu0 %vm87_vm1, %v70_v7 }
  0x22   :  { %8517 = vmatprep.mubr.msk.f32.mxu0 %vm9075_vm0, %v9074_v0 }
  0xd8   :  { %v125_v10 = vpop.f32.mrf.mxu0  ;;  %v182_v11 = vpop.f32.mrf.mxu1 }
  0xd9   :  { %v9165_v12 = vadd.f32 %v8019_v8, %v182_v11  ;;  %v9167_v14 = vadd.f32 %v8015_v9, %v125_v10 }
  0xda   :  { %v8487_v13 = vpop.f32.mrf.mxu0  ;;  %v8495_v15 = vpop.f32.mrf.mxu1 }
  0xdb   :  { %8506 = vmatpush3.xpose.msk.msra.mxu1 %vm246_vm2, %v9165_v12 }
  0xdc   :  { %v128_v16 = vpop.f32.mrf.mxu0  ;;  %v185_v17 = vpop.f32.mrf.mxu1  ;;  %8510 = vmatprep.subr.mxu1 %v9074_v0 }
  0xdd   :  { %v9172_v18 = vadd.f32 %v8019_v8, %v185_v17  ;;  %v9180_v21 = vadd.f32 %v8015_v9, %v128_v16 }
  0xde   :  { %v8488_v19 = vpop.f32.mrf.mxu0  ;;  %v8496_v20 = vpop.f32.mrf.mxu1  ;;  %8508 = vmatmul.mubr.msk.f32.vlgmr.msra.gmra.mxu1 %vm246_vm2, %v9167_v14 }
  0xdf   :  { %652 = vrot.lane.b32.xlu1 %v9172_v18, %s9076_s18  ;;  %8511 = vmatpush3.xpose.msk.msra.mxu1 %vm246_vm2, %v9172_v18 }
  0xe0   :  { %8512 = vmatprep.mubr.msk.f32.mxu1 %vm9075_vm0, %v9074_v0  ;;  %8520 = vmatprep.subr.mxu1 %v9074_v0 }
  0xe1   :  { %v239_v49 = vpop.f32.mrf.mxu0 }
  0xe2   :  { %8513 = vmatmul.mubr.msk.f32.vlgmr.msra.gmra.mxu1 %vm246_vm2, %v9180_v21  ;;  %v9222_v50 = vadd.f32 %v8023_v48, %v239_v49 }
  0xe3   :  { %572 = vrot.lane.b32.xlu1 %v9167_v14, %s9076_s18  ;;  %8522 = vmatprep.mubr.msk.f32.mxu1 %vm9075_vm0, %v9074_v0  ;;  %v8503_v51 = vpop.f32.mrf.mxu0 }
  0xe4   :  { %8516 = vmatpush3.msra.mxu0 %v9222_v50 }
  0xe5   :  { %v242_v52 = vpop.f32.mrf.mxu0  ;;  %8525 = vmatprep.subr.mxu0 %v9074_v0 }
  0xe6   :  { %v9226_v53 = vadd.f32 %v8023_v48, %v242_v52 }
  0xe7   :  { %v8504_v54 = vpop.f32.mrf.mxu0 }
  0xe8   :  { %8521 = vmatpush3.msra.mxu1 %v9226_v53 }
  0xe9   :  { %8530 = vmatprep.subr.mxu1 %v9074_v0 }
 0x151   :  { %v653_v55 = vpop.permute.xlu1 %652 }
 0x155   :  { %v573_v56 = vpop.permute.xlu1 %572 }
 0x19e   :  { %v319_v27 = vpop.f32.mrf.mxu1 }
 0x19f   :  { %v399_v29 = vmul.f32 0.35355338, %v319_v27 }
 0x1a0   :  { %v8509_v30 = vpop.f32.mrf.mxu1 }
 0x1a1   :  { %v401_v31 = vadd.f32 %v399_v29, %v9209_v28 }
 0x1a2   :  { %v395_v32 = vpop.f32.mrf.mxu1 }
 0x1a3   :  { %v400_v33 = vmul.f32 0.35355338, %v395_v32  ;;  %v403_v34 = vsel %vm246_vm2, %v401_v31, -inf }
 0x1a4   :  { %404 = vmax.xlane.f32.xlu0 %v403_v34  ;;  %v8514_v35 = vpop.f32.mrf.mxu1 }
 0x1a5   :  { %v402_v36 = vadd.f32 %v400_v33, %v9209_v28 }
 0x1a7   :  { %v406_v37 = vsel %vm246_vm2, %v402_v36, -inf }
 0x1a8   :  { %407 = vmax.xlane.f32.xlu0 %v406_v37 }
 0x1be   :  { %574 = vrot.lane.b32.xlu0 %v9165_v12, %s9076_s18 }
 0x22d   :  { %v405_v38 = vpop.xlane.xlu0 %404 }
 0x22e   :  { %v409_v39 = vsub.f32 %v401_v31, %v405_v38 }
 0x230   :  { %v411_v40 = vmul.f32 1.442695, %v409_v39 }
 0x231   :  { %v408_v41 = vpop.xlane.xlu0 %407 }
 0x232   :  { %8895 = vpow2.f32 %v411_v40  ;;  %v410_v42 = vsub.f32 %v402_v36, %v408_v41 }
 0x234   :  { %v413_v43 = vmul.f32 1.442695, %v410_v42  ;;  %v8011_v42 = vld [vmem:[%s10305_s2 + $0x30] sm:$0xf] }
 0x235   :  { %v575_v61 = vpop.permute.xlu0 %574 }
 0x236   :  { %8897 = vpow2.f32 %v413_v43 }
 0x23f   :  { %v8896_v44 = vpop.eup %8895 }
 0x240   :  { %v415_v45 = vsel %vm246_vm2, %v8896_v44, 0.0 }
 0x241   :  { %416 = vadd.xlane.f32.xlu1 %v415_v45 }
 0x243   :  { %v8898_v46 = vpop.eup %8897 }
 0x244   :  { %v418_v47 = vsel %vm246_vm2, %v8898_v46, 0.0 }
 0x245   :  { %419 = vadd.xlane.f32.xlu1 %v418_v47  ;;  %v8012_v47 = vld [vmem:[%s10305_s2 + $0x34] sm:$0xf] }
 0x246   :  { %v914_v48 = vsel %vm912_vm4, %v8012_v47, 0 }
 0x256   :  { %650 = vrot.lane.b32.xlu1 %v9180_v21, %s9076_s18 }
 0x2ca   :  { %v417_v57 = vpop.xlane.xlu1 %416 }
 0x2cb   :  { %8899 = vrcp.f32 %v417_v57 }
 0x2ce   :  { %v420_v58 = vpop.xlane.xlu1 %419 }
 0x2cf   :  { %8901 = vrcp.f32 %v420_v58 }
 0x2d2   :  { %v651_v1 = vpop.permute.xlu1 %650 }
 0x2d8   :  { %v8900_v59 = vpop.eup %8899 }
 0x2d9   :  { %v423_v60 = vmul.f32 %v8900_v59, %v8896_v44  ;;  %v961_v44 = vsel %vm912_vm4, %v8011_v42, 0 }
 0x2db   :  { %8518 = vmatmul.mubr.msk.f32.vlgmr.msra.gmra.mxu0 %vm246_vm2, %v423_v60 }
 0x2dc   :  { %v8902_v62 = vpop.eup %8901  ;;  %8526 = vmatpush3.xpose.msk.msra.mxu0 %vm246_vm2, %v575_v61  ;;  %8527 = vmatprep.mubr.msk.f32.mxu0 %vm9075_vm0, %v9074_v0 }
 0x2dd   :  { %v424_v63 = vmul.f32 %v8902_v62, %v8898_v46  ;;  %8535 = vmatprep.subr.mxu0 %v9074_v0 }
 0x2df   :  { %8523 = vmatmul.mubr.msk.f32.vlgmr.msra.gmra.mxu1 %vm246_vm2, %v424_v63  ;;  %8528 = vmatmul.mubr.msk.f32.vlgmr.msra.gmra.mxu0 %vm246_vm2, %v573_v56 }
 0x2e0   :  { %8531 = vmatpush3.xpose.msk.msra.mxu1 %vm246_vm2, %v653_v55  ;;  %8532 = vmatprep.mubr.msk.f32.mxu1 %vm9075_vm0, %v9074_v0 }
 0x2e1   :  { %8540 = vmatprep.subr.mxu1 %v9074_v0  ;;  %8537 = vmatprep.mubr.msk.f32.mxu0 %vm9075_vm0, %v9074_v0 }
 0x2e3   :  { %8533 = vmatmul.mubr.msk.f32.vlgmr.msra.gmra.mxu1 %vm246_vm2, %v651_v1 }
 0x2e4   :  { %8542 = vmatprep.mubr.msk.f32.mxu1 %vm9075_vm0, %v9074_v0 }
 0x39b   :  { %v9248_v2 = vpop.f32.mrf.mxu0 }
 0x39d   :  { %v8519_v3 = vpop.f32.mrf.mxu0 }
 0x39f   :  { %v9250_v4 = vpop.f32.mrf.mxu1  ;;  %v646_v7 = vpop.f32.mrf.mxu0 }
 0x3a0   :  { %v571_v8 = vpack.c.bf16 %v9250_v4, %v9248_v2  ;;  %v728_v9 = vmul.f32 0.35355338, %v646_v7 }
 0x3a1   :  { %v8524_v10 = vpop.f32.mrf.mxu1  ;;  %v8529_v11 = vpop.f32.mrf.mxu0 }
 0x3a2   :  { %v730_v13 = vadd.f32 %v728_v9, %v9209_v28 }
 0x3a3   :  { %v724_v15 = vpop.f32.mrf.mxu1 }
 0x3a4   :  { %v729_v16 = vmul.f32 0.35355338, %v724_v15  ;;  %v732_v17 = vsel %vm246_vm2, %v730_v13, -inf }
 0x3a5   :  { %v8534_v19 = vpop.f32.mrf.mxu1  ;;  %733 = vmax.xlane.f32.xlu0 %v732_v17 }
 0x3a6   :  { %v731_v20 = vadd.f32 %v729_v16, %v9209_v28 }
 0x3a8   :  { %v735_v22 = vsel %vm246_vm2, %v731_v20, -inf }
 0x3a9   :  { %736 = vmax.xlane.f32.xlu1 %v735_v22 }
 0x3ba   :  { %832 = vrot.lane.b32.xlu1 %v9226_v53, %s9076_s18 }
 0x3be   :  { %1084 = vrot.lane.b32.xlu1 %v9172_v18, %s9077_s25 }
 0x3c2   :  { %1082 = vrot.lane.b32.xlu1 %v9180_v21, %s9077_s25 }
 0x3c6   :  { %1004 = vrot.lane.b32.xlu1 %v9167_v14, %s9077_s25 }
 0x3ca   :  { %1390 = vrot.lane.b32.xlu1 %v9165_v12, %s9078_s26 }
 0x42e   :  { %v734_v23 = vpop.xlane.xlu0 %733 }
 0x42f   :  { %v738_v24 = vsub.f32 %v730_v13, %v734_v23 }
 0x431   :  { %v740_v27 = vmul.f32 1.442695, %v738_v24 }
 0x432   :  { %v737_v29 = vpop.xlane.xlu1 %736 }
 0x433   :  { %8903 = vpow2.f32 %v740_v27  ;;  %v739_v30 = vsub.f32 %v731_v20, %v737_v29 }
 0x435   :  { %v742_v31 = vmul.f32 1.442695, %v739_v30 }
 0x436   :  { %v833_v32 = vpop.permute.xlu1 %832 }
 0x437   :  { %8905 = vpow2.f32 %v742_v31  ;;  %8541 = vmatpush3.msra.mxu1 %v833_v32 }
 0x438   :  { %8551 = vmatprep.subr.bf16.mxu1 %v9074_v0 }
 0x43a   :  { %v1085_v45 = vpop.permute.xlu1 %1084 }
 0x43e   :  { %v1083_v46 = vpop.permute.xlu1 %1082 }
 0x440   :  { %v8904_v33 = vpop.eup %8903 }
 0x441   :  { %v744_v34 = vsel %vm246_vm2, %v8904_v33, 0.0 }
 0x442   :  { %745 = vadd.xlane.f32.xlu0 %v744_v34  ;;  %v1005_v60 = vpop.permute.xlu1 %1004 }
 0x444   :  { %v8906_v35 = vpop.eup %8905 }
 0x445   :  { %v747_v36 = vsel %vm246_vm2, %v8906_v35, 0.0 }
 0x446   :  { %748 = vadd.xlane.f32.xlu0 %v747_v36  ;;  %v1391_v23 = vpop.permute.xlu1 %1390 }
 0x45c   :  { %755 = vrot.lane.b32.xlu0 %v9222_v50, %s9076_s18 }
 0x460   :  { %1006 = vrot.lane.b32.xlu0 %v9165_v12, %s9077_s25 }
 0x4cb   :  { %v746_v37 = vpop.xlane.xlu0 %745 }
 0x4cc   :  { %8907 = vrcp.f32 %v746_v37 }
 0x4cf   :  { %v749_v38 = vpop.xlane.xlu0 %748 }
 0x4d0   :  { %8909 = vrcp.f32 %v749_v38 }
 0x4d3   :  { %v756_v39 = vpop.permute.xlu0 %755 }
 0x4d4   :  { %8536 = vmatpush3.msra.mxu0 %v756_v39 }
 0x4d5   :  { %8545 = vmatprep.subr.bf16.mxu0 %v9074_v0 }
 0x4d7   :  { %v1007_v56 = vpop.permute.xlu0 %1006 }
 0x4d9   :  { %v8908_v40 = vpop.eup %8907 }
 0x4da   :  { %v752_v41 = vmul.f32 %v8908_v40, %v8904_v33 }
 0x4dc   :  { %8538 = vmatmul.mubr.msk.f32.vlgmr.msra.gmra.mxu0 %vm246_vm2, %v752_v41 }
 0x4dd   :  { %v8910_v43 = vpop.eup %8909  ;;  %8547 = vmatprep.mubr.msk.bf16.mxu0 %vm9075_vm0, %v9074_v0  ;;  %8546 = vmatpush3.bf16.msra.mxu0 %v914_v48 }
 0x4de   :  { %v753_v12 = vmul.f32 %v8910_v43, %v8906_v35  ;;  %8557 = vmatprep.subr.mxu0 %v9074_v0 }
 0x4e0   :  { %8543 = vmatmul.mubr.msk.f32.vlgmr.msra.gmra.mxu1 %vm246_vm2, %v753_v12 }
 0x4e1   :  { %8552 = vmatpush3.bf16.msra.mxu1 %v961_v44  ;;  %8553 = vmatprep.mubr.msk.bf16.mxu1 %vm9075_vm0, %v9074_v0 }
 0x4e2   :  { %8562 = vmatprep.subr.mxu1 %v9074_v0 }
 0x4e4   :  { %8554 = vmatmul.mubr.msk.bf16.vlgmr.msra.gmra.mxu1 %vm246_vm2, %v571_v8 }
 0x4e5   :  { %8563 = vmatpush3.xpose.msk.msra.mxu1 %vm246_vm2, %v1085_v45  ;;  %8564 = vmatprep.mubr.msk.f32.mxu1 %vm9075_vm0, %v9074_v0 }
 0x4e6   :  { %8572 = vmatprep.subr.mxu1 %v9074_v0 }
 0x4ec   :  { %8565 = vmatmul.mubr.msk.f32.vlgmr.msra.gmra.mxu1 %vm246_vm2, %v1083_v46 }
 0x4ed   :  { %8574 = vmatprep.mubr.msk.f32.mxu1 %vm9075_vm0, %v9074_v0 }
 0x59c   :  { %v827_v49 = vpop.f32.mrf.mxu0 }
 0x59e   :  { %v8539_v51 = vpop.f32.mrf.mxu0 }
 0x5a0   :  { %v904_v52 = vpop.f32.mrf.mxu1 }
 0x5a1   :  { %v908_v54 = vpack.c.bf16 %v904_v52, %v827_v49 }
 0x5a2   :  { %v8544_v55 = vpop.f32.mrf.mxu1 }
 0x5a3   :  { %8548 = vmatmul.mubr.msk.bf16.vlgmr.msra.gmra.mxu0 %vm246_vm2, %v908_v54  ;;  %v8013_v54 = vld [vmem:[%s10305_s2 + $0x38] sm:$0xf] }
 0x5a4   :  { %8558 = vmatpush3.xpose.msk.msra.mxu0 %vm246_vm2, %v1007_v56  ;;  %v9302_v57 = vpop.f32.mrf.mxu1  ;;  %8559 = vmatprep.mubr.msk.f32.mxu0 %vm9075_vm0, %v9074_v0  ;;  %v1343_v55 = vsel %vm912_vm4, %v8013_v54, 0 }
 0x5a5   :  { %8567 = vmatprep.subr.mxu0 %v9074_v0 }
 0x5a6   :  { %v8555_v58 = vpop.f32.mrf.mxu1 }
 0x5a8   :  { %v9307_v59 = vpop.f32.mrf.mxu1 }
 0x5aa   :  { %v8556_v61 = vpop.f32.mrf.mxu1 }
 0x5ab   :  { %8560 = vmatmul.mubr.msk.f32.vlgmr.msra.gmra.mxu0 %vm246_vm2, %v1005_v60 }
 0x5ac   :  { %v1156_v62 = vpop.f32.mrf.mxu1  ;;  %8569 = vmatprep.mubr.msk.f32.mxu0 %vm9075_vm0, %v9074_v0 }
 0x5ad   :  { %v1161_v63 = vmul.f32 0.35355338, %v1156_v62 }
 0x5ae   :  { %v8566_v1 = vpop.f32.mrf.mxu1 }
 0x5af   :  { %v1163_v2 = vadd.f32 %v1161_v63, %v9209_v28 }
 0x5b1   :  { %v1167_v3 = vsel %vm246_vm2, %v1163_v2, -inf }
 0x5b2   :  { %1168 = vmax.xlane.f32.xlu0 %v1167_v3 }
 0x5c8   :  { %1262 = vrot.lane.b32.xlu0 %v9226_v53, %s9077_s25 }
 0x5cc   :  { %1388 = vrot.lane.b32.xlu0 %v9167_v14, %s9078_s26 }
 0x5d0   :  { %1466 = vrot.lane.b32.xlu0 %v9180_v21, %s9078_s26 }
 0x63b   :  { %v1169_v4 = vpop.xlane.xlu0 %1168 }
 0x63c   :  { %v1171_v7 = vsub.f32 %v1163_v2, %v1169_v4 }
 0x63e   :  { %v1174_v8 = vmul.f32 1.442695, %v1171_v7 }
 0x63f   :  { %v1263_v9 = vpop.permute.xlu0 %1262 }
 0x640   :  { %8911 = vpow2.f32 %v1174_v8  ;;  %8573 = vmatpush3.msra.mxu1 %v1263_v9 }
 0x641   :  { %8583 = vmatprep.subr.mxu1 %v9074_v0 }
 0x64d   :  { %v8912_v10 = vpop.eup %8911 }
 0x64e   :  { %v1179_v11 = vsel %vm246_vm2, %v8912_v10, 0.0 }
 0x64f   :  { %1180 = vadd.xlane.f32.xlu1 %v1179_v11 }
 0x660   :  { %1468 = vrot.lane.b32.xlu1 %v9172_v18, %s9078_s26  ;;  %v1389_v18 = vpop.permute.xlu0 %1388 }
 0x663   :  { %v9324_v13 = vpop.f32.mrf.mxu0 }
 0x664   :  { %v1467_v31 = vpop.permute.xlu0 %1466 }
 0x665   :  { %v8549_v14 = vpop.f32.mrf.mxu0 }
 0x667   :  { %v9326_v15 = vpop.f32.mrf.mxu0 }
 0x669   :  { %v8550_v21 = vpop.f32.mrf.mxu0 }
 0x66b   :  { %v1078_v16 = vpop.f32.mrf.mxu0 }
 0x66c   :  { %v1160_v19 = vmul.f32 0.35355338, %v1078_v16 }
 0x66d   :  { %v8561_v17 = vpop.f32.mrf.mxu0 }
 0x66e   :  { %v1162_v20 = vadd.f32 %v1160_v19, %v9209_v28  ;;  %v8014_v19 = vld [vmem:[%s10305_s2 + $0x3c] sm:$0xf] }
 0x670   :  { %v1164_v22 = vsel %vm246_vm2, %v1162_v20, -inf }
 0x684   :  { %1165 = vmax.xlane.f32.xlu1 %v1164_v22  ;;  %v998_v22 = vadd.f32 %v9302_v57, %v9324_v13  ;;  %v8055_v57 = vld [vmem:[%s10307_s4 + $0x3] ss:$0 sm:$0xff] }
 0x6d8   :  { %v1181_v24 = vpop.xlane.xlu1 %1180 }
 0x6d9   :  { %8913 = vrcp.f32 %v1181_v24 }
 0x6dc   :  { %v1469_v30 = vpop.permute.xlu1 %1468 }
 0x6e6   :  { %v8914_v27 = vpop.eup %8913 }
 0x6e7   :  { %v1185_v29 = vmul.f32 %v8914_v27, %v8912_v10 }
 0x6e9   :  { %8575 = vmatmul.mubr.msk.f32.vlgmr.msra.gmra.mxu1 %vm246_vm2, %v1185_v29  ;;  %v1001_v29 = vadd.f32 %v9307_v59, %v9326_v15 }
 0x6ea   :  { %8584 = vmatpush3.xpose.msk.msra.mxu1 %vm246_vm2, %v1391_v23  ;;  %8585 = vmatprep.mubr.msk.f32.mxu1 %vm9075_vm0, %v9074_v0 }
 0x6eb   :  { %8588 = vmatprep.subr.mxu1 %v9074_v0 }
 0x6ed   :  { %8586 = vmatmul.mubr.msk.f32.vlgmr.msra.gmra.mxu1 %vm246_vm2, %v1389_v18 }
 0x6ee   :  { %8589 = vmatpush3.xpose.msk.msra.mxu1 %vm246_vm2, %v1469_v30  ;;  %8590 = vmatprep.mubr.msk.f32.mxu1 %vm9075_vm0, %v9074_v0 }
 0x6ef   :  { %8598 = vmatprep.subr.mxu1 %v9074_v0 }
 0x6f1   :  { %8591 = vmatmul.mubr.msk.f32.vlgmr.msra.gmra.mxu1 %vm246_vm2, %v1467_v31 }
 0x6f2   :  { %8600 = vmatprep.mubr.msk.f32.mxu1 %vm9075_vm0, %v9074_v0 }
 0x70d   :  { %v1166_v32 = vpop.xlane.xlu1 %1165 }
 0x70e   :  { %v1170_v33 = vsub.f32 %v1162_v20, %v1166_v32  ;;  %v1727_v20 = vsel %vm912_vm4, %v8014_v19, 0 }
 0x710   :  { %v1172_v34 = vmul.f32 1.442695, %v1170_v33 }
 0x712   :  { %8915 = vpow2.f32 %v1172_v34 }
 0x71f   :  { %v8916_v35 = vpop.eup %8915 }
 0x720   :  { %v1176_v36 = vsel %vm246_vm2, %v8916_v35, 0.0 }
 0x721   :  { %1177 = vadd.xlane.f32.xlu0 %v1176_v36 }
 0x737   :  { %1186 = vrot.lane.b32.xlu0 %v9222_v50, %s9077_s25 }
 0x73b   :  { %1646 = vrot.lane.b32.xlu0 %v9226_v53, %s9078_s26 }
 0x7a9   :  { %v1334_v37 = vpop.f32.mrf.mxu1 }
 0x7aa   :  { %v1178_v38 = vpop.xlane.xlu0 %1177 }
 0x7ab   :  { %8917 = vrcp.f32 %v1178_v38  ;;  %v8576_v39 = vpop.f32.mrf.mxu1 }
 0x7ad   :  { %v1462_v40 = vpop.f32.mrf.mxu1 }
 0x7ae   :  { %v1544_v41 = vmul.f32 0.35355338, %v1462_v40  ;;  %v1187_v42 = vpop.permute.xlu0 %1186 }
 0x7af   :  { %8568 = vmatpush3.msra.mxu0 %v1187_v42  ;;  %v8587_v43 = vpop.f32.mrf.mxu1 }
 0x7b0   :  { %v1546_v12 = vadd.f32 %v1544_v41, %v9209_v28  ;;  %8577 = vmatprep.subr.bf16.mxu0 %v9074_v0 }
 0x7b1   :  { %v1540_v44 = vpop.f32.mrf.mxu1 }
 0x7b2   :  { %v1545_v45 = vmul.f32 0.35355338, %v1540_v44  ;;  %v1647_v46 = vpop.permute.xlu0 %1646  ;;  %v1548_v47 = vsel %vm246_vm2, %v1546_v12, -inf }
 0x7b3   :  { %v8592_v48 = vpop.f32.mrf.mxu1  ;;  %1549 = vmax.xlane.f32.xlu1 %v1548_v47  ;;  %8599 = vmatpush3.msra.mxu1 %v1647_v46 }
 0x7b4   :  { %v1547_v53 = vadd.f32 %v1545_v45, %v9209_v28 }
 0x7b6   :  { %v1551_v49 = vsel %vm246_vm2, %v1547_v53, -inf }
 0x7b7   :  { %1552 = vmax.xlane.f32.xlu1 %v1551_v49 }
 0x7b8   :  { %v8918_v51 = vpop.eup %8917 }
 0x7b9   :  { %v1184_v52 = vmul.f32 %v8918_v51, %v8916_v35 }
 0x7bb   :  { %8570 = vmatmul.mubr.msk.f32.vlgmr.msra.gmra.mxu0 %vm246_vm2, %v1184_v52 }
 0x7bc   :  { %8579 = vmatprep.mubr.msk.bf16.mxu0 %vm9075_vm0, %v9074_v0  ;;  %8578 = vmatpush3.bf16.msra.mxu0 %v1343_v55  ;;  %v1837_v55 = vld [vmem:[#allocation2 + $0x80] sm:$0xff] }
 0x7bd   :  { %8593 = vmatprep.subr.mxu0 %v9074_v0 }
 0x83c   :  { %v1550_v56 = vpop.xlane.xlu1 %1549 }
 0x83d   :  { %v1554_v58 = vsub.f32 %v1546_v12, %v1550_v56  ;;  %v1845_v56 = vld [vmem:[#allocation2 + $0xc0] sm:$0xff] }
 0x83f   :  { %v1556_v60 = vmul.f32 1.442695, %v1554_v58  ;;  %v8076_v58 = vcombine.high %v1837_v55, %v1845_v56 }
 0x840   :  { %v1553_v61 = vpop.xlane.xlu1 %1552 }
 0x841   :  { %8919 = vpow2.f32 %v1556_v60  ;;  %v1555_v62 = vsub.f32 %v1547_v53, %v1553_v61  ;;  %v1846_v60 = vld [vmem:[#allocation2 + $0xc8] sm:$0xff]  ;;  %v8075_v61 = vcombine.low %v1837_v55, %v1845_v56  ;;  %2148 = vmatprep.subr.bf16.mxu1 %v8076_v58 }
 0x843   :  { %v1558_v63 = vmul.f32 1.442695, %v1555_v62 }
 0x845   :  { %8921 = vpow2.f32 %v1558_v63 }
 0x84e   :  { %v8920_v1 = vpop.eup %8919 }
 0x84f   :  { %v1560_v2 = vsel %vm246_vm2, %v8920_v1, 0.0 }
 0x850   :  { %1561 = vadd.xlane.f32.xlu1 %v1560_v2  ;;  %v1829_v2 = vld [vmem:[#allocation2 + $0x40] sm:$0xff] }
 0x852   :  { %v8922_v3 = vpop.eup %8921 }
 0x853   :  { %v1563_v4 = vsel %vm246_vm2, %v8922_v3, 0.0 }
 0x854   :  { %1564 = vadd.xlane.f32.xlu1 %v1563_v4 }
 0x865   :  { %1570 = vrot.lane.b32.xlu1 %v9222_v50, %s9078_s26 }
 0x87b   :  { %v1258_v7 = vpop.f32.mrf.mxu0 }
 0x87c   :  { %v1338_v8 = vpack.c.bf16 %v1334_v37, %v1258_v7  ;;  %v1830_v7 = vld [vmem:[#allocation2 + $0x48] sm:$0xff] }
 0x87d   :  { %v8571_v9 = vpop.f32.mrf.mxu0 }
 0x87e   :  { %8580 = vmatmul.mubr.msk.bf16.vlgmr.msra.gmra.mxu0 %vm246_vm2, %v1338_v8 }
 0x87f   :  { %8595 = vmatprep.mubr.msk.f32.mxu0 %vm9075_vm0, %v9074_v0 }
 0x8d9   :  { %v1562_v10 = vpop.xlane.xlu1 %1561 }
 0x8da   :  { %8923 = vrcp.f32 %v1562_v10 }
 0x8dd   :  { %v1565_v11 = vpop.xlane.xlu1 %1564 }
 0x8de   :  { %8925 = vrcp.f32 %v1565_v11  ;;  %v1839_v11 = vld [vmem:[#allocation2 + $0x90] sm:$0xff] }
 0x8e1   :  { %v1571_v14 = vpop.permute.xlu1 %1570 }
 0x8e2   :  { %8594 = vmatpush3.msra.mxu0 %v1571_v14  ;;  %v1847_v14 = vld [vmem:[#allocation2 + $0xd0] sm:$0xff] }
 0x8e3   :  { %8603 = vmatprep.subr.bf16.mxu0 %v9074_v0  ;;  %v8079_v19 = vcombine.low %v1839_v11, %v1847_v14 }
 0x8e7   :  { %v8924_v21 = vpop.eup %8923 }
 0x8e8   :  { %v1568_v16 = vmul.f32 %v8924_v21, %v8920_v1  ;;  %v1821_v1 = vld [vmem:[#allocation2] sm:$0xff]  ;;  %v1840_v21 = vld [vmem:[#allocation2 + $0x98] sm:$0xff] }
 0x8e9   :  { %v8060_v4 = vcombine.high %v1821_v1, %v1829_v2  ;;  %v8059_v8 = vcombine.low %v1821_v1, %v1829_v2 }
 0x8ea   :  { %8596 = vmatmul.mubr.msk.f32.vlgmr.msra.gmra.mxu0 %vm246_vm2, %v1568_v16  ;;  %v9079_v16 = vmov 0  }
 0x8eb   :  { %v8926_v50 = vpop.eup %8925  ;;  %8605 = vmatprep.mubr.msk.bf16.mxu0 %vm9075_vm0, %v9074_v0  ;;  %8604 = vmatpush3.bf16.msra.mxu0 %v1727_v20 }
 0x8ec   :  { %v1569_v17 = vmul.f32 %v8926_v50, %v8922_v3  ;;  %v1822_v3 = vld [vmem:[#allocation2 + $0x8] sm:$0xff]  ;;  %v8080_v50 = vcombine.high %v1839_v11, %v1847_v14 }
 0x8ed   :  { %v8061_v9 = vcombine.low %v1822_v3, %v1830_v7  ;;  %v8062_v10 = vcombine.high %v1822_v3, %v1830_v7  ;;  %v1827_v7 = vld [vmem:[#allocation2 + $0x30] sm:$0xff] }
 0x8ee   :  { %8601 = vmatmul.mubr.msk.f32.vlgmr.msra.gmra.mxu1 %vm246_vm2, %v1569_v17  ;;  %v1848_v17 = vld [vmem:[#allocation2 + $0xd8] sm:$0xff] }
 0x8ef   :  { %2149 = vmatpush1.bf16.msra.mxu1 %v8075_v61  ;;  %2168 = vmatprep.mubr.bf16.mxu1 %v9079_v16  ;;  %v8081_v20 = vcombine.low %v1840_v21, %v1848_v17  ;;  %v1851_v61 = vld [vmem:[#allocation2 + $0xf0] sm:$0xff] }
 0x8f0   :  { %2150 = vmatprep.subr.bf16.mxu1 %v8060_v4 }
 0x8f3   :  { %2151 = vmatpush1.bf16.msra.mxu1 %v8059_v8  ;;  %v1835_v8 = vld [vmem:[#allocation2 + $0x70] sm:$0xff] }
 0x8f4   :  { %2234 = vmatprep.subr.bf16.mxu1 %v8080_v50 }
 0x93e   :  { %v1379_v23 = vpop.f32.mrf.mxu0 }
 0x93f   :  { %v1386_v24 = vadd.f32 %v1379_v23, %v998_v22  ;;  %v8082_v22 = vcombine.high %v1840_v21, %v1848_v17  ;;  %v8072_v21 = vcombine.high %v1827_v7, %v1835_v8  ;;  %v1870_v17 = vld [vmem:[#allocation2 + $0x180] sm:$0xff] }
 0x940   :  { %v8581_v27 = vpop.f32.mrf.mxu0 }
 0x942   :  { %v1382_v18 = vpop.f32.mrf.mxu0 }
 0x943   :  { %v1387_v30 = vadd.f32 %v1382_v18, %v1001_v29 }
 0x944   :  { %v8582_v31 = vpop.f32.mrf.mxu0 }
 0x9aa   :  { %v1642_v32 = vpop.f32.mrf.mxu0 }
 0x9ac   :  { %v8597_v33 = vpop.f32.mrf.mxu0 }
 0x9ad   :  { %v8056_v33 = vld [vmem:[%s10307_s4 + $0x4] ss:$0 sm:$0xff] }
 0x9ae   :  { %v1718_v34 = vpop.f32.mrf.mxu1 }
 0x9af   :  { %v1722_v35 = vpack.c.bf16 %v1718_v34, %v1642_v32 }
 0x9b0   :  { %v8602_v36 = vpop.f32.mrf.mxu1 }
 0x9b1   :  { %8606 = vmatmul.mubr.msk.bf16.vlgmr.msra.gmra.mxu0 %vm246_vm2, %v1722_v35 }
 0x9b2   :  { %2211 = vmatprep.mubr.bf16.mxu0 %v9079_v16 }
 0xa71   :  { %v1763_v13 = vpop.f32.mrf.mxu0 }
 0xa72   :  { %v1770_v37 = vadd.f32 %v1763_v13, %v1386_v24 }
 0xa73   :  { %v8607_v38 = vpop.f32.mrf.mxu0 }
 0xa74   :  { %v1776_v39 = vadd.f32 %v8055_v57, %v1770_v37  ;;  %v1823_v37 = vld [vmem:[#allocation2 + $0x10] sm:$0xff] }
 0xa75   :  { %v1766_v40 = vpop.f32.mrf.mxu0  ;;  %v1831_v38 = vld [vmem:[#allocation2 + $0x50] sm:$0xff] }
 0xa76   :  { %v1771_v59 = vadd.f32 %v1766_v40, %v1387_v30  ;;  %v1778_v15 = vadd.f32 %v1776_v39, %v9142_v5  ;;  %v1824_v39 = vld [vmem:[#allocation2 + $0x18] sm:$0xff] }
 0xa77   :  { %v8608_v41 = vpop.f32.mrf.mxu0  ;;  %v1832_v40 = vld [vmem:[#allocation2 + $0x58] sm:$0xff] }
 0xa78   :  { %v1777_v42 = vadd.f32 %v8055_v57, %v1771_v59  ;;  %v1782_v43 = vsel %vm87_vm1, %v1778_v15, 0.0  ;;  %v8057_v57 = vld [vmem:[%s10307_s4 + $0x5] ss:$0 sm:$0xff] }
 0xa79   :  { %1783 = vadd.xlane.f32.xlu0 %v1782_v43  ;;  %v8066_v43 = vcombine.high %v1824_v39, %v1832_v40 }
 0xa7a   :  { %v1779_v12 = vadd.f32 %v1777_v42, %v9147_v6  ;;  %v1838_v6 = vld [vmem:[#allocation2 + $0x88] sm:$0xff]  ;;  %v8064_v42 = vcombine.high %v1823_v37, %v1831_v38 }
 0xa7b   :  { %v8077_v62 = vcombine.low %v1838_v6, %v1846_v60  ;;  %v8078_v63 = vcombine.high %v1838_v6, %v1846_v60  ;;  %v1843_v60 = vld [vmem:[#allocation2 + $0xb0] sm:$0xff] }
 0xa7c   :  { %v1785_v44 = vsel %vm87_vm1, %v1779_v12, 0.0  ;;  %v8088_v3 = vcombine.high %v1843_v60, %v1851_v61  ;;  %v8087_v11 = vcombine.low %v1843_v60, %v1851_v61  ;;  %v9471_v60 = vsub.s32 5, %v9202_v25 }
 0xa7d   :  { %1786 = vadd.xlane.f32.xlu1 %v1785_v44  ;;  %2191 = vmatprep.subr.bf16.mxu0 %v8078_v63  ;;  %v1849_v44 = vld [vmem:[#allocation2 + $0xe0] sm:$0xff]  ;;  %v1852_v63 = vld [vmem:[#allocation2 + $0xf8] sm:$0xff]  ;;  %v9474_v61 = vsub.s32 7, %v9202_v25 }
 0xa7e   :  { %2192 = vmatpush1.bf16.msra.mxu0 %v8077_v62  ;;  %v1844_v62 = vld [vmem:[#allocation2 + $0xb8] sm:$0xff] }
 0xa7f   :  { %2193 = vmatprep.subr.bf16.mxu0 %v8062_v10  ;;  %v8090_v4 = vcombine.high %v1844_v62, %v1852_v63  ;;  %v1836_v10 = vld [vmem:[#allocation2 + $0x78] sm:$0xff]  ;;  %v8089_v14 = vcombine.low %v1844_v62, %v1852_v63 }
 0xa82   :  { %2194 = vmatpush1.bf16.msra.mxu0 %v8061_v9  ;;  %v1828_v9 = vld [vmem:[#allocation2 + $0x38] sm:$0xff] }
 0xa83   :  { %2277 = vmatprep.subr.bf16.mxu0 %v8082_v22  ;;  %v8074_v50 = vcombine.high %v1828_v9, %v1836_v10  ;;  %v1879_v22 = vld [vmem:[#allocation2 + $0x1c8] sm:$0xff] }
 0xb02   :  { %v1784_v45 = vpop.xlane.xlu0 %1783 }
 0xb03   :  { %v1789_v46 = vmul.f32 0.03125, %v1784_v45  ;;  %v1842_v45 = vld [vmem:[#allocation2 + $0xa8] sm:$0xff] }
 0xb05   :  { %v1791_v47 = vsub.f32 %v1778_v15, %v1789_v46  ;;  %v1850_v46 = vld [vmem:[#allocation2 + $0xe8] sm:$0xff] }
 0xb06   :  { %v1787_v48 = vpop.xlane.xlu1 %1786  ;;  %v8085_v56 = vcombine.low %v1842_v45, %v1850_v46 }
 0xb07   :  { %v1790_v53 = vmul.f32 0.03125, %v1787_v48  ;;  %v1793_v49 = vmul.f32 %v1791_v47, %v1791_v47  ;;  %v8065_v48 = vcombine.low %v1824_v39, %v1832_v40  ;;  %v9433_v39 = vld [vmem:[#allocation2 + $0x198] sm:$0xff] }
 0xb09   :  { %v1792_v51 = vsub.f32 %v1779_v12, %v1790_v53  ;;  %v1795_v52 = vsel %vm87_vm1, %v1793_v49, 0.0  ;;  %v1841_v12 = vld [vmem:[#allocation2 + $0xa0] sm:$0xff]  ;;  %v8086_v49 = vcombine.high %v1842_v45, %v1850_v46  ;;  %v9449_v45 = vsub.s32 3, %v9202_v25 }
 0xb0a   :  { %1796 = vadd.xlane.f32.xlu0 %v1795_v52  ;;  %v8084_v53 = vcombine.high %v1841_v12, %v1849_v44  ;;  %v1833_v52 = vld [vmem:[#allocation2 + $0x60] sm:$0xff]  ;;  %v8083_v55 = vcombine.low %v1841_v12, %v1849_v44  ;;  %v9446_v44 = vsub.s32 1, %v9202_v25  ;;  %v9452_v46 = vsub.s32 0, %v9202_v25 }
 0xb0b   :  { %v1794_v5 = vmul.f32 %v1792_v51, %v1792_v51 }
 0xb0d   :  { %v1798_v54 = vsel %vm87_vm1, %v1794_v5, 0.0  ;;  %v1826_v5 = vld [vmem:[#allocation2 + $0x28] sm:$0xff] }
 0xb0e   :  { %1799 = vadd.xlane.f32.xlu0 %v1798_v54  ;;  %v1834_v54 = vld [vmem:[#allocation2 + $0x68] sm:$0xff] }
 0xb0f   :  { %v8070_v58 = vcombine.high %v1826_v5, %v1834_v54  ;;  %v8069_v2 = vcombine.low %v1826_v5, %v1834_v54 }
 0xb93   :  { %v1797_v23 = vpop.xlane.xlu0 %1796 }
 0xb94   :  { %v1801_v24 = vmul.f32 0.03125, %v1797_v23  ;;  %v8071_v23 = vcombine.low %v1827_v7, %v1835_v8 }
 0xb96   :  { %v1803_v27 = vadd.f32 1e-05, %v1801_v24  ;;  %v8073_v24 = vcombine.low %v1828_v9, %v1836_v10 }
 0xb97   :  { %v1800_v29 = vpop.xlane.xlu0 %1799 }
 0xb98   :  { %8927 = vrsqrt.f32 %v1803_v27  ;;  %v1802_v18 = vmul.f32 0.03125, %v1800_v29 }
 0xb9a   :  { %v1804_v30 = vadd.f32 1e-05, %v1802_v18 }
 0xb9c   :  { %8929 = vrsqrt.f32 %v1804_v30 }
 0xba5   :  { %v8928_v31 = vpop.eup %8927 }
 0xba6   :  { %v1807_v32 = vmul.f32 %v8928_v31, %v1791_v47  ;;  %v8063_v47 = vcombine.low %v1823_v37, %v1831_v38  ;;  %v1854_v31 = vld [vmem:[#allocation2 + $0x100] sm:$0xff]  ;;  %v9429_v37 = vld [vmem:[#allocation2 + $0x190] sm:$0xff] }
 0xba7   :  { %v9431_v38 = vld [vmem:[#allocation2 + $0x1d0] sm:$0xff] }
 0xba8   :  { %v1813_v35 = vmul.f32 %v8056_v33, %v1807_v32  ;;  %v1862_v32 = vld [vmem:[#allocation2 + $0x140] sm:$0xff]  ;;  %v8121_v40 = vcombine.high %v9429_v37, %v9431_v38 }
 0xba9   :  { %v8930_v34 = vpop.eup %8929 }
 0xbaa   :  { %v1808_v36 = vmul.f32 %v8930_v34, %v1792_v51  ;;  %v9399_v59 = vadd.f32 %v8057_v57, %v1813_v35  ;;  %v1825_v51 = vld [vmem:[#allocation2 + $0x20] sm:$0xff]  ;;  %v8101_v34 = vcombine.high %v1854_v31, %v1862_v32  ;;  %v1863_v35 = vld [vmem:[#allocation2 + $0x148] sm:$0xff] }
 0xbab   :  { %v8068_v6 = vcombine.high %v1825_v51, %v1833_v52  ;;  %v8067_v1 = vcombine.low %v1825_v51, %v1833_v52 }
 0xbac   :  { %v1814_v13 = vmul.f32 %v8056_v33, %v1808_v36  ;;  %v1855_v33 = vld [vmem:[#allocation2 + $0x108] sm:$0xff]  ;;  %v8100_v36 = vcombine.low %v1854_v31, %v1862_v32 }
 0xbae   :  { %v9401_v15 = vadd.f32 %v8057_v57, %v1814_v13  ;;  %v8102_v57 = vcombine.low %v1855_v33, %v1863_v35  ;;  %v8103_v13 = vcombine.high %v1855_v33, %v1863_v35 }
 0xbb0   :  { %v9405_v41 = vpack.c.bf16 %v9401_v15, %v9399_v59 }
 0xbb2   :  { %8091 = vmatmul.mubr.msk.bf16.vlgmr.msra.gmra.mxu1 %vm87_vm1, %v9405_v41  ;;  %8092 = vmatmul.mubr.msk.bf16.vlgmr.msra.gmra.mxu0 %vm87_vm1, %v9405_v41 }
 0xbb3   :  { %2235 = vmatpush1.bf16.msra.mxu1 %v8079_v19  ;;  %2278 = vmatpush1.bf16.msra.mxu0 %v8081_v20  ;;  %v1878_v19 = vld [vmem:[#allocation2 + $0x1c0] sm:$0xff]  ;;  %v1871_v20 = vld [vmem:[#allocation2 + $0x188] sm:$0xff] }
 0xbb4   :  { %2236 = vmatprep.subr.bf16.mxu1 %v8064_v42  ;;  %2279 = vmatprep.subr.bf16.mxu0 %v8066_v43  ;;  %v8117_v27 = vcombine.high %v1870_v17, %v1878_v19  ;;  %v8119_v29 = vcombine.high %v1871_v20, %v1879_v22  ;;  %v8116_v18 = vcombine.low %v1870_v17, %v1878_v19 }
 0xbb5   :  { %2254 = vmatprep.mubr.bf16.mxu1 %v9079_v16  ;;  %2297 = vmatprep.mubr.bf16.mxu0 %v9079_v16  ;;  %v8118_v30 = vcombine.low %v1871_v20, %v1879_v22  ;;  %v8120_v42 = vcombine.low %v9429_v37, %v9431_v38  ;;  %v9484_v20 = vld [vmem:[#allocation2 + $0x110] sm:$0xff]  ;;  %v9519_v37 = vld [vmem:[#allocation2 + $0x1a0] sm:$0xff] }
 0xbb6   :  { %v9486_v22 = vld [vmem:[#allocation2 + $0x150] sm:$0xff]  ;;  %v9521_v38 = vld [vmem:[#allocation2 + $0x1e0] sm:$0xff] }
 0xbb7   :  { %2237 = vmatpush1.bf16.msra.mxu1 %v8063_v47  ;;  %2280 = vmatpush1.bf16.msra.mxu0 %v8065_v48  ;;  %v9455_v47 = vsub.s32 2, %v9202_v25  ;;  %v9460_v48 = vld [vmem:[%s10308_s5] ss:$2 sm:$0xff] }
 0xbb8   :  { %2320 = vmatprep.subr.bf16.mxu1 %v8084_v53  ;;  %2363 = vmatprep.subr.bf16.mxu0 %v8086_v49  ;;  %v1900_v51 = vrot.slane %v9460_v48, %v9446_v44  ;;  %v1908_v52 = vrot.slane %v9460_v48, %v9449_v45  ;;  %v1896_v5 = vrot.slane %v9460_v48, %v9452_v46 }
 0xbb9   :  { %v1904_v54 = vrot.slane %v9460_v48, %v9455_v47  ;;  %v1916_v17 = vrot.slane %v9460_v48, %v9471_v60  ;;  %v1924_v19 = vrot.slane %v9460_v48, %v9474_v61 }
 0xbba   :  { %8093 = vmatmul.mubr.msk.bf16.vlgmr.msra.gmra.mxu1 %vm87_vm1, %v9405_v41  ;;  %8094 = vmatmul.mubr.msk.bf16.vlgmr.msra.gmra.mxu0 %vm87_vm1, %v9405_v41 }
 0xbbb   :  { %2321 = vmatpush1.bf16.msra.mxu1 %v8083_v55  ;;  %2364 = vmatpush1.bf16.msra.mxu0 %v8085_v56 }
 0xbbc   :  { %2322 = vmatprep.subr.bf16.mxu1 %v8068_v6  ;;  %2365 = vmatprep.subr.bf16.mxu0 %v8070_v58 }
 0xbbd   :  { %2340 = vmatprep.mubr.bf16.mxu1 %v9079_v16  ;;  %2383 = vmatprep.mubr.bf16.mxu0 %v9079_v16 }
 0xbbf   :  { %2323 = vmatpush1.bf16.msra.mxu1 %v8067_v1  ;;  %2366 = vmatpush1.bf16.msra.mxu0 %v8069_v2 }
 0xbc0   :  { %2406 = vmatprep.subr.bf16.mxu1 %v8088_v3  ;;  %2449 = vmatprep.subr.bf16.mxu0 %v8090_v4 }
 0xbc2   :  { %8095 = vmatmul.mubr.msk.bf16.vlgmr.msra.gmra.mxu1 %vm87_vm1, %v9405_v41  ;;  %8096 = vmatmul.mubr.msk.bf16.vlgmr.msra.gmra.mxu0 %vm87_vm1, %v9405_v41 }
 0xbc3   :  { %2407 = vmatpush1.bf16.msra.mxu1 %v8087_v11  ;;  %2450 = vmatpush1.bf16.msra.mxu0 %v8089_v14 }
 0xbc4   :  { %2408 = vmatprep.subr.bf16.mxu1 %v8072_v21  ;;  %2451 = vmatprep.subr.bf16.mxu0 %v8074_v50 }
 0xbc5   :  { %2426 = vmatprep.mubr.bf16.mxu1 %v9079_v16  ;;  %2469 = vmatprep.mubr.bf16.mxu0 %v9079_v16 }
 0xbc7   :  { %2409 = vmatpush1.bf16.msra.mxu1 %v8071_v23  ;;  %2452 = vmatpush1.bf16.msra.mxu0 %v8073_v24 }
 0xbc8   :  { %2704 = vmatprep.subr.bf16.mxu1 %v8117_v27  ;;  %2745 = vmatprep.subr.bf16.mxu0 %v8119_v29 }
 0xbca   :  { %8097 = vmatmul.mubr.msk.bf16.vlgmr.msra.gmra.mxu1 %vm87_vm1, %v9405_v41  ;;  %8098 = vmatmul.mubr.msk.bf16.vlgmr.msra.gmra.mxu0 %vm87_vm1, %v9405_v41  ;;  %v9437_v41 = vld [vmem:[#allocation2 + $0x1d8] sm:$0xff] }
 0xbcb   :  { %2705 = vmatpush1.bf16.xpose.msra.mxu1 %v8116_v18  ;;  %2746 = vmatpush1.bf16.xpose.msra.mxu0 %v8118_v30  ;;  %v8122_v43 = vcombine.low %v9433_v39, %v9437_v41  ;;  %v8123_v12 = vcombine.high %v9433_v39, %v9437_v41  ;;  %v9488_v18 = vld [vmem:[#allocation2 + $0x118] sm:$0xff] }
 0xbcc   :  { %2706 = vmatprep.subr.bf16.mxu1 %v8101_v34  ;;  %2747 = vmatprep.subr.bf16.mxu0 %v8103_v13  ;;  %v9490_v30 = vld [vmem:[#allocation2 + $0x158] sm:$0xff] }
 0xbd3   :  { %2707 = vmatpush1.bf16.xpose.msra.mxu1 %v8100_v36  ;;  %2748 = vmatpush1.bf16.xpose.msra.mxu0 %v8102_v57 }
 0xbd4   :  { %2786 = vmatprep.subr.bf16.mxu1 %v8121_v40  ;;  %2827 = vmatprep.subr.bf16.mxu0 %v8123_v12 }
 0xc72   :  { %v2170_v53 = vpop.f32.mrf.mxu1  ;;  %v2213_v49 = vpop.f32.mrf.mxu0 }
 0xc73   :  { %v2171_v3 = vadd.f32 %v2170_v53, %v1896_v5  ;;  %v2214_v4 = vadd.f32 %v2213_v49, %v1904_v54  ;;  %v8105_v53 = vcombine.high %v9484_v20, %v9486_v22  ;;  %v8107_v49 = vcombine.high %v9488_v18, %v9490_v30 }
 0xc74   :  { %v2172_v55 = vpop.f32.mrf.mxu1  ;;  %v2215_v56 = vpop.f32.mrf.mxu0 }
 0xc75   :  { %v2173_v62 = vadd.f32 %v2172_v55, %v1900_v51  ;;  %v2216_v63 = vadd.f32 %v2215_v56, %v1908_v52  ;;  %v2480_v31 = vmax.f32 %v2171_v3, 0.0  ;;  %v2482_v32 = vmax.f32 %v2214_v4, 0.0  ;;  %v1875_v3 = vld [vmem:[#allocation2 + $0x1a8] sm:$0xff] }
 0xc76   :  { %v2174_v6 = vpop.f32.mrf.mxu1  ;;  %v2217_v58 = vpop.f32.mrf.mxu0  ;;  %v1883_v4 = vld [vmem:[#allocation2 + $0x1e8] sm:$0xff] }
 0xc77   :  { %v2175_v1 = vadd.f32 %v2174_v6, %v1896_v5  ;;  %v2218_v2 = vadd.f32 %v2217_v58, %v1904_v54  ;;  %v2481_v23 = vmax.f32 %v2173_v62, 0.0  ;;  %v2483_v24 = vmax.f32 %v2216_v63, 0.0  ;;  %v9511_v62 = vld [vmem:[%s10308_s5 + $0x10] ss:$2 sm:$0xff] }
 0xc78   :  { %v2176_v7 = vpop.f32.mrf.mxu1  ;;  %v2219_v8 = vpop.f32.mrf.mxu0  ;;  %v9497_v5 = vsub.s32 4, %v9202_v25  ;;  %v9500_v54 = vsub.s32 6, %v9202_v25 }
 0xc79   :  { %v2177_v9 = vadd.f32 %v2176_v7, %v1900_v51  ;;  %v2220_v10 = vadd.f32 %v2219_v8, %v1908_v52  ;;  %v2496_v11 = vmax.f32 %v2175_v1, 0.0  ;;  %v2498_v14 = vmax.f32 %v2218_v2, 0.0 }
 0xc7a   :  { %v9476_v21 = vpop.f32.mrf.mxu1  ;;  %v9478_v50 = vpop.f32.mrf.mxu0  ;;  %v1932_v2 = vrot.slane %v9511_v62, %v9446_v44  ;;  %v1912_v7 = vrot.slane %v9460_v48, %v9497_v5  ;;  %v1920_v8 = vrot.slane %v9460_v48, %v9500_v54  ;;  %v8125_v48 = vcombine.high %v9519_v37, %v9521_v38 }
 0xc7b   :  { %v2497_v27 = vmax.f32 %v2177_v9, 0.0  ;;  %v2499_v29 = vmax.f32 %v2220_v10, 0.0  ;;  %v2512_v57 = vpack.c.bf16 %v2496_v11, %v2480_v31  ;;  %v2514_v13 = vpack.c.bf16 %v2498_v14, %v2482_v32 }
 0xc7c   :  { %v2258_v33 = vpop.f32.mrf.mxu1  ;;  %v2301_v34 = vpop.f32.mrf.mxu0  ;;  %v1940_v10 = vrot.slane %v9511_v62, %v9449_v45  ;;  %v8104_v14 = vcombine.low %v9484_v20, %v9486_v22  ;;  %v8127_v32 = vcombine.high %v1875_v3, %v1883_v4  ;;  %v2300_v20 = vadd.f32 %v9478_v50, %v1920_v8 }
 0xc7d   :  { %v2513_v35 = vpack.c.bf16 %v2497_v27, %v2481_v23  ;;  %v2515_v36 = vpack.c.bf16 %v2499_v29, %v2483_v24  ;;  %v2259_v51 = vadd.f32 %v2258_v33, %v1916_v17  ;;  %v2302_v52 = vadd.f32 %v2301_v34, %v1924_v19 }
 0xc7e   :  { %v2260_v40 = vpop.f32.mrf.mxu1  ;;  %v2303_v12 = vpop.f32.mrf.mxu0  ;;  %v2257_v34 = vadd.f32 %v9476_v21, %v1912_v7 }
 0xc7f   :  { %2724 = vmatprep.mubr.bf16.mxu1 %v2513_v35  ;;  %2765 = vmatprep.mubr.bf16.mxu0 %v2515_v36  ;;  %v2485_v39 = vmax.f32 %v2259_v51, 0.0  ;;  %v2487_v41 = vmax.f32 %v2302_v52, 0.0  ;;  %v2261_v24 = vadd.f32 %v2260_v40, %v1912_v7  ;;  %v2304_v27 = vadd.f32 %v2303_v12, %v1920_v8  ;;  %v1858_v51 = vld [vmem:[#allocation2 + $0x120] sm:$0xff] }
 0xc80   :  { %v2262_v55 = vpop.f32.mrf.mxu1  ;;  %v2305_v56 = vpop.f32.mrf.mxu0  ;;  %2725 = vmatmul.mubr.bf16.vlgmr.msra.gmra.mxu1 %v2512_v57  ;;  %2766 = vmatmul.mubr.bf16.vlgmr.msra.gmra.mxu0 %v2514_v13  ;;  %v2484_v50 = vmax.f32 %v2257_v34, 0.0  ;;  %v2486_v52 = vmax.f32 %v2300_v20, 0.0  ;;  %v8126_v8 = vcombine.low %v1875_v3, %v1883_v4  ;;  %v1928_v3 = vrot.slane %v9511_v62, %v9452_v46  ;;  %v1877_v4 = vld [vmem:[#allocation2 + $0x1b8] sm:$0xff] }
 0xc81   :  { %v2263_v6 = vadd.f32 %v2262_v55, %v1916_v17  ;;  %v2306_v58 = vadd.f32 %v2305_v56, %v1924_v19  ;;  %2787 = vmatpush1.bf16.xpose.msra.mxu1 %v8120_v42  ;;  %2828 = vmatpush1.bf16.xpose.msra.mxu0 %v8122_v43  ;;  %v8106_v19 = vcombine.low %v9488_v18, %v9490_v30  ;;  %v2500_v57 = vmax.f32 %v2261_v24, 0.0  ;;  %v1866_v56 = vld [vmem:[#allocation2 + $0x160] sm:$0xff] }
 0xc82   :  { %v9513_v63 = vpop.f32.mrf.mxu1  ;;  %v9515_v1 = vpop.f32.mrf.mxu0  ;;  %2788 = vmatprep.subr.bf16.mxu1 %v8105_v53  ;;  %2829 = vmatprep.subr.bf16.mxu0 %v8107_v49  ;;  %v2502_v13 = vmax.f32 %v2304_v27, 0.0  ;;  %v8108_v27 = vcombine.low %v1858_v51, %v1866_v56 }
 0xc83   :  { %v2501_v42 = vmax.f32 %v2263_v6, 0.0  ;;  %v2503_v43 = vmax.f32 %v2306_v58, 0.0  ;;  %v1859_v6 = vld [vmem:[#allocation2 + $0x128] sm:$0xff] }
 0xc84   :  { %v2344_v9 = vpop.f32.mrf.mxu1  ;;  %v2387_v11 = vpop.f32.mrf.mxu0  ;;  %v1867_v58 = vld [vmem:[#allocation2 + $0x168] sm:$0xff] }
 0xc85   :  { %v2517_v17 = vpack.c.bf16 %v2501_v42, %v2485_v39  ;;  %v2519_v23 = vpack.c.bf16 %v2503_v43, %v2487_v41  ;;  %v2345_v33 = vadd.f32 %v2344_v9, %v1932_v2  ;;  %v2388_v22 = vadd.f32 %v2387_v11, %v1940_v10 }
 0xc86   :  { %v2346_v29 = vpop.f32.mrf.mxu1  ;;  %v9533_v31 = vpop.f32.mrf.mxu0  ;;  %v8124_v39 = vcombine.low %v9519_v37, %v9521_v38  ;;  %v2516_v42 = vpack.c.bf16 %v2500_v57, %v2484_v50  ;;  %v2518_v43 = vpack.c.bf16 %v2502_v13, %v2486_v52  ;;  %v8111_v11 = vcombine.high %v1859_v6, %v1867_v58  ;;  %v1876_v37 = vld [vmem:[#allocation2 + $0x1b0] sm:$0xff] }
 0xc87   :  { %2806 = vmatprep.mubr.bf16.mxu1 %v2517_v17  ;;  %2847 = vmatprep.mubr.bf16.mxu0 %v2519_v23  ;;  %v2489_v53 = vmax.f32 %v2345_v33, 0.0  ;;  %v2491_v55 = vmax.f32 %v2388_v22, 0.0  ;;  %v1884_v38 = vld [vmem:[#allocation2 + $0x1f0] sm:$0xff]  ;;  %v1936_v23 = vrot.slane %v9511_v62, %v9455_v47  ;;  %v8110_v34 = vcombine.low %v1859_v6, %v1867_v58  ;;  %v1869_v58 = vld [vmem:[#allocation2 + $0x178] sm:$0xff] }
 0xc88   :  { %v2348_v35 = vpop.f32.mrf.mxu1  ;;  %v2391_v18 = vpop.f32.mrf.mxu0  ;;  %v8129_v20 = vcombine.high %v1876_v37, %v1884_v38  ;;  %v1860_v50 = vld [vmem:[#allocation2 + $0x130] sm:$0xff]  ;;  %v8128_v6 = vcombine.low %v1876_v37, %v1884_v38 }
 0xc89   :  { %v2349_v30 = vadd.f32 %v2348_v35, %v1932_v2  ;;  %v2392_v36 = vadd.f32 %v2391_v18, %v1940_v10  ;;  %2789 = vmatpush1.bf16.xpose.msra.mxu1 %v8104_v14  ;;  %2830 = vmatpush1.bf16.xpose.msra.mxu0 %v8106_v19  ;;  %v8109_v10 = vcombine.high %v1858_v51, %v1866_v56  ;;  %v1885_v19 = vld [vmem:[#allocation2 + $0x1f8] sm:$0xff]  ;;  %v1868_v52 = vld [vmem:[#allocation2 + $0x170] sm:$0xff] }
 0xc8a   :  { %v9539_v40 = vpop.f32.mrf.mxu1  ;;  %v9541_v12 = vpop.f32.mrf.mxu0  ;;  %2868 = vmatprep.subr.bf16.mxu1 %v8125_v48  ;;  %2909 = vmatprep.subr.bf16.mxu0 %v8127_v32  ;;  %v2347_v48 = vadd.f32 %v2346_v29, %v1928_v3  ;;  %v1948_v32 = vrot.slane %v9511_v62, %v9471_v60  ;;  %v2390_v22 = vadd.f32 %v9533_v31, %v1936_v23 }
 0xc8b   :  { %v2505_v49 = vmax.f32 %v2349_v30, 0.0  ;;  %v2507_v21 = vmax.f32 %v2392_v36, 0.0  ;;  %v1956_v35 = vrot.slane %v9511_v62, %v9474_v61  ;;  %v8131_v18 = vcombine.high %v1877_v4, %v1885_v19 }
 0xc8c   :  { %v2430_v2 = vpop.f32.mrf.mxu1  ;;  %v2473_v7 = vpop.f32.mrf.mxu0  ;;  %v2343_v30 = vadd.f32 %v9513_v63, %v1928_v3  ;;  %v2386_v57 = vadd.f32 %v9515_v1, %v1936_v23  ;;  %v2504_v29 = vmax.f32 %v2347_v48, 0.0  ;;  %v1861_v63 = vld [vmem:[#allocation2 + $0x138] sm:$0xff]  ;;  %v8112_v37 = vcombine.low %v1860_v50, %v1868_v52 }
 0xc8d   :  { %v2521_v41 = vpack.c.bf16 %v2505_v49, %v2489_v53  ;;  %v2523_v9 = vpack.c.bf16 %v2507_v21, %v2491_v55  ;;  %v2431_v53 = vadd.f32 %v2430_v2, %v1948_v32  ;;  %v2506_v49 = vmax.f32 %v2390_v22, 0.0 }
 0xc8e   :  { %v9545_v14 = vpop.f32.mrf.mxu1  ;;  %v9547_v17 = vpop.f32.mrf.mxu0  ;;  %v2474_v21 = vadd.f32 %v2473_v7, %v1956_v35  ;;  %v2488_v51 = vmax.f32 %v2343_v30, 0.0  ;;  %v2490_v55 = vmax.f32 %v2386_v57, 0.0  ;;  %v8113_v2 = vcombine.high %v1860_v50, %v1868_v52 }
 0xc8f   :  { %v2493_v1 = vmax.f32 %v2431_v53, 0.0  ;;  %v8114_v3 = vcombine.low %v1861_v63, %v1869_v58 }
 0xc90   :  { %2807 = vmatmul.mubr.bf16.vlgmr.msra.gmra.mxu1 %v2516_v42  ;;  %2848 = vmatmul.mubr.bf16.vlgmr.msra.gmra.mxu0 %v2518_v43  ;;  %v2434_v24 = vpop.f32.mrf.mxu1  ;;  %v2477_v33 = vpop.f32.mrf.mxu0  ;;  %v2522_v42 = vpack.c.bf16 %v2506_v49, %v2490_v55  ;;  %v2495_v43 = vmax.f32 %v2474_v21, 0.0 }
 0xc91   :  { %2869 = vmatpush1.bf16.xpose.msra.mxu1 %v8124_v39  ;;  %2888 = vmatprep.mubr.bf16.mxu1 %v2521_v41  ;;  %v2435_v36 = vadd.f32 %v2434_v24, %v1948_v32  ;;  %v2478_v13 = vadd.f32 %v2477_v33, %v1956_v35  ;;  %v2520_v39 = vpack.c.bf16 %v2504_v29, %v2488_v51  ;;  %v9582_v33 = vld [vmem:[%s10304_s1] sm:$0xff] }
 0xc92   :  { %2910 = vmatpush1.bf16.xpose.msra.mxu0 %v8126_v8  ;;  %2929 = vmatprep.mubr.bf16.mxu0 %v2523_v9  ;;  %v8130_v41 = vcombine.low %v1877_v4, %v1885_v19  ;;  %v8115_v9 = vcombine.high %v1861_v63, %v1869_v58  ;;  %v8099_v35 = vld [vmem:[%s10307_s4 + $0x6] ss:$0 sm:$0xff] }
 0xc93   :  { %2870 = vmatprep.subr.bf16.mxu1 %v8109_v10  ;;  %2911 = vmatprep.subr.bf16.mxu0 %v8111_v11  ;;  %v2509_v31 = vmax.f32 %v2435_v36, 0.0  ;;  %v2511_v56 = vmax.f32 %v2478_v13, 0.0  ;;  %v1944_v10 = vrot.slane %v9511_v62, %v9497_v5  ;;  %v1952_v11 = vrot.slane %v9511_v62, %v9500_v54 }
 0xc95   :  { %v2525_v8 = vpack.c.bf16 %v2509_v31, %v2493_v1  ;;  %v2527_v7 = vpack.c.bf16 %v2511_v56, %v2495_v43  ;;  %v2433_v38 = vadd.f32 %v9545_v14, %v1944_v10  ;;  %v2476_v4 = vadd.f32 %v9547_v17, %v1952_v11  ;;  %v8884_v14 = vld [vmem:[%s10305_s2 + $0x48] sm:$0xff]   ;;  %v8886_v17 = vld [vmem:[%s10305_s2 + $0x40] sm:$0xff]  }
 0xc96   :  { %v2429_v19 = vadd.f32 %v9539_v40, %v1944_v10  ;;  %v2472_v23 = vadd.f32 %v9541_v12, %v1952_v11  ;;  %v8883_v40 = vld [vmem:[%s10305_s2 + $0x58] sm:$0xff]  }
 0xc97   :  { %v2508_v24 = vmax.f32 %v2433_v38, 0.0 }
 0xc98   :  { %v2492_v48 = vmax.f32 %v2429_v19, 0.0  ;;  %v2494_v62 = vmax.f32 %v2472_v23, 0.0 }
 0xc99   :  { %2871 = vmatpush1.bf16.xpose.msra.mxu1 %v8108_v27  ;;  %v2510_v27 = vmax.f32 %v2476_v4, 0.0 }
 0xc9a   :  { %2912 = vmatpush1.bf16.xpose.msra.mxu0 %v8110_v34  ;;  %2950 = vmatprep.subr.bf16.mxu1 %v8129_v20  ;;  %v2524_v32 = vpack.c.bf16 %v2508_v24, %v2492_v48  ;;  %v9587_v34 = vld [vmem:[%s10304_s1 + $0x8] sm:$0xff]  ;;  %v8885_v20 = vld [vmem:[%s10305_s2 + $0x50] sm:$0xff]  }
 0xc9b   :  { %2991 = vmatprep.subr.bf16.mxu0 %v8131_v18  ;;  %v2526_v12 = vpack.c.bf16 %v2510_v27, %v2494_v62  ;;  %v9598_v22 = vpack.c.bf16 %v9587_v34, %v9582_v33 }
 0xca0   :  { %2889 = vmatmul.mubr.bf16.vlgmr.msra.gmra.mxu1 %v2520_v39 }
 0xca1   :  { %2930 = vmatmul.mubr.bf16.vlgmr.msra.gmra.mxu0 %v2522_v42  ;;  %2951 = vmatpush1.bf16.xpose.msra.mxu1 %v8128_v6 }
 0xca2   :  { %2970 = vmatprep.mubr.bf16.mxu1 %v2525_v8  ;;  %2992 = vmatpush1.bf16.xpose.msra.mxu0 %v8130_v41 }
 0xca3   :  { %3011 = vmatprep.mubr.bf16.mxu0 %v2527_v7  ;;  %2952 = vmatprep.subr.bf16.mxu1 %v8113_v2 }
 0xca4   :  { %2993 = vmatprep.subr.bf16.mxu0 %v8115_v9 }
 0xca9   :  { %2953 = vmatpush1.bf16.xpose.msra.mxu1 %v8112_v37 }
 0xcaa   :  { %2994 = vmatpush1.bf16.xpose.msra.mxu0 %v8114_v3  ;;  %8609 = vmatprep.subr.bf16.mxu1 %v9074_v0 }
 0xcab   :  { %8617 = vmatprep.subr.bf16.mxu0 %v9074_v0 }
 0xcb0   :  { %2971 = vmatmul.mubr.bf16.vlgmr.msra.gmra.mxu1 %v2524_v32 }
 0xcb1   :  { %3012 = vmatmul.mubr.bf16.vlgmr.msra.gmra.mxu0 %v2526_v12  ;;  %8610 = vmatpush3.bf16.msra.mxu1 %v8884_v14 }
 0xcb2   :  { %8618 = vmatpush3.bf16.msra.mxu0 %v8883_v40  ;;  %8611 = vmatprep.subr.bf16.mxu1 %v9074_v0 }
 0xcb3   :  { %8619 = vmatprep.subr.bf16.mxu0 %v9074_v0  ;;  %8621 = vmatprep.mubr.msk.bf16.mxu0 %vm9075_vm0, %v9074_v0 }
 0xcb4   :  { %8613 = vmatprep.mubr.msk.bf16.mxu1 %vm9075_vm0, %v9074_v0 }
 0xcb5   :  { %8612 = vmatpush3.bf16.msra.mxu1 %v8886_v17 }
 0xcb6   :  { %8620 = vmatpush3.bf16.msra.mxu0 %v8885_v20  ;;  %8625 = vmatprep.subr.bf16.mxu1 %v9074_v0 }
 0xcb7   :  { %8633 = vmatprep.subr.mxu0 %v9074_v0 }
 0xcb8   :  { %8614 = vmatmul.mubr.msk.bf16.vlgmr.msra.gmra.mxu1 %vm87_vm1, %v9598_v22 }
 0xcb9   :  { %8622 = vmatmul.mubr.msk.bf16.vlgmr.msra.gmra.mxu0 %vm87_vm1, %v9598_v22  ;;  %8629 = vmatprep.mubr.msk.bf16.mxu1 %vm9075_vm0, %v9074_v0 }
 0xcba   :  { %8635 = vmatprep.mubr.msk.f32.mxu0 %vm9075_vm0, %v9074_v0 }
 0xd40   :  { %v2726_v18 = vpop.f32.mrf.mxu1  ;;  %v2767_v30 = vpop.f32.mrf.mxu0 }
 0xd41   :  { %v2727_v36 = vadd.f32 %v8099_v35, %v2726_v18 }
 0xd42   :  { %v2728_v57 = vpop.f32.mrf.mxu1  ;;  %v2769_v13 = vpop.f32.mrf.mxu0 }
 0xd43   :  { %v2768_v29 = vadd.f32 %v2767_v30, %v2727_v36  ;;  %v8156_v36 = vld [vmem:[%s10307_s4 + $0xc] ss:$0 sm:$0xff]  ;;  %v8152_v57 = vld [vmem:[%s10307_s4 + $0xb] ss:$0 sm:$0xff] }
 0xd44   :  { %v2729_v53 = vpop.f32.mrf.mxu1  ;;  %v2770_v49 = vpop.f32.mrf.mxu0 }
 0xd45   :  { %v2730_v21 = vadd.f32 %v8099_v35, %v2729_v53 }
 0xd46   :  { %v2731_v51 = vpop.f32.mrf.mxu1  ;;  %v2772_v31 = vpop.f32.mrf.mxu0 }
 0xd47   :  { %v2771_v50 = vadd.f32 %v2770_v49, %v2730_v21 }
 0xd50   :  { %v2808_v52 = vpop.f32.mrf.mxu1  ;;  %v2849_v55 = vpop.f32.mrf.mxu0 }
 0xd51   :  { %v2809_v56 = vadd.f32 %v2808_v52, %v2768_v29 }
 0xd52   :  { %v2810_v6 = vpop.f32.mrf.mxu1  ;;  %v2851_v63 = vpop.f32.mrf.mxu0 }
 0xd53   :  { %v2850_v58 = vadd.f32 %v2849_v55, %v2809_v56  ;;  %v8887_v63 = vld [vmem:[%s10305_s2 + $0x68] sm:$0xff]  }
 0xd54   :  { %v2811_v39 = vpop.f32.mrf.mxu1  ;;  %v2852_v1 = vpop.f32.mrf.mxu0  ;;  %8626 = vmatpush3.bf16.msra.mxu1 %v8887_v63 }
 0xd55   :  { %v2812_v41 = vadd.f32 %v2811_v39, %v2771_v50  ;;  %8627 = vmatprep.subr.bf16.mxu1 %v9074_v0 }
 0xd56   :  { %v2813_v42 = vpop.f32.mrf.mxu1  ;;  %v2854_v43 = vpop.f32.mrf.mxu0 }
 0xd57   :  { %v2853_v2 = vadd.f32 %v2852_v1, %v2812_v41 }
 0xd60   :  { %v2890_v8 = vpop.f32.mrf.mxu1 }
 0xd61   :  { %v2891_v9 = vadd.f32 %v2890_v8, %v2850_v58  ;;  %v2931_v7 = vpop.f32.mrf.mxu0  ;;  %v8888_v58 = vld [vmem:[%s10305_s2 + $0x60] sm:$0xff]  }
 0xd62   :  { %v2892_v10 = vpop.f32.mrf.mxu1  ;;  %8628 = vmatpush3.bf16.msra.mxu1 %v8888_v58 }
 0xd63   :  { %v2932_v11 = vadd.f32 %v2931_v7, %v2891_v9  ;;  %v2933_v37 = vpop.f32.mrf.mxu0  ;;  %8643 = vmatprep.subr.mxu1 %v9074_v0 }
 0xd64   :  { %v2893_v38 = vpop.f32.mrf.mxu1 }
 0xd65   :  { %v2894_v3 = vadd.f32 %v2893_v38, %v2853_v2  ;;  %v2934_v4 = vpop.f32.mrf.mxu0  ;;  %8630 = vmatmul.mubr.msk.bf16.vlgmr.msra.gmra.mxu1 %vm87_vm1, %v9598_v22 }
 0xd66   :  { %v2895_v19 = vpop.f32.mrf.mxu1  ;;  %8645 = vmatprep.mubr.msk.f32.mxu1 %vm9075_vm0, %v9074_v0 }
 0xd67   :  { %v2935_v23 = vadd.f32 %v2934_v4, %v2894_v3  ;;  %v2936_v24 = vpop.f32.mrf.mxu0 }
 0xd70   :  { %v2972_v27 = vpop.f32.mrf.mxu1 }
 0xd71   :  { %v2973_v48 = vadd.f32 %v2972_v27, %v2932_v11  ;;  %v3013_v62 = vpop.f32.mrf.mxu0 }
 0xd72   :  { %v2974_v14 = vpop.f32.mrf.mxu1 }
 0xd73   :  { %v9615_v32 = vadd.f32 %v3013_v62, %v2973_v48  ;;  %v3015_v40 = vpop.f32.mrf.mxu0  ;;  %v8160_v48 = vld [vmem:[%s10307_s4 + $0xd] ss:$0 sm:$0xff] }
 0xd74   :  { %v2975_v12 = vpop.f32.mrf.mxu1 }
 0xd75   :  { %v2976_v17 = vadd.f32 %v2975_v12, %v2935_v23  ;;  %v3016_v20 = vpop.f32.mrf.mxu0 }
 0xd76   :  { %v2977_v35 = vpop.f32.mrf.mxu1 }
 0xd77   :  { %v9617_v18 = vadd.f32 %v3016_v20, %v2976_v17  ;;  %v3018_v30 = vpop.f32.mrf.mxu0 }
 0xd78   :  { %v3182_v13 = vpop.f32.mrf.mxu1 }
 0xd79   :  { %v3239_v29 = vpop.f32.mrf.mxu0  ;;  %v9627_v21 = vadd.f32 %v8152_v57, %v3182_v13 }
 0xd7a   :  { %v9625_v53 = vadd.f32 %v8156_v36, %v3239_v29  ;;  %v8615_v49 = vpop.f32.mrf.mxu1 }
 0xd7b   :  { %v8623_v51 = vpop.f32.mrf.mxu0 }
 0xd7c   :  { %8634 = vmatpush3.xpose.msk.msra.mxu0 %vm246_vm2, %v9625_v53  ;;  %v3185_v31 = vpop.f32.mrf.mxu1 }
 0xd7d   :  { %v3242_v50 = vpop.f32.mrf.mxu0  ;;  %8638 = vmatprep.subr.mxu0 %v9074_v0  ;;  %v9640_v6 = vadd.f32 %v8152_v57, %v3185_v31 }
 0xd7e   :  { %v9632_v52 = vadd.f32 %v8156_v36, %v3242_v50  ;;  %v8616_v55 = vpop.f32.mrf.mxu1 }
 0xd7f   :  { %v8624_v56 = vpop.f32.mrf.mxu0  ;;  %8636 = vmatmul.mubr.msk.f32.vlgmr.msra.gmra.mxu0 %vm246_vm2, %v9627_v21 }
 0xd80   :  { %3708 = vrot.lane.b32.xlu1 %v9632_v52, %s9076_s18  ;;  %8639 = vmatpush3.xpose.msk.msra.mxu0 %vm246_vm2, %v9632_v52 }
 0xd81   :  { %8640 = vmatprep.mubr.msk.f32.mxu0 %vm9075_vm0, %v9074_v0  ;;  %8648 = vmatprep.subr.mxu0 %v9074_v0 }
 0xd83   :  { %8641 = vmatmul.mubr.msk.f32.vlgmr.msra.gmra.mxu0 %vm246_vm2, %v9640_v6 }
 0xd84   :  { %3628 = vrot.lane.b32.xlu1 %v9627_v21, %s9076_s18  ;;  %8650 = vmatprep.mubr.msk.f32.mxu0 %vm9075_vm0, %v9074_v0 }
 0xdf2   :  { %v3709_v35 = vpop.permute.xlu1 %3708 }
 0xdf6   :  { %v3629_v30 = vpop.permute.xlu1 %3628 }
 0xe25   :  { %v3296_v62 = vpop.f32.mrf.mxu1 }
 0xe26   :  { %v9672_v14 = vadd.f32 %v8160_v48, %v3296_v62 }
 0xe27   :  { %v8631_v40 = vpop.f32.mrf.mxu1 }
 0xe28   :  { %8644 = vmatpush3.msra.mxu1 %v9672_v14 }
 0xe29   :  { %v3299_v12 = vpop.f32.mrf.mxu1  ;;  %8653 = vmatprep.subr.mxu1 %v9074_v0 }
 0xe2a   :  { %v9676_v17 = vadd.f32 %v8160_v48, %v3299_v12 }
 0xe2b   :  { %v8632_v20 = vpop.f32.mrf.mxu1 }
 0xe2c   :  { %8649 = vmatpush3.msra.mxu0 %v9676_v17 }
 0xe2d   :  { %8658 = vmatprep.subr.mxu0 %v9074_v0 }
 0xe3f   :  { %v3375_v39 = vpop.f32.mrf.mxu0 }
 0xe40   :  { %v3455_v1 = vmul.f32 0.35355338, %v3375_v39 }
 0xe41   :  { %v8637_v41 = vpop.f32.mrf.mxu0 }
 0xe42   :  { %v3457_v42 = vadd.f32 %v3455_v1, %v9209_v28 }
 0xe43   :  { %v3451_v43 = vpop.f32.mrf.mxu0 }
 0xe44   :  { %v3456_v2 = vmul.f32 0.35355338, %v3451_v43  ;;  %v3459_v8 = vsel %vm246_vm2, %v3457_v42, -inf }
 0xe45   :  { %3460 = vmax.xlane.f32.xlu0 %v3459_v8  ;;  %v8642_v9 = vpop.f32.mrf.mxu0 }
 0xe46   :  { %v3458_v7 = vadd.f32 %v3456_v2, %v9209_v28 }
 0xe48   :  { %v3462_v10 = vsel %vm246_vm2, %v3458_v7, -inf }
 0xe49   :  { %3463 = vmax.xlane.f32.xlu0 %v3462_v10 }
 0xece   :  { %v3461_v22 = vpop.xlane.xlu0 %3460 }
 0xecf   :  { %v3465_v11 = vsub.f32 %v3457_v42, %v3461_v22 }
 0xed1   :  { %v3467_v37 = vmul.f32 1.442695, %v3465_v11 }
 0xed2   :  { %v3464_v38 = vpop.xlane.xlu0 %3463 }
 0xed3   :  { %8931 = vpow2.f32 %v3467_v37  ;;  %v3466_v3 = vsub.f32 %v3458_v7, %v3464_v38 }
 0xed5   :  { %v3469_v4 = vmul.f32 1.442695, %v3466_v3 }
 0xed7   :  { %8933 = vpow2.f32 %v3469_v4 }
 0xee0   :  { %v8932_v19 = vpop.eup %8931 }
 0xee1   :  { %v3471_v23 = vsel %vm246_vm2, %v8932_v19, 0.0 }
 0xee2   :  { %3472 = vadd.xlane.f32.xlu0 %v3471_v23 }
 0xee4   :  { %v8934_v24 = vpop.eup %8933 }
 0xee5   :  { %v3474_v27 = vsel %vm246_vm2, %v8934_v24, 0.0 }
 0xee6   :  { %3475 = vadd.xlane.f32.xlu1 %v3474_v27 }
 0xef7   :  { %3706 = vrot.lane.b32.xlu1 %v9640_v6, %s9076_s18 }
 0xef8   :  { %3630 = vrot.lane.b32.xlu0 %v9625_v53, %s9076_s18 }
 0xf6b   :  { %v3473_v36 = vpop.xlane.xlu0 %3472 }
 0xf6c   :  { %8935 = vrcp.f32 %v3473_v36  ;;  %v8148_v36 = vld [vmem:[%s10305_s2 + $0x70] sm:$0xf] }
 0xf6f   :  { %v3476_v57 = vpop.xlane.xlu1 %3475  ;;  %v3631_v49 = vpop.permute.xlu0 %3630 }
 0xf70   :  { %8937 = vrcp.f32 %v3476_v57 }
 0xf73   :  { %v3707_v50 = vpop.permute.xlu1 %3706 }
 0xf79   :  { %v8936_v13 = vpop.eup %8935 }
 0xf7a   :  { %v3479_v29 = vmul.f32 %v8936_v13, %v8932_v19  ;;  %v4016_v13 = vsel %vm912_vm4, %v8148_v36, 0 }
 0xf7c   :  { %8646 = vmatmul.mubr.msk.f32.vlgmr.msra.gmra.mxu1 %vm246_vm2, %v3479_v29 }
 0xf7d   :  { %v8938_v51 = vpop.eup %8937  ;;  %8654 = vmatpush3.xpose.msk.msra.mxu1 %vm246_vm2, %v3631_v49  ;;  %8655 = vmatprep.mubr.msk.f32.mxu1 %vm9075_vm0, %v9074_v0 }
 0xf7e   :  { %v3480_v31 = vmul.f32 %v8938_v51, %v8934_v24  ;;  %8663 = vmatprep.subr.mxu1 %v9074_v0  ;;  %v8149_v51 = vld [vmem:[%s10305_s2 + $0x74] sm:$0xf] }
 0xf80   :  { %8651 = vmatmul.mubr.msk.f32.vlgmr.msra.gmra.mxu0 %vm246_vm2, %v3480_v31  ;;  %8656 = vmatmul.mubr.msk.f32.vlgmr.msra.gmra.mxu1 %vm246_vm2, %v3629_v30  ;;  %v3969_v31 = vsel %vm912_vm4, %v8149_v51, 0 }
 0xf81   :  { %8659 = vmatpush3.xpose.msk.msra.mxu0 %vm246_vm2, %v3709_v35  ;;  %8660 = vmatprep.mubr.msk.f32.mxu0 %vm9075_vm0, %v9074_v0 }
 0xf82   :  { %8668 = vmatprep.subr.mxu0 %v9074_v0  ;;  %8665 = vmatprep.mubr.msk.f32.mxu1 %vm9075_vm0, %v9074_v0 }
 0xf84   :  { %8661 = vmatmul.mubr.msk.f32.vlgmr.msra.gmra.mxu0 %vm246_vm2, %v3707_v50 }
 0xf85   :  { %8670 = vmatprep.mubr.msk.f32.mxu0 %vm9075_vm0, %v9074_v0 }
0x103c   :  { %v3550_v55 = vpop.f32.mrf.mxu1 }
0x103e   :  { %v8647_v56 = vpop.f32.mrf.mxu1 }
0x1040   :  { %v3623_v63 = vpop.f32.mrf.mxu0  ;;  %v3702_v58 = vpop.f32.mrf.mxu1 }
0x1041   :  { %v3627_v39 = vpack.c.bf16 %v3623_v63, %v3550_v55  ;;  %v3784_v1 = vmul.f32 0.35355338, %v3702_v58 }
0x1042   :  { %v8652_v41 = vpop.f32.mrf.mxu0  ;;  %v8657_v42 = vpop.f32.mrf.mxu1 }
0x1043   :  { %v3786_v43 = vadd.f32 %v3784_v1, %v9209_v28 }
0x1044   :  { %v3780_v2 = vpop.f32.mrf.mxu0 }
0x1045   :  { %v3785_v8 = vmul.f32 0.35355338, %v3780_v2  ;;  %v3788_v9 = vsel %vm246_vm2, %v3786_v43, -inf }
0x1046   :  { %3789 = vmax.xlane.f32.xlu0 %v3788_v9  ;;  %v8662_v7 = vpop.f32.mrf.mxu0 }
0x1047   :  { %v3787_v10 = vadd.f32 %v3785_v8, %v9209_v28 }
0x1049   :  { %v3791_v22 = vsel %vm246_vm2, %v3787_v10, -inf }
0x104a   :  { %3792 = vmax.xlane.f32.xlu1 %v3791_v22 }
0x105b   :  { %3888 = vrot.lane.b32.xlu1 %v9676_v17, %s9076_s18 }
0x105f   :  { %4139 = vrot.lane.b32.xlu1 %v9632_v52, %s9077_s25 }
0x1063   :  { %4137 = vrot.lane.b32.xlu1 %v9640_v6, %s9077_s25 }
0x1067   :  { %4059 = vrot.lane.b32.xlu1 %v9627_v21, %s9077_s25 }
0x106b   :  { %4445 = vrot.lane.b32.xlu1 %v9625_v53, %s9078_s26 }
0x10cf   :  { %v3790_v11 = vpop.xlane.xlu0 %3789 }
0x10d0   :  { %v3794_v37 = vsub.f32 %v3786_v43, %v3790_v11 }
0x10d2   :  { %v3796_v38 = vmul.f32 1.442695, %v3794_v37 }
0x10d3   :  { %v3793_v3 = vpop.xlane.xlu1 %3792 }
0x10d4   :  { %8939 = vpow2.f32 %v3796_v38  ;;  %v3795_v4 = vsub.f32 %v3787_v10, %v3793_v3 }
0x10d6   :  { %v3798_v19 = vmul.f32 1.442695, %v3795_v4 }
0x10d7   :  { %v3889_v23 = vpop.permute.xlu1 %3888 }
0x10d8   :  { %8941 = vpow2.f32 %v3798_v19  ;;  %8669 = vmatpush3.msra.mxu0 %v3889_v23 }
0x10d9   :  { %8679 = vmatprep.subr.bf16.mxu0 %v9074_v0 }
0x10db   :  { %v4140_v29 = vpop.permute.xlu1 %4139 }
0x10df   :  { %v4138_v49 = vpop.permute.xlu1 %4137 }
0x10e1   :  { %v8940_v24 = vpop.eup %8939 }
0x10e2   :  { %v3800_v27 = vsel %vm246_vm2, %v8940_v24, 0.0 }
0x10e3   :  { %3801 = vadd.xlane.f32.xlu0 %v3800_v27  ;;  %v4060_v43 = vpop.permute.xlu1 %4059 }
0x10e5   :  { %v8942_v48 = vpop.eup %8941 }
0x10e6   :  { %v3803_v62 = vsel %vm246_vm2, %v8942_v48, 0.0 }
0x10e7   :  { %3804 = vadd.xlane.f32.xlu0 %v3803_v62 }
0x10fd   :  { %3811 = vrot.lane.b32.xlu0 %v9672_v14, %s9076_s18 }
0x1101   :  { %4061 = vrot.lane.b32.xlu0 %v9625_v53, %s9077_s25 }
0x116c   :  { %v3802_v40 = vpop.xlane.xlu0 %3801 }
0x116d   :  { %8943 = vrcp.f32 %v3802_v40 }
0x1170   :  { %v3805_v12 = vpop.xlane.xlu0 %3804 }
0x1171   :  { %8945 = vrcp.f32 %v3805_v12 }
0x1174   :  { %v3812_v20 = vpop.permute.xlu0 %3811 }
0x1175   :  { %8664 = vmatpush3.msra.mxu1 %v3812_v20  ;;  %v4446_v20 = vpop.permute.xlu1 %4445 }
0x1176   :  { %8673 = vmatprep.subr.bf16.mxu1 %v9074_v0 }
0x117a   :  { %v8944_v35 = vpop.eup %8943 }
0x117b   :  { %v3808_v30 = vmul.f32 %v8944_v35, %v8940_v24 }
0x117d   :  { %8666 = vmatmul.mubr.msk.f32.vlgmr.msra.gmra.mxu1 %vm246_vm2, %v3808_v30 }
0x117e   :  { %v8946_v57 = vpop.eup %8945  ;;  %8675 = vmatprep.mubr.msk.bf16.mxu1 %vm9075_vm0, %v9074_v0  ;;  %8674 = vmatpush3.bf16.msra.mxu1 %v3969_v31 }
0x117f   :  { %v3809_v53 = vmul.f32 %v8946_v57, %v8942_v48  ;;  %8685 = vmatprep.subr.mxu1 %v9074_v0 }
0x1181   :  { %8671 = vmatmul.mubr.msk.f32.vlgmr.msra.gmra.mxu0 %vm246_vm2, %v3809_v53 }
0x1182   :  { %8680 = vmatpush3.bf16.msra.mxu0 %v4016_v13  ;;  %8681 = vmatprep.mubr.msk.bf16.mxu0 %vm9075_vm0, %v9074_v0 }
0x1183   :  { %8690 = vmatprep.subr.mxu0 %v9074_v0 }
0x1185   :  { %8682 = vmatmul.mubr.msk.bf16.vlgmr.msra.gmra.mxu0 %vm246_vm2, %v3627_v39  ;;  %v4062_v39 = vpop.permute.xlu0 %4061 }
0x1186   :  { %8691 = vmatpush3.xpose.msk.msra.mxu0 %vm246_vm2, %v4140_v29  ;;  %8692 = vmatprep.mubr.msk.f32.mxu0 %vm9075_vm0, %v9074_v0 }
0x1187   :  { %8700 = vmatprep.subr.mxu0 %v9074_v0 }
0x118d   :  { %8693 = vmatmul.mubr.msk.f32.vlgmr.msra.gmra.mxu0 %vm246_vm2, %v4138_v49 }
0x118e   :  { %8702 = vmatprep.mubr.msk.f32.mxu0 %vm9075_vm0, %v9074_v0 }
0x123d   :  { %v3883_v50 = vpop.f32.mrf.mxu1 }
0x123f   :  { %v8667_v55 = vpop.f32.mrf.mxu1 }
0x1241   :  { %v3960_v56 = vpop.f32.mrf.mxu0 }
0x1242   :  { %v3964_v63 = vpack.c.bf16 %v3960_v56, %v3883_v50  ;;  %v3020_v50 = vadd.f32 %v9615_v32, %v9399_v59 }
0x1243   :  { %v8672_v58 = vpop.f32.mrf.mxu0 }
0x1244   :  { %8676 = vmatmul.mubr.msk.bf16.vlgmr.msra.gmra.mxu1 %vm246_vm2, %v3964_v63  ;;  %v3024_v55 = vsel %vm87_vm1, %v3020_v50, 0.0 }
0x1245   :  { %8686 = vmatpush3.xpose.msk.msra.mxu1 %vm246_vm2, %v4062_v39  ;;  %v9748_v1 = vpop.f32.mrf.mxu0  ;;  %8687 = vmatprep.mubr.msk.f32.mxu1 %vm9075_vm0, %v9074_v0 }
0x1246   :  { %8695 = vmatprep.subr.mxu1 %v9074_v0 }
0x1247   :  { %v8683_v41 = vpop.f32.mrf.mxu0 }
0x1249   :  { %v9753_v42 = vpop.f32.mrf.mxu0 }
0x124b   :  { %v8684_v2 = vpop.f32.mrf.mxu0 }
0x124c   :  { %8688 = vmatmul.mubr.msk.f32.vlgmr.msra.gmra.mxu1 %vm246_vm2, %v4060_v43 }
0x124d   :  { %v4211_v8 = vpop.f32.mrf.mxu0  ;;  %8697 = vmatprep.mubr.msk.f32.mxu1 %vm9075_vm0, %v9074_v0 }
0x124e   :  { %v4216_v9 = vmul.f32 0.35355338, %v4211_v8 }
0x124f   :  { %v8694_v7 = vpop.f32.mrf.mxu0 }
0x1250   :  { %v4218_v10 = vadd.f32 %v4216_v9, %v9209_v28 }
0x1252   :  { %v4222_v22 = vsel %vm246_vm2, %v4218_v10, -inf }
0x1253   :  { %4223 = vmax.xlane.f32.xlu0 %v4222_v22 }
0x1269   :  { %4317 = vrot.lane.b32.xlu0 %v9676_v17, %s9077_s25 }
0x126d   :  { %4443 = vrot.lane.b32.xlu0 %v9627_v21, %s9078_s26 }
0x1271   :  { %4521 = vrot.lane.b32.xlu0 %v9640_v6, %s9078_s26 }
0x12dc   :  { %v4224_v11 = vpop.xlane.xlu0 %4223 }
0x12dd   :  { %v4226_v37 = vsub.f32 %v4218_v10, %v4224_v11 }
0x12df   :  { %v4229_v38 = vmul.f32 1.442695, %v4226_v37 }
0x12e0   :  { %v4318_v3 = vpop.permute.xlu0 %4317 }
0x12e1   :  { %8947 = vpow2.f32 %v4229_v38  ;;  %8701 = vmatpush3.msra.mxu0 %v4318_v3 }
0x12e2   :  { %8711 = vmatprep.subr.mxu0 %v9074_v0 }
0x12ee   :  { %v8948_v4 = vpop.eup %8947 }
0x12ef   :  { %v4234_v19 = vsel %vm246_vm2, %v8948_v4, 0.0 }
0x12f0   :  { %4235 = vadd.xlane.f32.xlu1 %v4234_v19 }
0x1301   :  { %4523 = vrot.lane.b32.xlu1 %v9632_v52, %s9078_s26  ;;  %v4444_v52 = vpop.permute.xlu0 %4443 }
0x1304   :  { %v9770_v23 = vpop.f32.mrf.mxu1 }
0x1305   :  { %v4522_v53 = vpop.permute.xlu0 %4521 }
0x1306   :  { %v8677_v21 = vpop.f32.mrf.mxu1 }
0x1308   :  { %v9772_v24 = vpop.f32.mrf.mxu1 }
0x130a   :  { %v8678_v6 = vpop.f32.mrf.mxu1 }
0x130b   :  { %v8150_v6 = vld [vmem:[%s10305_s2 + $0x78] sm:$0xf] }
0x130c   :  { %v4133_v27 = vpop.f32.mrf.mxu1 }
0x130d   :  { %v4215_v62 = vmul.f32 0.35355338, %v4133_v27  ;;  %v4398_v27 = vsel %vm912_vm4, %v8150_v6, 0  ;;  %v4056_v6 = vadd.f32 %v9753_v42, %v9772_v24 }
0x130e   :  { %v8689_v48 = vpop.f32.mrf.mxu1 }
0x130f   :  { %v4217_v40 = vadd.f32 %v4215_v62, %v9209_v28 }
0x1311   :  { %v4219_v12 = vsel %vm246_vm2, %v4217_v40, -inf }
0x1325   :  { %4220 = vmax.xlane.f32.xlu1 %v4219_v12 }
0x1379   :  { %v4236_v35 = vpop.xlane.xlu1 %4235 }
0x137a   :  { %8949 = vrcp.f32 %v4236_v35 }
0x137d   :  { %v4524_v57 = vpop.permute.xlu1 %4523 }
0x1387   :  { %v8950_v30 = vpop.eup %8949 }
0x1388   :  { %v4240_v36 = vmul.f32 %v8950_v30, %v8948_v4 }
0x138a   :  { %8703 = vmatmul.mubr.msk.f32.vlgmr.msra.gmra.mxu0 %vm246_vm2, %v4240_v36 }
0x138b   :  { %8712 = vmatpush3.xpose.msk.msra.mxu0 %vm246_vm2, %v4446_v20  ;;  %8713 = vmatprep.mubr.msk.f32.mxu0 %vm9075_vm0, %v9074_v0 }
0x138c   :  { %8716 = vmatprep.subr.mxu0 %v9074_v0 }
0x138e   :  { %8714 = vmatmul.mubr.msk.f32.vlgmr.msra.gmra.mxu0 %vm246_vm2, %v4444_v52 }
0x138f   :  { %8717 = vmatpush3.xpose.msk.msra.mxu0 %vm246_vm2, %v4524_v57  ;;  %8718 = vmatprep.mubr.msk.f32.mxu0 %vm9075_vm0, %v9074_v0 }
0x1390   :  { %8726 = vmatprep.subr.mxu0 %v9074_v0 }
0x1392   :  { %8719 = vmatmul.mubr.msk.f32.vlgmr.msra.gmra.mxu0 %vm246_vm2, %v4522_v53 }
0x1393   :  { %8728 = vmatprep.mubr.msk.f32.mxu0 %vm9075_vm0, %v9074_v0 }
0x13ae   :  { %v4221_v13 = vpop.xlane.xlu1 %4220 }
0x13af   :  { %v4225_v29 = vsub.f32 %v4217_v40, %v4221_v13 }
0x13b1   :  { %v4227_v49 = vmul.f32 1.442695, %v4225_v29 }
0x13b3   :  { %8951 = vpow2.f32 %v4227_v49  ;;  %v3021_v49 = vadd.f32 %v9617_v18, %v9401_v15 }
0x13c0   :  { %v8952_v51 = vpop.eup %8951 }
0x13c1   :  { %v4231_v31 = vsel %vm246_vm2, %v8952_v51, 0.0 }
0x13c2   :  { %4232 = vadd.xlane.f32.xlu0 %v4231_v31 }
0x13d8   :  { %4241 = vrot.lane.b32.xlu0 %v9672_v14, %s9077_s25 }
0x13dc   :  { %4701 = vrot.lane.b32.xlu0 %v9676_v17, %s9078_s26 }
0x13fb   :  { %3025 = vadd.xlane.f32.xlu0 %v3024_v55 }
0x144a   :  { %v4389_v56 = vpop.f32.mrf.mxu0 }
0x144b   :  { %v4233_v63 = vpop.xlane.xlu0 %4232 }
0x144c   :  { %8953 = vrcp.f32 %v4233_v63  ;;  %v8704_v58 = vpop.f32.mrf.mxu0 }
0x144e   :  { %v4517_v39 = vpop.f32.mrf.mxu0 }
0x144f   :  { %v4599_v41 = vmul.f32 0.35355338, %v4517_v39  ;;  %v4242_v43 = vpop.permute.xlu0 %4241 }
0x1450   :  { %8696 = vmatpush3.msra.mxu1 %v4242_v43  ;;  %v8715_v2 = vpop.f32.mrf.mxu0 }
0x1451   :  { %v4601_v8 = vadd.f32 %v4599_v41, %v9209_v28  ;;  %8705 = vmatprep.subr.bf16.mxu1 %v9074_v0 }
0x1452   :  { %v4595_v17 = vpop.f32.mrf.mxu0 }
0x1453   :  { %v4600_v9 = vmul.f32 0.35355338, %v4595_v17  ;;  %v4702_v7 = vpop.permute.xlu0 %4701  ;;  %v4603_v59 = vsel %vm246_vm2, %v4601_v8, -inf }
0x1454   :  { %8727 = vmatpush3.msra.mxu0 %v4702_v7  ;;  %4604 = vmax.xlane.f32.xlu1 %v4603_v59  ;;  %v8720_v32 = vpop.f32.mrf.mxu0  ;;  %v8133_v59 = vld [vmem:[%s10307_s4 + $0x8] ss:$0 sm:$0xff] }
0x1455   :  { %v4602_v10 = vadd.f32 %v4600_v9, %v9209_v28  ;;  %8737 = vmatprep.subr.bf16.mxu0 %v9074_v0 }
0x1457   :  { %v4606_v22 = vsel %vm246_vm2, %v4602_v10, -inf }
0x1458   :  { %4607 = vmax.xlane.f32.xlu1 %v4606_v22 }
0x1459   :  { %v8954_v11 = vpop.eup %8953 }
0x145a   :  { %v4239_v37 = vmul.f32 %v8954_v11, %v8952_v51  ;;  %v3027_v51 = vsel %vm87_vm1, %v3021_v49, 0.0 }
0x145c   :  { %8698 = vmatmul.mubr.msk.f32.vlgmr.msra.gmra.mxu1 %vm246_vm2, %v4239_v37  ;;  %v8151_v37 = vld [vmem:[%s10305_s2 + $0x7c] sm:$0xf] }
0x145d   :  { %8707 = vmatprep.mubr.msk.bf16.mxu1 %vm9075_vm0, %v9074_v0  ;;  %8706 = vmatpush3.bf16.msra.mxu1 %v4398_v27 }
0x145e   :  { %8721 = vmatprep.subr.mxu1 %v9074_v0 }
0x1484   :  { %v3026_v38 = vpop.xlane.xlu0 %3025 }
0x1485   :  { %v3030_v3 = vmul.f32 0.03125, %v3026_v38  ;;  %v4782_v38 = vsel %vm912_vm4, %v8151_v37, 0 }
0x1487   :  { %v3032_v4 = vsub.f32 %v3020_v50, %v3030_v3  ;;  %v4053_v3 = vadd.f32 %v9748_v1, %v9770_v23 }
0x1489   :  { %v3034_v19 = vmul.f32 %v3032_v4, %v3032_v4 }
0x148b   :  { %v3036_v21 = vsel %vm87_vm1, %v3034_v19, 0.0 }
0x148c   :  { %3037 = vadd.xlane.f32.xlu0 %v3036_v21 }
0x14dd   :  { %v4605_v48 = vpop.xlane.xlu1 %4604 }
0x14de   :  { %v4609_v62 = vsub.f32 %v4601_v8, %v4605_v48  ;;  %v8132_v8 = vld [vmem:[%s10307_s4 + $0x7] ss:$0 sm:$0xff] }
0x14e0   :  { %v4611_v40 = vmul.f32 1.442695, %v4609_v62 }
0x14e1   :  { %v4608_v12 = vpop.xlane.xlu1 %4607 }
0x14e2   :  { %8955 = vpow2.f32 %v4611_v40  ;;  %v4610_v20 = vsub.f32 %v4602_v10, %v4608_v12 }
0x14e4   :  { %v4613_v35 = vmul.f32 1.442695, %v4610_v20 }
0x14e6   :  { %8957 = vpow2.f32 %v4613_v35 }
0x14ef   :  { %v8956_v30 = vpop.eup %8955 }
0x14f0   :  { %v4615_v36 = vsel %vm246_vm2, %v8956_v30, 0.0 }
0x14f1   :  { %4616 = vadd.xlane.f32.xlu1 %v4615_v36 }
0x14f3   :  { %v8958_v52 = vpop.eup %8957 }
0x14f4   :  { %v4618_v57 = vsel %vm246_vm2, %v8958_v52, 0.0 }
0x14f5   :  { %4619 = vadd.xlane.f32.xlu1 %v4618_v57 }
0x1506   :  { %4625 = vrot.lane.b32.xlu1 %v9672_v14, %s9078_s26 }
0x1515   :  { %v3038_v18 = vpop.xlane.xlu0 %3037 }
0x1516   :  { %v3042_v58 = vmul.f32 0.03125, %v3038_v18 }
0x1518   :  { %v3044_v39 = vadd.f32 1e-05, %v3042_v58 }
0x151c   :  { %v4313_v53 = vpop.f32.mrf.mxu1 }
0x151d   :  { %v4393_v13 = vpack.c.bf16 %v4389_v56, %v4313_v53 }
0x151e   :  { %v8699_v29 = vpop.f32.mrf.mxu1 }
0x151f   :  { %8708 = vmatmul.mubr.msk.bf16.vlgmr.msra.gmra.mxu1 %vm246_vm2, %v4393_v13 }
0x1520   :  { %8723 = vmatprep.mubr.msk.f32.mxu1 %vm9075_vm0, %v9074_v0 }
0x152a   :  { %3028 = vadd.xlane.f32.xlu1 %v3027_v51  ;;  %v8192_v51 = vld [vmem:[%s10307_s4 + $0xe] ss:$0 sm:$0xff] }
0x157a   :  { %v4617_v31 = vpop.xlane.xlu1 %4616 }
0x157b   :  { %8959 = vrcp.f32 %v4617_v31 }
0x157e   :  { %v4620_v50 = vpop.xlane.xlu1 %4619 }
0x157f   :  { %8961 = vrcp.f32 %v4620_v50 }
0x1580   :  { %8963 = vrsqrt.f32 %v3044_v39 }
0x1582   :  { %v4626_v55 = vpop.permute.xlu1 %4625 }
0x1583   :  { %8722 = vmatpush3.msra.mxu1 %v4626_v55 }
0x1584   :  { %8731 = vmatprep.subr.bf16.mxu1 %v9074_v0 }
0x1588   :  { %v8960_v14 = vpop.eup %8959 }
0x1589   :  { %v4623_v56 = vmul.f32 %v8960_v14, %v8956_v30 }
0x158b   :  { %8724 = vmatmul.mubr.msk.f32.vlgmr.msra.gmra.mxu1 %vm246_vm2, %v4623_v56 }
0x158c   :  { %v8962_v63 = vpop.eup %8961  ;;  %8733 = vmatprep.mubr.msk.bf16.mxu1 %vm9075_vm0, %v9074_v0  ;;  %8732 = vmatpush3.bf16.msra.mxu1 %v4782_v38 }
0x158d   :  { %v4624_v15 = vmul.f32 %v8962_v63, %v8958_v52  ;;  %v8964_v41 = vpop.eup %8963  ;;  %8745 = vmatprep.subr.bf16.mxu1 %v9074_v0 }
0x158e   :  { %v3048_v43 = vmul.f32 %v8964_v41, %v3032_v4 }
0x158f   :  { %8729 = vmatmul.mubr.msk.f32.vlgmr.msra.gmra.mxu0 %vm246_vm2, %v4624_v15 }
0x1590   :  { %8741 = vmatprep.mubr.msk.bf16.mxu0 %vm9075_vm0, %v9074_v0  ;;  %v3054_v7 = vmul.f32 %v8132_v8, %v3048_v43 }
0x1592   :  { %v3060_v22 = vadd.f32 %v8133_v59, %v3054_v7 }
0x1594   :  { %v3064_v11 = vsel %vm87_vm1, %v3060_v22, 0.0 }
0x15b3   :  { %v3029_v2 = vpop.xlane.xlu1 %3028 }
0x15b4   :  { %v3031_v17 = vmul.f32 0.03125, %v3029_v2 }
0x15b6   :  { %v3033_v9 = vsub.f32 %v3021_v49, %v3031_v17 }
0x15b8   :  { %v3035_v32 = vmul.f32 %v3033_v9, %v3033_v9 }
0x15ba   :  { %v3039_v10 = vsel %vm87_vm1, %v3035_v32, 0.0 }
0x15bb   :  { %3040 = vadd.xlane.f32.xlu0 %v3039_v10  ;;  %v8890_v10 = vld [vmem:[%s10305_s2 + $0x90] sm:$0xff]  }
0x15bf   :  { %3065 = vadd.xlane.f32.xlu0 %v3064_v11 }
0x15df   :  { %v4434_v4 = vpop.f32.mrf.mxu1 }
0x15e0   :  { %v4441_v19 = vadd.f32 %v4434_v4, %v4053_v3 }
0x15e1   :  { %v8709_v21 = vpop.f32.mrf.mxu1 }
0x15e3   :  { %v4437_v27 = vpop.f32.mrf.mxu1 }
0x15e4   :  { %v4442_v48 = vadd.f32 %v4437_v27, %v4056_v6 }
0x15e5   :  { %v8710_v62 = vpop.f32.mrf.mxu1 }
0x1644   :  { %v3041_v40 = vpop.xlane.xlu0 %3040 }
0x1645   :  { %v3043_v12 = vmul.f32 0.03125, %v3041_v40 }
0x1647   :  { %v3045_v20 = vadd.f32 1e-05, %v3043_v12 }
0x1648   :  { %v3066_v13 = vpop.xlane.xlu0 %3065 }
0x1649   :  { %8965 = vrsqrt.f32 %v3045_v20  ;;  %v3070_v29 = vmul.f32 0.03125, %v3066_v13 }
0x164b   :  { %v4697_v35 = vpop.f32.mrf.mxu1  ;;  %v3072_v14 = vsub.f32 %v3060_v22, %v3070_v29  ;;  %v8891_v29 = vld [vmem:[%s10305_s2 + $0x88] sm:$0xff]  }
0x164c   :  { %8738 = vmatpush3.bf16.msra.mxu0 %v8891_v29 }
0x164d   :  { %v8725_v30 = vpop.f32.mrf.mxu1  ;;  %8739 = vmatprep.subr.bf16.mxu0 %v9074_v0 }
0x164f   :  { %v4773_v36 = vpop.f32.mrf.mxu0 }
0x1650   :  { %v4777_v52 = vpack.c.bf16 %v4773_v36, %v4697_v35  ;;  %v8134_v36 = vld [vmem:[%s10307_s4 + $0x9] ss:$0 sm:$0xff] }
0x1651   :  { %v8730_v57 = vpop.f32.mrf.mxu0 }
0x1652   :  { %8734 = vmatmul.mubr.msk.bf16.vlgmr.msra.gmra.mxu1 %vm246_vm2, %v4777_v52 }
0x1653   :  { %8749 = vmatprep.mubr.msk.bf16.mxu1 %vm9075_vm0, %v9074_v0 }
0x1656   :  { %v8966_v1 = vpop.eup %8965 }
0x1657   :  { %v3049_v23 = vmul.f32 %v8966_v1, %v3033_v9 }
0x1659   :  { %v3055_v42 = vmul.f32 %v8132_v8, %v3049_v23  ;;  %v3074_v8 = vmul.f32 %v3072_v14, %v3072_v14  ;;  %v8135_v23 = vld [vmem:[%s10307_s4 + $0xa] ss:$0 sm:$0xff] }
0x165b   :  { %v3061_v24 = vadd.f32 %v8133_v59, %v3055_v42  ;;  %v3076_v7 = vsel %vm87_vm1, %v3074_v8, 0.0 }
0x165d   :  { %v3067_v53 = vsel %vm87_vm1, %v3061_v24, 0.0 }
0x165e   :  { %3068 = vadd.xlane.f32.xlu0 %v3067_v53 }
0x16e7   :  { %v3069_v49 = vpop.xlane.xlu0 %3068 }
0x16e8   :  { %v3071_v56 = vmul.f32 0.03125, %v3069_v49  ;;  %v8892_v49 = vld [vmem:[%s10305_s2 + $0x80] sm:$0xff]  }
0x16e9   :  { %8740 = vmatpush3.bf16.msra.mxu0 %v8892_v49 }
0x16ea   :  { %v3073_v41 = vsub.f32 %v3061_v24, %v3071_v56  ;;  %8753 = vmatprep.subr.bf16.mxu0 %v9074_v0 }
0x16ec   :  { %v3075_v59 = vmul.f32 %v3073_v41, %v3073_v41 }
0x16ee   :  { %v3079_v32 = vsel %vm87_vm1, %v3075_v59, 0.0  ;;  %v8894_v59 = vld [vmem:[%s10305_s2 + $0xa0] sm:$0xff]  }
0x1712   :  { %v4818_v31 = vpop.f32.mrf.mxu1 }
0x1713   :  { %v4825_v50 = vadd.f32 %v4818_v31, %v4441_v19 }
0x1714   :  { %v8735_v55 = vpop.f32.mrf.mxu1 }
0x1715   :  { %v4831_v63 = vadd.f32 %v8192_v51, %v4825_v50 }
0x1716   :  { %v4821_v15 = vpop.f32.mrf.mxu1 }
0x1717   :  { %v4826_v18 = vadd.f32 %v4821_v15, %v4442_v48  ;;  %v4833_v58 = vadd.f32 %v4831_v63, %v9582_v33  ;;  %v8889_v33 = vld [vmem:[%s10305_s2 + $0x98] sm:$0xff]  }
0x1718   :  { %v8736_v39 = vpop.f32.mrf.mxu1  ;;  %8746 = vmatpush3.bf16.msra.mxu1 %v8889_v33 }
0x1719   :  { %v4832_v43 = vadd.f32 %v8192_v51, %v4826_v18  ;;  %v4837_v2 = vsel %vm87_vm1, %v4833_v58, 0.0  ;;  %8747 = vmatprep.subr.bf16.mxu1 %v9074_v0  ;;  %v8193_v18 = vld [vmem:[%s10307_s4 + $0xf] ss:$0 sm:$0xff] }
0x171a   :  { %4838 = vadd.xlane.f32.xlu0 %v4837_v2 }
0x171b   :  { %v4834_v17 = vadd.f32 %v4832_v43, %v9587_v34  ;;  %v8194_v43 = vld [vmem:[%s10307_s4 + $0x10] ss:$0 sm:$0xff] }
0x171c   :  { %8748 = vmatpush3.bf16.msra.mxu1 %v8890_v10 }
0x171d   :  { %v4840_v9 = vsel %vm87_vm1, %v4834_v17, 0.0  ;;  %8761 = vmatprep.subr.mxu1 %v9074_v0 }
0x171e   :  { %4841 = vadd.xlane.f32.xlu1 %v4840_v9  ;;  %3077 = vadd.xlane.f32.xlu0 %v3076_v7  ;;  %v8893_v9 = vld [vmem:[%s10305_s2 + $0xa8] sm:$0xff]  }
0x1722   :  { %3080 = vadd.xlane.f32.xlu1 %v3079_v32  ;;  %v8215_v32 = vld [vmem:[%s10307_s4 + $0x12] ss:$0 sm:$0xff] }
0x17a3   :  { %v4839_v34 = vpop.xlane.xlu0 %4838 }
0x17a4   :  { %v4843_v22 = vmul.f32 0.03125, %v4839_v34 }
0x17a6   :  { %v4845_v11 = vsub.f32 %v4833_v58, %v4843_v22 }
0x17a7   :  { %v4842_v37 = vpop.xlane.xlu1 %4841  ;;  %v3078_v38 = vpop.xlane.xlu0 %3077 }
0x17a8   :  { %v4844_v3 = vmul.f32 0.03125, %v4842_v37  ;;  %v3082_v4 = vmul.f32 0.03125, %v3078_v38  ;;  %v4847_v19 = vmul.f32 %v4845_v11, %v4845_v11  ;;  %v8211_v38 = vld [vmem:[%s10307_s4 + $0x11] ss:$0 sm:$0xff] }
0x17aa   :  { %v4846_v21 = vsub.f32 %v4834_v17, %v4844_v3  ;;  %v3084_v6 = vadd.f32 1e-05, %v3082_v4  ;;  %v4849_v27 = vsel %vm87_vm1, %v4847_v19, 0.0 }
0x17ab   :  { %v3081_v48 = vpop.xlane.xlu1 %3080  ;;  %4850 = vadd.xlane.f32.xlu0 %v4849_v27 }
0x17ac   :  { %8967 = vrsqrt.f32 %v3084_v6  ;;  %v3083_v62 = vmul.f32 0.03125, %v3081_v48  ;;  %v4848_v40 = vmul.f32 %v4846_v21, %v4846_v21  ;;  %v8219_v48 = vld [vmem:[%s10307_s4 + $0x13] ss:$0 sm:$0xff] }
0x17ae   :  { %v3085_v12 = vadd.f32 1e-05, %v3083_v62  ;;  %v4852_v20 = vsel %vm87_vm1, %v4848_v40, 0.0 }
0x17af   :  { %4853 = vadd.xlane.f32.xlu1 %v4852_v20 }
0x17b0   :  { %8969 = vrsqrt.f32 %v3085_v12 }
0x17b9   :  { %v8968_v35 = vpop.eup %8967 }
0x17ba   :  { %v3088_v30 = vmul.f32 %v8968_v35, %v3072_v14 }
0x17bc   :  { %v3094_v1 = vmul.f32 %v8134_v36, %v3088_v30 }
0x17bd   :  { %v8970_v52 = vpop.eup %8969 }
0x17be   :  { %v3089_v57 = vmul.f32 %v8970_v52, %v3073_v41  ;;  %v3100_v24 = vadd.f32 %v8135_v23, %v3094_v1 }
0x17c0   :  { %v3095_v42 = vmul.f32 %v8134_v36, %v3089_v57 }
0x17c2   :  { %v3101_v53 = vadd.f32 %v8135_v23, %v3095_v42 }
0x17c4   :  { %v4960_v13 = vpack.c.bf16 %v3101_v53, %v3100_v24 }
0x17c6   :  { %8750 = vmatmul.mubr.msk.bf16.vlgmr.msra.gmra.mxu1 %vm87_vm1, %v4960_v13 }
0x17c7   :  { %8763 = vmatprep.mubr.msk.f32.mxu1 %vm9075_vm0, %v9074_v0 }
0x1834   :  { %v4851_v51 = vpop.xlane.xlu0 %4850 }
0x1835   :  { %v4855_v31 = vmul.f32 0.03125, %v4851_v51 }
0x1837   :  { %v4857_v50 = vadd.f32 1e-05, %v4855_v31 }
0x1838   :  { %v4854_v55 = vpop.xlane.xlu1 %4853 }
0x1839   :  { %8971 = vrsqrt.f32 %v4857_v50  ;;  %v4856_v14 = vmul.f32 0.03125, %v4854_v55 }
0x183b   :  { %v4858_v56 = vadd.f32 1e-05, %v4856_v14 }
0x183d   :  { %8973 = vrsqrt.f32 %v4858_v56 }
0x1846   :  { %v8972_v63 = vpop.eup %8971 }
0x1847   :  { %v4861_v15 = vmul.f32 %v8972_v63, %v4845_v11 }
0x1849   :  { %v4867_v41 = vmul.f32 %v8193_v18, %v4861_v15 }
0x184a   :  { %v8974_v58 = vpop.eup %8973 }
0x184b   :  { %v4862_v39 = vmul.f32 %v8974_v58, %v4846_v21  ;;  %v9892_v8 = vadd.f32 %v8194_v43, %v4867_v41 }
0x184d   :  { %v4868_v2 = vmul.f32 %v8193_v18, %v4862_v39 }
0x184f   :  { %v9894_v17 = vadd.f32 %v8194_v43, %v4868_v2 }
0x1851   :  { %v4899_v7 = vpack.c.bf16 %v9894_v17, %v9892_v8 }
0x1853   :  { %8742 = vmatmul.mubr.msk.bf16.vlgmr.msra.gmra.mxu0 %vm87_vm1, %v4899_v7 }
0x1854   :  { %8754 = vmatpush3.bf16.msra.mxu0 %v8893_v9  ;;  %8757 = vmatprep.mubr.msk.bf16.mxu0 %vm9075_vm0, %v9074_v0 }
0x1855   :  { %8755 = vmatprep.subr.bf16.mxu0 %v9074_v0 }
0x1858   :  { %8756 = vmatpush3.bf16.msra.mxu0 %v8894_v59 }
0x1859   :  { %8771 = vmatprep.subr.mxu0 %v9074_v0 }
0x185b   :  { %8758 = vmatmul.mubr.msk.bf16.vlgmr.msra.gmra.mxu0 %vm87_vm1, %v4960_v13 }
0x185c   :  { %8773 = vmatprep.mubr.msk.f32.mxu0 %vm9075_vm0, %v9074_v0 }
0x1886   :  { %v5014_v33 = vpop.f32.mrf.mxu1 }
0x1887   :  { %v9915_v10 = vadd.f32 %v8215_v32, %v5014_v33 }
0x1888   :  { %v8751_v34 = vpop.f32.mrf.mxu1 }
0x1889   :  { %8762 = vmatpush3.xpose.msk.msra.mxu1 %vm246_vm2, %v9915_v10 }
0x188a   :  { %v5017_v22 = vpop.f32.mrf.mxu1  ;;  %8766 = vmatprep.subr.mxu1 %v9074_v0 }
0x188b   :  { %v9920_v11 = vadd.f32 %v8215_v32, %v5017_v22 }
0x188c   :  { %v8752_v37 = vpop.f32.mrf.mxu1 }
0x1913   :  { %v4953_v3 = vpop.f32.mrf.mxu0 }
0x1914   :  { %v9925_v4 = vadd.f32 %v8211_v38, %v4953_v3 }
0x1915   :  { %v8743_v19 = vpop.f32.mrf.mxu0 }
0x1916   :  { %8764 = vmatmul.mubr.msk.f32.vlgmr.msra.gmra.mxu1 %vm246_vm2, %v9925_v4 }
0x1917   :  { %8767 = vmatpush3.xpose.msk.msra.mxu1 %vm246_vm2, %v9920_v11  ;;  %v4956_v21 = vpop.f32.mrf.mxu0  ;;  %8768 = vmatprep.mubr.msk.f32.mxu1 %vm9075_vm0, %v9074_v0 }
0x1918   :  { %v9933_v6 = vadd.f32 %v8211_v38, %v4956_v21  ;;  %8776 = vmatprep.subr.mxu1 %v9074_v0 }
0x1919   :  { %v8744_v27 = vpop.f32.mrf.mxu0 }
0x191a   :  { %8769 = vmatmul.mubr.msk.f32.vlgmr.msra.gmra.mxu1 %vm246_vm2, %v9933_v6 }
0x191b   :  { %v5071_v62 = vpop.f32.mrf.mxu0  ;;  %8778 = vmatprep.mubr.msk.f32.mxu1 %vm9075_vm0, %v9074_v0 }
0x191c   :  { %v9943_v40 = vadd.f32 %v8219_v48, %v5071_v62 }
0x191d   :  { %v8759_v12 = vpop.f32.mrf.mxu0 }
0x191e   :  { %8772 = vmatpush3.msra.mxu0 %v9943_v40 }
0x191f   :  { %v5074_v20 = vpop.f32.mrf.mxu0  ;;  %8781 = vmatprep.subr.mxu0 %v9074_v0 }
0x1920   :  { %v9947_v35 = vadd.f32 %v8219_v48, %v5074_v20 }
0x1921   :  { %v8760_v30 = vpop.f32.mrf.mxu0 }
0x1922   :  { %8777 = vmatpush3.msra.mxu1 %v9947_v35 }
0x1923   :  { %8786 = vmatprep.subr.mxu1 %v9074_v0 }
0x19d6   :  { %v5150_v36 = vpop.f32.mrf.mxu1 }
0x19d7   :  { %v5230_v52 = vmul.f32 0.35355338, %v5150_v36 }
0x19d8   :  { %v8765_v57 = vpop.f32.mrf.mxu1 }
0x19d9   :  { %v5232_v1 = vadd.f32 %v5230_v52, %v9209_v28 }
0x19da   :  { %v5226_v23 = vpop.f32.mrf.mxu1 }
0x19db   :  { %v5231_v42 = vmul.f32 0.35355338, %v5226_v23  ;;  %v5234_v24 = vsel %vm246_vm2, %v5232_v1, -inf }
0x19dc   :  { %5235 = vmax.xlane.f32.xlu0 %v5234_v24  ;;  %v8770_v53 = vpop.f32.mrf.mxu1 }
0x19dd   :  { %v5233_v13 = vadd.f32 %v5231_v42, %v9209_v28 }
0x19df   :  { %v5237_v29 = vsel %vm246_vm2, %v5233_v13, -inf }
0x19e0   :  { %5238 = vmax.xlane.f32.xlu1 %v5237_v29 }
0x19f1   :  { %5483 = vrot.lane.b32.xlu1 %v9920_v11, %s9076_s18 }
0x19f5   :  { %5403 = vrot.lane.b32.xlu1 %v9925_v4, %s9076_s18 }
0x1a65   :  { %v5236_v49 = vpop.xlane.xlu0 %5235 }
0x1a66   :  { %v5240_v51 = vsub.f32 %v5232_v1, %v5236_v49 }
0x1a68   :  { %v5242_v31 = vmul.f32 1.442695, %v5240_v51 }
0x1a69   :  { %v5239_v50 = vpop.xlane.xlu1 %5238 }
0x1a6a   :  { %8975 = vpow2.f32 %v5242_v31  ;;  %v5241_v55 = vsub.f32 %v5233_v13, %v5239_v50 }
0x1a6c   :  { %v5244_v14 = vmul.f32 1.442695, %v5241_v55 }
0x1a6d   :  { %v5484_v58 = vpop.permute.xlu1 %5483 }
0x1a6e   :  { %8977 = vpow2.f32 %v5244_v14 }
0x1a71   :  { %v5404_v39 = vpop.permute.xlu1 %5403 }
0x1a77   :  { %v8976_v56 = vpop.eup %8975 }
0x1a78   :  { %v5246_v63 = vsel %vm246_vm2, %v8976_v56, 0.0 }
0x1a79   :  { %5247 = vadd.xlane.f32.xlu0 %v5246_v63 }
0x1a7b   :  { %v8978_v15 = vpop.eup %8977 }
0x1a7c   :  { %v5249_v18 = vsel %vm246_vm2, %v8978_v15, 0.0 }
0x1a7d   :  { %5250 = vadd.xlane.f32.xlu1 %v5249_v18 }
0x1a8e   :  { %5481 = vrot.lane.b32.xlu1 %v9933_v6, %s9076_s18 }
0x1a8f   :  { %5405 = vrot.lane.b32.xlu0 %v9915_v10, %s9076_s18 }
0x1b02   :  { %v5248_v41 = vpop.xlane.xlu0 %5247 }
0x1b03   :  { %8979 = vrcp.f32 %v5248_v41 }
0x1b06   :  { %v5251_v43 = vpop.xlane.xlu1 %5250  ;;  %v5406_v7 = vpop.permute.xlu0 %5405 }
0x1b07   :  { %8981 = vrcp.f32 %v5251_v43  ;;  %v8208_v43 = vld [vmem:[%s10305_s2 + $0xb4] sm:$0xf] }
0x1b0a   :  { %v5482_v33 = vpop.permute.xlu1 %5481 }
0x1b10   :  { %v8980_v2 = vpop.eup %8979 }
0x1b11   :  { %v5254_v9 = vmul.f32 %v8980_v2, %v8976_v56  ;;  %v5744_v2 = vsel %vm912_vm4, %v8208_v43, 0 }
0x1b13   :  { %8774 = vmatmul.mubr.msk.f32.vlgmr.msra.gmra.mxu0 %vm246_vm2, %v5254_v9 }
0x1b14   :  { %v8982_v59 = vpop.eup %8981  ;;  %8782 = vmatpush3.xpose.msk.msra.mxu0 %vm246_vm2, %v5406_v7  ;;  %8783 = vmatprep.mubr.msk.f32.mxu0 %vm9075_vm0, %v9074_v0 }
0x1b15   :  { %v5255_v32 = vmul.f32 %v8982_v59, %v8978_v15  ;;  %8791 = vmatprep.subr.mxu0 %v9074_v0  ;;  %v8207_v15 = vld [vmem:[%s10305_s2 + $0xb0] sm:$0xf] }
0x1b17   :  { %8779 = vmatmul.mubr.msk.f32.vlgmr.msra.gmra.mxu1 %vm246_vm2, %v5255_v32  ;;  %8784 = vmatmul.mubr.msk.f32.vlgmr.msra.gmra.mxu0 %vm246_vm2, %v5404_v39 }
0x1b18   :  { %8787 = vmatpush3.xpose.msk.msra.mxu1 %vm246_vm2, %v5484_v58  ;;  %8788 = vmatprep.mubr.msk.f32.mxu1 %vm9075_vm0, %v9074_v0  ;;  %v5791_v58 = vsel %vm912_vm4, %v8207_v15, 0 }
0x1b19   :  { %8796 = vmatprep.subr.mxu1 %v9074_v0  ;;  %8793 = vmatprep.mubr.msk.f32.mxu0 %vm9075_vm0, %v9074_v0 }
0x1b1b   :  { %8789 = vmatmul.mubr.msk.f32.vlgmr.msra.gmra.mxu1 %vm246_vm2, %v5482_v33 }
0x1b1c   :  { %8798 = vmatprep.mubr.msk.f32.mxu1 %vm9075_vm0, %v9074_v0 }
0x1bd3   :  { %v5325_v34 = vpop.f32.mrf.mxu0 }
0x1bd5   :  { %v8775_v22 = vpop.f32.mrf.mxu0 }
0x1bd7   :  { %v5398_v37 = vpop.f32.mrf.mxu1  ;;  %v5477_v38 = vpop.f32.mrf.mxu0 }
0x1bd8   :  { %v5402_v3 = vpack.c.bf16 %v5398_v37, %v5325_v34  ;;  %v5559_v19 = vmul.f32 0.35355338, %v5477_v38 }
0x1bd9   :  { %v8780_v21 = vpop.f32.mrf.mxu1  ;;  %v8785_v27 = vpop.f32.mrf.mxu0 }
0x1bda   :  { %v5561_v48 = vadd.f32 %v5559_v19, %v9209_v28 }
0x1bdb   :  { %v5555_v62 = vpop.f32.mrf.mxu1 }
0x1bdc   :  { %v5560_v12 = vmul.f32 0.35355338, %v5555_v62  ;;  %v5563_v20 = vsel %vm246_vm2, %v5561_v48, -inf }
0x1bdd   :  { %v8790_v30 = vpop.f32.mrf.mxu1  ;;  %5564 = vmax.xlane.f32.xlu0 %v5563_v20 }
0x1bde   :  { %v5562_v36 = vadd.f32 %v5560_v12, %v9209_v28 }
0x1be0   :  { %v5566_v52 = vsel %vm246_vm2, %v5562_v36, -inf }
0x1be1   :  { %5567 = vmax.xlane.f32.xlu1 %v5566_v52 }
0x1bf2   :  { %5663 = vrot.lane.b32.xlu1 %v9947_v35, %s9076_s18 }
0x1bf6   :  { %5914 = vrot.lane.b32.xlu1 %v9920_v11, %s9077_s25 }
0x1bfa   :  { %5912 = vrot.lane.b32.xlu1 %v9933_v6, %s9077_s25 }
0x1bfe   :  { %5834 = vrot.lane.b32.xlu1 %v9925_v4, %s9077_s25 }
0x1c02   :  { %6220 = vrot.lane.b32.xlu1 %v9915_v10, %s9078_s26 }
0x1c66   :  { %v5565_v57 = vpop.xlane.xlu0 %5564 }
0x1c67   :  { %v5569_v1 = vsub.f32 %v5561_v48, %v5565_v57 }
0x1c69   :  { %v5571_v23 = vmul.f32 1.442695, %v5569_v1 }
0x1c6a   :  { %v5568_v42 = vpop.xlane.xlu1 %5567 }
0x1c6b   :  { %8983 = vpow2.f32 %v5571_v23  ;;  %v5570_v24 = vsub.f32 %v5562_v36, %v5568_v42 }
0x1c6d   :  { %v5573_v53 = vmul.f32 1.442695, %v5570_v24 }
0x1c6e   :  { %v5664_v13 = vpop.permute.xlu1 %5663 }
0x1c6f   :  { %8985 = vpow2.f32 %v5573_v53  ;;  %8797 = vmatpush3.msra.mxu1 %v5664_v13 }
0x1c70   :  { %8807 = vmatprep.subr.bf16.mxu1 %v9074_v0 }
0x1c72   :  { %v5915_v39 = vpop.permute.xlu1 %5914 }
0x1c76   :  { %v5913_v41 = vpop.permute.xlu1 %5912 }
0x1c78   :  { %v8984_v29 = vpop.eup %8983 }
0x1c79   :  { %v5575_v49 = vsel %vm246_vm2, %v8984_v29, 0.0 }
0x1c7a   :  { %5576 = vadd.xlane.f32.xlu0 %v5575_v49 }
0x1c7c   :  { %v8986_v51 = vpop.eup %8985 }
0x1c7d   :  { %v5578_v31 = vsel %vm246_vm2, %v8986_v51, 0.0 }
0x1c7e   :  { %5579 = vadd.xlane.f32.xlu0 %v5578_v31 }
0x1c94   :  { %5586 = vrot.lane.b32.xlu0 %v9943_v40, %s9076_s18 }
0x1c98   :  { %5836 = vrot.lane.b32.xlu0 %v9915_v10, %s9077_s25 }
0x1d03   :  { %v5577_v50 = vpop.xlane.xlu0 %5576 }
0x1d04   :  { %8987 = vrcp.f32 %v5577_v50 }
0x1d07   :  { %v5580_v55 = vpop.xlane.xlu0 %5579 }
0x1d08   :  { %8989 = vrcp.f32 %v5580_v55 }
0x1d0b   :  { %v5587_v14 = vpop.permute.xlu0 %5586 }
0x1d0c   :  { %8792 = vmatpush3.msra.mxu0 %v5587_v14 }
0x1d0d   :  { %8801 = vmatprep.subr.bf16.mxu0 %v9074_v0 }
0x1d0f   :  { %v5837_v34 = vpop.permute.xlu0 %5836 }
0x1d11   :  { %v8988_v56 = vpop.eup %8987 }
0x1d12   :  { %v5583_v63 = vmul.f32 %v8988_v56, %v8984_v29 }
0x1d14   :  { %8794 = vmatmul.mubr.msk.f32.vlgmr.msra.gmra.mxu0 %vm246_vm2, %v5583_v63 }
0x1d15   :  { %v8990_v18 = vpop.eup %8989  ;;  %8803 = vmatprep.mubr.msk.bf16.mxu0 %vm9075_vm0, %v9074_v0  ;;  %8802 = vmatpush3.bf16.msra.mxu0 %v5744_v2 }
0x1d16   :  { %v5584_v10 = vmul.f32 %v8990_v18, %v8986_v51  ;;  %8813 = vmatprep.subr.mxu0 %v9074_v0 }
0x1d18   :  { %8799 = vmatmul.mubr.msk.f32.vlgmr.msra.gmra.mxu1 %vm246_vm2, %v5584_v10 }
0x1d19   :  { %8808 = vmatpush3.bf16.msra.mxu1 %v5791_v58  ;;  %8809 = vmatprep.mubr.msk.bf16.mxu1 %vm9075_vm0, %v9074_v0 }
0x1d1a   :  { %8818 = vmatprep.subr.mxu1 %v9074_v0 }
0x1d1c   :  { %8810 = vmatmul.mubr.msk.bf16.vlgmr.msra.gmra.mxu1 %vm246_vm2, %v5402_v3  ;;  %v5835_v3 = vpop.permute.xlu1 %5834 }
0x1d1d   :  { %8819 = vmatpush3.xpose.msk.msra.mxu1 %vm246_vm2, %v5915_v39  ;;  %8820 = vmatprep.mubr.msk.f32.mxu1 %vm9075_vm0, %v9074_v0 }
0x1d1e   :  { %8828 = vmatprep.subr.mxu1 %v9074_v0 }
0x1d20   :  { %v6221_v51 = vpop.permute.xlu1 %6220 }
0x1d24   :  { %8821 = vmatmul.mubr.msk.f32.vlgmr.msra.gmra.mxu1 %vm246_vm2, %v5913_v41 }
0x1d25   :  { %8830 = vmatprep.mubr.msk.f32.mxu1 %vm9075_vm0, %v9074_v0 }
0x1dd4   :  { %v5658_v9 = vpop.f32.mrf.mxu0 }
0x1dd6   :  { %v8795_v7 = vpop.f32.mrf.mxu0 }
0x1dd8   :  { %v5735_v59 = vpop.f32.mrf.mxu1 }
0x1dd9   :  { %v5739_v32 = vpack.c.bf16 %v5735_v59, %v5658_v9 }
0x1dda   :  { %v8800_v33 = vpop.f32.mrf.mxu1 }
0x1ddb   :  { %8804 = vmatmul.mubr.msk.bf16.vlgmr.msra.gmra.mxu0 %vm246_vm2, %v5739_v32 }
0x1ddc   :  { %8814 = vmatpush3.xpose.msk.msra.mxu0 %vm246_vm2, %v5837_v34  ;;  %v10029_v22 = vpop.f32.mrf.mxu1  ;;  %8815 = vmatprep.mubr.msk.f32.mxu0 %vm9075_vm0, %v9074_v0 }
0x1ddd   :  { %8823 = vmatprep.subr.mxu0 %v9074_v0 }
0x1dde   :  { %v8811_v37 = vpop.f32.mrf.mxu1 }
0x1de0   :  { %v10034_v38 = vpop.f32.mrf.mxu1 }
0x1de2   :  { %v8812_v19 = vpop.f32.mrf.mxu1 }
0x1de3   :  { %8816 = vmatmul.mubr.msk.f32.vlgmr.msra.gmra.mxu0 %vm246_vm2, %v5835_v3 }
0x1de4   :  { %v5986_v21 = vpop.f32.mrf.mxu1  ;;  %8825 = vmatprep.mubr.msk.f32.mxu0 %vm9075_vm0, %v9074_v0 }
0x1de5   :  { %v5991_v27 = vmul.f32 0.35355338, %v5986_v21 }
0x1de6   :  { %v8822_v48 = vpop.f32.mrf.mxu1 }
0x1de7   :  { %v5993_v62 = vadd.f32 %v5991_v27, %v9209_v28 }
0x1de9   :  { %v5997_v12 = vsel %vm246_vm2, %v5993_v62, -inf }
0x1dea   :  { %5998 = vmax.xlane.f32.xlu0 %v5997_v12 }
0x1e00   :  { %6092 = vrot.lane.b32.xlu0 %v9947_v35, %s9077_s25 }
0x1e04   :  { %6218 = vrot.lane.b32.xlu0 %v9925_v4, %s9078_s26 }
0x1e08   :  { %6296 = vrot.lane.b32.xlu0 %v9933_v6, %s9078_s26 }
0x1e73   :  { %v5999_v20 = vpop.xlane.xlu0 %5998 }
0x1e74   :  { %v6001_v30 = vsub.f32 %v5993_v62, %v5999_v20  ;;  %v8209_v62 = vld [vmem:[%s10305_s2 + $0xb8] sm:$0xf] }
0x1e75   :  { %v6173_v12 = vsel %vm912_vm4, %v8209_v62, 0 }
0x1e76   :  { %v6004_v36 = vmul.f32 1.442695, %v6001_v30 }
0x1e77   :  { %v6093_v52 = vpop.permute.xlu0 %6092 }
0x1e78   :  { %8991 = vpow2.f32 %v6004_v36  ;;  %8829 = vmatpush3.msra.mxu1 %v6093_v52 }
0x1e79   :  { %8839 = vmatprep.subr.mxu1 %v9074_v0 }
0x1e85   :  { %v8992_v57 = vpop.eup %8991 }
0x1e86   :  { %v6009_v1 = vsel %vm246_vm2, %v8992_v57, 0.0 }
0x1e87   :  { %6010 = vadd.xlane.f32.xlu1 %v6009_v1 }
0x1e98   :  { %6298 = vrot.lane.b32.xlu1 %v9920_v11, %s9078_s26  ;;  %v6219_v11 = vpop.permute.xlu0 %6218 }
0x1e9b   :  { %v10051_v23 = vpop.f32.mrf.mxu0 }
0x1e9c   :  { %v6297_v56 = vpop.permute.xlu0 %6296 }
0x1e9d   :  { %v8805_v4 = vpop.f32.mrf.mxu0 }
0x1e9f   :  { %v10053_v42 = vpop.f32.mrf.mxu0 }
0x1ea1   :  { %v8806_v6 = vpop.f32.mrf.mxu0 }
0x1ea3   :  { %v5908_v24 = vpop.f32.mrf.mxu0 }
0x1ea4   :  { %v5990_v13 = vmul.f32 0.35355338, %v5908_v24 }
0x1ea5   :  { %v8817_v53 = vpop.f32.mrf.mxu0 }
0x1ea6   :  { %v5992_v29 = vadd.f32 %v5990_v13, %v9209_v28 }
0x1ea8   :  { %v5994_v49 = vsel %vm246_vm2, %v5992_v29, -inf }
0x1ebc   :  { %5995 = vmax.xlane.f32.xlu1 %v5994_v49 }
0x1f10   :  { %v6011_v31 = vpop.xlane.xlu1 %6010 }
0x1f11   :  { %8993 = vrcp.f32 %v6011_v31 }
0x1f14   :  { %v6299_v14 = vpop.permute.xlu1 %6298 }
0x1f1e   :  { %v8994_v50 = vpop.eup %8993 }
0x1f1f   :  { %v6015_v55 = vmul.f32 %v8994_v50, %v8992_v57 }
0x1f21   :  { %8831 = vmatmul.mubr.msk.f32.vlgmr.msra.gmra.mxu1 %vm246_vm2, %v6015_v55 }
0x1f22   :  { %8840 = vmatpush3.xpose.msk.msra.mxu1 %vm246_vm2, %v6221_v51  ;;  %8841 = vmatprep.mubr.msk.f32.mxu1 %vm9075_vm0, %v9074_v0 }
0x1f23   :  { %8844 = vmatprep.subr.mxu1 %v9074_v0 }
0x1f25   :  { %8842 = vmatmul.mubr.msk.f32.vlgmr.msra.gmra.mxu1 %vm246_vm2, %v6219_v11 }
0x1f26   :  { %8845 = vmatpush3.xpose.msk.msra.mxu1 %vm246_vm2, %v6299_v14  ;;  %8846 = vmatprep.mubr.msk.f32.mxu1 %vm9075_vm0, %v9074_v0  ;;  %v8210_v14 = vld [vmem:[%s10305_s2 + $0xbc] sm:$0xf] }
0x1f27   :  { %8854 = vmatprep.subr.mxu1 %v9074_v0 }
0x1f29   :  { %8847 = vmatmul.mubr.msk.f32.vlgmr.msra.gmra.mxu1 %vm246_vm2, %v6297_v56  ;;  %v6557_v56 = vsel %vm912_vm4, %v8210_v14, 0 }
0x1f2a   :  { %8856 = vmatprep.mubr.msk.f32.mxu1 %vm9075_vm0, %v9074_v0 }
0x1f45   :  { %v5996_v63 = vpop.xlane.xlu1 %5995 }
0x1f46   :  { %v6000_v15 = vsub.f32 %v5992_v29, %v5996_v63  ;;  %v5828_v63 = vadd.f32 %v10029_v22, %v10051_v23  ;;  %v8251_v22 = vld [vmem:[%s10307_s4 + $0x14] ss:$0 sm:$0xff] }
0x1f48   :  { %v6002_v18 = vmul.f32 1.442695, %v6000_v15 }
0x1f4a   :  { %8995 = vpow2.f32 %v6002_v18 }
0x1f57   :  { %v8996_v10 = vpop.eup %8995 }
0x1f58   :  { %v6006_v58 = vsel %vm246_vm2, %v8996_v10, 0.0 }
0x1f59   :  { %6007 = vadd.xlane.f32.xlu0 %v6006_v58 }
0x1f6f   :  { %6016 = vrot.lane.b32.xlu0 %v9943_v40, %s9077_s25 }
0x1f73   :  { %6476 = vrot.lane.b32.xlu0 %v9947_v35, %s9078_s26 }
0x1fe1   :  { %v6164_v39 = vpop.f32.mrf.mxu1 }
0x1fe2   :  { %v6008_v41 = vpop.xlane.xlu0 %6007 }
0x1fe3   :  { %8997 = vrcp.f32 %v6008_v41  ;;  %v8832_v43 = vpop.f32.mrf.mxu1 }
0x1fe5   :  { %v6292_v2 = vpop.f32.mrf.mxu1 }
0x1fe6   :  { %v6374_v9 = vmul.f32 0.35355338, %v6292_v2  ;;  %v6017_v7 = vpop.permute.xlu0 %6016 }
0x1fe7   :  { %8824 = vmatpush3.msra.mxu0 %v6017_v7  ;;  %v8843_v59 = vpop.f32.mrf.mxu1 }
0x1fe8   :  { %v6376_v32 = vadd.f32 %v6374_v9, %v9209_v28  ;;  %8833 = vmatprep.subr.bf16.mxu0 %v9074_v0 }
0x1fe9   :  { %v6370_v33 = vpop.f32.mrf.mxu1 }
0x1fea   :  { %v6375_v34 = vmul.f32 0.35355338, %v6370_v33  ;;  %v6477_v37 = vpop.permute.xlu0 %6476  ;;  %v6378_v3 = vsel %vm246_vm2, %v6376_v32, -inf }
0x1feb   :  { %v8848_v19 = vpop.f32.mrf.mxu1  ;;  %6379 = vmax.xlane.f32.xlu1 %v6378_v3  ;;  %8855 = vmatpush3.msra.mxu1 %v6477_v37 }
0x1fec   :  { %v6377_v35 = vadd.f32 %v6375_v34, %v9209_v28 }
0x1fee   :  { %v6381_v21 = vsel %vm246_vm2, %v6377_v35, -inf }
0x1fef   :  { %6382 = vmax.xlane.f32.xlu1 %v6381_v21 }
0x1ff0   :  { %v8998_v27 = vpop.eup %8997 }
0x1ff1   :  { %v6014_v48 = vmul.f32 %v8998_v27, %v8996_v10 }
0x1ff3   :  { %8826 = vmatmul.mubr.msk.f32.vlgmr.msra.gmra.mxu0 %vm246_vm2, %v6014_v48 }
0x1ff4   :  { %8835 = vmatprep.mubr.msk.bf16.mxu0 %vm9075_vm0, %v9074_v0  ;;  %8834 = vmatpush3.bf16.msra.mxu0 %v6173_v12 }
0x1ff5   :  { %8849 = vmatprep.subr.mxu0 %v9074_v0 }
0x2074   :  { %v6380_v28 = vpop.xlane.xlu1 %6379 }
0x2075   :  { %v6384_v20 = vsub.f32 %v6376_v32, %v6380_v28 }
0x2077   :  { %v6386_v30 = vmul.f32 1.442695, %v6384_v20 }
0x2078   :  { %v6383_v36 = vpop.xlane.xlu1 %6382 }
0x2079   :  { %8999 = vpow2.f32 %v6386_v30  ;;  %v6385_v52 = vsub.f32 %v6377_v35, %v6383_v36 }
0x207b   :  { %v6388_v57 = vmul.f32 1.442695, %v6385_v52 }
0x207d   :  { %9001 = vpow2.f32 %v6388_v57 }
0x2086   :  { %v9000_v1 = vpop.eup %8999 }
0x2087   :  { %v6390_v4 = vsel %vm246_vm2, %v9000_v1, 0.0 }
0x2088   :  { %6391 = vadd.xlane.f32.xlu1 %v6390_v4  ;;  %v6675_v4 = vld [vmem:[#allocation2 + $0x2c0] sm:$0xff] }
0x208a   :  { %v9002_v6 = vpop.eup %9001 }
0x208b   :  { %v6393_v24 = vsel %vm246_vm2, %v9002_v6, 0.0 }
0x208c   :  { %6394 = vadd.xlane.f32.xlu1 %v6393_v24  ;;  %v6676_v24 = vld [vmem:[#allocation2 + $0x2c8] sm:$0xff] }
0x209d   :  { %6400 = vrot.lane.b32.xlu1 %v9943_v40, %s9078_s26 }
0x20b3   :  { %v6088_v53 = vpop.f32.mrf.mxu0 }
0x20b4   :  { %v6168_v13 = vpack.c.bf16 %v6164_v39, %v6088_v53 }
0x20b5   :  { %v8827_v29 = vpop.f32.mrf.mxu0 }
0x20b6   :  { %8836 = vmatmul.mubr.msk.bf16.vlgmr.msra.gmra.mxu0 %vm246_vm2, %v6168_v13 }
0x20b7   :  { %8851 = vmatprep.mubr.msk.f32.mxu0 %vm9075_vm0, %v9074_v0 }
0x2111   :  { %v6392_v49 = vpop.xlane.xlu1 %6391 }
0x2112   :  { %9003 = vrcp.f32 %v6392_v49  ;;  %v6651_v49 = vld [vmem:[#allocation2 + $0x200] sm:$0xff] }
0x2115   :  { %v6395_v51 = vpop.xlane.xlu1 %6394 }
0x2116   :  { %9005 = vrcp.f32 %v6395_v51  ;;  %v6659_v51 = vld [vmem:[#allocation2 + $0x240] sm:$0xff] }
0x2119   :  { %v6401_v31 = vpop.permute.xlu1 %6400 }
0x211a   :  { %8850 = vmatpush3.msra.mxu0 %v6401_v31  ;;  %v6652_v31 = vld [vmem:[#allocation2 + $0x208] sm:$0xff] }
0x211b   :  { %8859 = vmatprep.subr.bf16.mxu0 %v9074_v0 }
0x211f   :  { %v9004_v50 = vpop.eup %9003 }
0x2120   :  { %v6398_v55 = vmul.f32 %v9004_v50, %v9000_v1  ;;  %v6667_v1 = vld [vmem:[#allocation2 + $0x280] sm:$0xff]  ;;  %v8257_v50 = vcombine.high %v6651_v49, %v6659_v51 }
0x2121   :  { %v8272_v53 = vcombine.low %v6667_v1, %v6675_v4 }
0x2122   :  { %8852 = vmatmul.mubr.msk.f32.vlgmr.msra.gmra.mxu0 %vm246_vm2, %v6398_v55  ;;  %v6660_v55 = vld [vmem:[#allocation2 + $0x248] sm:$0xff] }
0x2123   :  { %v9006_v40 = vpop.eup %9005  ;;  %8861 = vmatprep.mubr.msk.bf16.mxu0 %vm9075_vm0, %v9074_v0  ;;  %8860 = vmatpush3.bf16.msra.mxu0 %v6557_v56  ;;  %v5831_v0 = vadd.f32 %v10034_v38, %v10053_v42  ;;  %v8259_v14 = vcombine.high %v6652_v31, %v6660_v55  ;;  %v6669_v56 = vld [vmem:[#allocation2 + $0x290] sm:$0xff] }
0x2124   :  { %v6399_v11 = vmul.f32 %v9006_v40, %v9002_v6  ;;  %v8273_v6 = vcombine.high %v6667_v1, %v6675_v4  ;;  %v8256_v40 = vcombine.low %v6651_v49, %v6659_v51 }
0x2126   :  { %8857 = vmatmul.mubr.msk.f32.vlgmr.msra.gmra.mxu1 %vm246_vm2, %v6399_v11  ;;  %6979 = vmatprep.subr.bf16.mxu1 %v8273_v6  ;;  %v8258_v11 = vcombine.low %v6652_v31, %v6660_v55  ;;  %v6663_v6 = vld [vmem:[#allocation2 + $0x260] sm:$0xff]  ;;  %v6673_v31 = vld [vmem:[#allocation2 + $0x2b0] sm:$0xff]  ;;  %v6674_v55 = vld [vmem:[#allocation2 + $0x2b8] sm:$0xff] }
0x2127   :  { %6999 = vmatprep.mubr.bf16.mxu1 %v9079_v16  ;;  %6980 = vmatpush1.bf16.msra.mxu1 %v8272_v53  ;;  %v6664_v53 = vld [vmem:[#allocation2 + $0x268] sm:$0xff] }
0x2128   :  { %6981 = vmatprep.subr.bf16.mxu1 %v8257_v50  ;;  %v6681_v50 = vld [vmem:[#allocation2 + $0x2f0] sm:$0xff] }
0x212b   :  { %6982 = vmatpush1.bf16.msra.mxu1 %v8256_v40  ;;  %v6682_v40 = vld [vmem:[#allocation2 + $0x2f8] sm:$0xff] }
0x2176   :  { %v6209_v15 = vpop.f32.mrf.mxu0 }
0x2177   :  { %v6216_v18 = vadd.f32 %v6209_v15, %v5828_v63  ;;  %v6677_v63 = vld [vmem:[#allocation2 + $0x2d0] sm:$0xff]  ;;  %v6670_v15 = vld [vmem:[#allocation2 + $0x298] sm:$0xff] }
0x2178   :  { %v8837_v10 = vpop.f32.mrf.mxu0 }
0x2179   :  { %v6678_v10 = vld [vmem:[#allocation2 + $0x2d8] sm:$0xff] }
0x217a   :  { %v6212_v58 = vpop.f32.mrf.mxu0 }
0x217b   :  { %v6217_v39 = vadd.f32 %v6212_v58, %v5831_v0  ;;  %v8276_v0 = vcombine.low %v6669_v56, %v6677_v63  ;;  %v8278_v58 = vcombine.low %v6670_v15, %v6678_v10 }
0x217c   :  { %v8838_v41 = vpop.f32.mrf.mxu0 }
0x21e2   :  { %v6472_v43 = vpop.f32.mrf.mxu0 }
0x21e4   :  { %v8853_v2 = vpop.f32.mrf.mxu0 }
0x21e6   :  { %v6548_v9 = vpop.f32.mrf.mxu1 }
0x21e7   :  { %v6552_v7 = vpack.c.bf16 %v6548_v9, %v6472_v43 }
0x21e8   :  { %v8858_v59 = vpop.f32.mrf.mxu1 }
0x21e9   :  { %8862 = vmatmul.mubr.msk.bf16.vlgmr.msra.gmra.mxu0 %vm246_vm2, %v6552_v7 }
0x21ea   :  { %7042 = vmatprep.mubr.bf16.mxu0 %v9079_v16 }
0x22a9   :  { %v6593_v23 = vpop.f32.mrf.mxu0 }
0x22aa   :  { %v6600_v32 = vadd.f32 %v6593_v23, %v6216_v18  ;;  %v8277_v18 = vcombine.high %v6669_v56, %v6677_v63  ;;  %v8285_v56 = vcombine.high %v6673_v31, %v6681_v50  ;;  %v8287_v63 = vcombine.high %v6674_v55, %v6682_v40 }
0x22ab   :  { %v8863_v33 = vpop.f32.mrf.mxu0 }
0x22ac   :  { %v6606_v38 = vadd.f32 %v8251_v22, %v6600_v32  ;;  %7065 = vmatprep.subr.bf16.mxu1 %v8277_v18  ;;  %v8252_v32 = vld [vmem:[%s10307_s4 + $0x15] ss:$0 sm:$0xff] }
0x22ad   :  { %v6596_v42 = vpop.f32.mrf.mxu0  ;;  %v6665_v18 = vld [vmem:[#allocation2 + $0x270] sm:$0xff] }
0x22ae   :  { %v6601_v34 = vadd.f32 %v6596_v42, %v6217_v39  ;;  %v6608_v37 = vadd.f32 %v6606_v38, %v9892_v8  ;;  %v8279_v39 = vcombine.high %v6670_v15, %v6678_v10  ;;  %v6657_v15 = vld [vmem:[#allocation2 + $0x230] sm:$0xff]  ;;  %v6658_v10 = vld [vmem:[#allocation2 + $0x238] sm:$0xff] }
0x22af   :  { %v8864_v3 = vpop.f32.mrf.mxu0 }
0x22b0   :  { %v6607_v19 = vadd.f32 %v8251_v22, %v6601_v34  ;;  %v6612_v35 = vsel %vm87_vm1, %v6608_v37, 0.0  ;;  %v8253_v34 = vld [vmem:[%s10307_s4 + $0x16] ss:$0 sm:$0xff] }
0x22b1   :  { %6613 = vadd.xlane.f32.xlu0 %v6612_v35  ;;  %v6653_v3 = vld [vmem:[#allocation2 + $0x210] sm:$0xff]  ;;  %v6654_v35 = vld [vmem:[#allocation2 + $0x218] sm:$0xff] }
0x22b2   :  { %v6609_v21 = vadd.f32 %v6607_v19, %v9894_v17  ;;  %v6668_v17 = vld [vmem:[#allocation2 + $0x288] sm:$0xff]  ;;  %v6661_v19 = vld [vmem:[#allocation2 + $0x250] sm:$0xff] }
0x22b3   :  { %v8274_v13 = vcombine.low %v6668_v17, %v6676_v24  ;;  %v8275_v29 = vcombine.high %v6668_v17, %v6676_v24  ;;  %v6655_v17 = vld [vmem:[#allocation2 + $0x220] sm:$0xff]  ;;  %v6656_v24 = vld [vmem:[#allocation2 + $0x228] sm:$0xff] }
0x22b4   :  { %v6615_v27 = vsel %vm87_vm1, %v6609_v21, 0.0  ;;  %v8265_v49 = vcombine.high %v6655_v17, %v6663_v6  ;;  %v8267_v51 = vcombine.high %v6656_v24, %v6664_v53 }
0x22b5   :  { %6616 = vadd.xlane.f32.xlu1 %v6615_v27  ;;  %7022 = vmatprep.subr.bf16.mxu0 %v8275_v29 }
0x22b6   :  { %7023 = vmatpush1.bf16.msra.mxu0 %v8274_v13 }
0x22b7   :  { %7024 = vmatprep.subr.bf16.mxu0 %v8259_v14  ;;  %v8266_v14 = vcombine.low %v6656_v24, %v6664_v53 }
0x22ba   :  { %7025 = vmatpush1.bf16.msra.mxu0 %v8258_v11  ;;  %v8264_v11 = vcombine.low %v6655_v17, %v6663_v6 }
0x22bb   :  { %7108 = vmatprep.subr.bf16.mxu0 %v8279_v39  ;;  %v8286_v39 = vcombine.low %v6674_v55, %v6682_v40 }
0x233a   :  { %v6614_v48 = vpop.xlane.xlu0 %6613 }
0x233b   :  { %v6618_v62 = vmul.f32 0.03125, %v6614_v48 }
0x233d   :  { %v6620_v12 = vsub.f32 %v6608_v37, %v6618_v62 }
0x233e   :  { %v6617_v28 = vpop.xlane.xlu1 %6616 }
0x233f   :  { %v6619_v20 = vmul.f32 0.03125, %v6617_v28  ;;  %v6622_v30 = vmul.f32 %v6620_v12, %v6620_v12 }
0x2341   :  { %v6621_v36 = vsub.f32 %v6609_v21, %v6619_v20  ;;  %v6624_v52 = vsel %vm87_vm1, %v6622_v30, 0.0  ;;  %v6662_v21 = vld [vmem:[#allocation2 + $0x258] sm:$0xff]  ;;  %v6671_v20 = vld [vmem:[#allocation2 + $0x2a0] sm:$0xff] }
0x2342   :  { %6625 = vadd.xlane.f32.xlu0 %v6624_v52  ;;  %v8263_v28 = vcombine.high %v6654_v35, %v6662_v21  ;;  %v6679_v30 = vld [vmem:[#allocation2 + $0x2e0] sm:$0xff]  ;;  %v6680_v52 = vld [vmem:[#allocation2 + $0x2e8] sm:$0xff] }
0x2343   :  { %v6623_v8 = vmul.f32 %v6621_v36, %v6621_v36  ;;  %v8281_v1 = vcombine.high %v6671_v20, %v6679_v30  ;;  %v8280_v13 = vcombine.low %v6671_v20, %v6679_v30  ;;  %v10158_v20 = vld [vmem:[#allocation2 + $0x3d0] sm:$0xff]  ;;  %v10160_v30 = vld [vmem:[#allocation2 + $0x398] sm:$0xff] }
0x2345   :  { %v6627_v57 = vsel %vm87_vm1, %v6623_v8, 0.0  ;;  %v8260_v8 = vcombine.low %v6653_v3, %v6661_v19 }
0x2346   :  { %6628 = vadd.xlane.f32.xlu0 %v6627_v57  ;;  %v8262_v57 = vcombine.low %v6654_v35, %v6662_v21  ;;  %v6693_v35 = vld [vmem:[#allocation2 + $0x348] sm:$0xff] }
0x23cb   :  { %v6626_v41 = vpop.xlane.xlu0 %6625 }
0x23cc   :  { %v6630_v43 = vmul.f32 0.03125, %v6626_v41  ;;  %v8269_v41 = vcombine.high %v6657_v15, %v6665_v18 }
0x23ce   :  { %v6632_v2 = vadd.f32 1e-05, %v6630_v43 }
0x23cf   :  { %v6629_v9 = vpop.xlane.xlu0 %6628 }
0x23d0   :  { %9007 = vrsqrt.f32 %v6632_v2  ;;  %v6631_v7 = vmul.f32 0.03125, %v6629_v9  ;;  %v6700_v2 = vld [vmem:[#allocation2 + $0x380] sm:$0xff] }
0x23d1   :  { %v6708_v9 = vld [vmem:[#allocation2 + $0x3c0] sm:$0xff] }
0x23d2   :  { %v6633_v59 = vadd.f32 1e-05, %v6631_v7  ;;  %v6701_v7 = vld [vmem:[#allocation2 + $0x388] sm:$0xff] }
0x23d4   :  { %9009 = vrsqrt.f32 %v6633_v59  ;;  %v6709_v59 = vld [vmem:[#allocation2 + $0x3c8] sm:$0xff] }
0x23dd   :  { %v9008_v22 = vpop.eup %9007 }
0x23de   :  { %v6636_v23 = vmul.f32 %v9008_v22, %v6620_v12  ;;  %v8261_v12 = vcombine.high %v6653_v3, %v6661_v19  ;;  %v8268_v22 = vcombine.low %v6657_v15, %v6665_v18  ;;  %v6685_v3 = vld [vmem:[#allocation2 + $0x308] sm:$0xff] }
0x23df   :  { %v8299_v21 = vcombine.low %v6685_v3, %v6693_v35 }
0x23e0   :  { %v6642_v38 = vmul.f32 %v8252_v32, %v6636_v23 }
0x23e1   :  { %v9010_v33 = vpop.eup %9009 }
0x23e2   :  { %v6637_v42 = vmul.f32 %v9010_v33, %v6621_v36  ;;  %v10126_v27 = vadd.f32 %v8253_v34, %v6642_v38  ;;  %v6672_v36 = vld [vmem:[#allocation2 + $0x2a8] sm:$0xff]  ;;  %v8316_v33 = vcombine.high %v6701_v7, %v6709_v59  ;;  %v8313_v38 = vcombine.low %v6700_v2, %v6708_v9 }
0x23e3   :  { %v8283_v4 = vcombine.high %v6672_v36, %v6680_v52  ;;  %v8282_v29 = vcombine.low %v6672_v36, %v6680_v52  ;;  %v10164_v36 = vld [vmem:[#allocation2 + $0x3d8] sm:$0xff] }
0x23e4   :  { %v6643_v37 = vmul.f32 %v8252_v32, %v6637_v42  ;;  %v8314_v32 = vcombine.high %v6700_v2, %v6708_v9  ;;  %v8315_v42 = vcombine.low %v6701_v7, %v6709_v59  ;;  %v10193_v9 = vld [vmem:[#allocation2 + $0x310] sm:$0xff] }
0x23e5   :  { %v10195_v7 = vld [vmem:[#allocation2 + $0x350] sm:$0xff] }
0x23e6   :  { %v10128_v48 = vadd.f32 %v8253_v34, %v6643_v37  ;;  %v6684_v34 = vld [vmem:[#allocation2 + $0x300] sm:$0xff] }
0x23e7   :  { %v6692_v37 = vld [vmem:[#allocation2 + $0x340] sm:$0xff] }
0x23e8   :  { %v10132_v62 = vpack.c.bf16 %v10128_v48, %v10126_v27  ;;  %v8298_v19 = vcombine.high %v6684_v34, %v6692_v37 }
0x23ea   :  { %8288 = vmatmul.mubr.msk.bf16.vlgmr.msra.gmra.mxu1 %vm87_vm1, %v10132_v62  ;;  %8289 = vmatmul.mubr.msk.bf16.vlgmr.msra.gmra.mxu0 %vm87_vm1, %v10132_v62 }
0x23eb   :  { %7066 = vmatpush1.bf16.msra.mxu1 %v8276_v0  ;;  %7109 = vmatpush1.bf16.msra.mxu0 %v8278_v58  ;;  %v6666_v0 = vld [vmem:[#allocation2 + $0x278] sm:$0xff]  ;;  %v8284_v58 = vcombine.low %v6673_v31, %v6681_v50 }
0x23ec   :  { %7067 = vmatprep.subr.bf16.mxu1 %v8261_v12  ;;  %7110 = vmatprep.subr.bf16.mxu0 %v8263_v28  ;;  %v8271_v43 = vcombine.high %v6658_v10, %v6666_v0  ;;  %v8270_v23 = vcombine.low %v6658_v10, %v6666_v0  ;;  %v8300_v12 = vcombine.high %v6685_v3, %v6693_v35  ;;  %v10156_v28 = vld [vmem:[#allocation2 + $0x390] sm:$0xff] }
0x23ed   :  { %7085 = vmatprep.mubr.bf16.mxu1 %v9079_v16  ;;  %7128 = vmatprep.mubr.bf16.mxu0 %v9079_v16  ;;  %v8317_v52 = vcombine.low %v10156_v28, %v10158_v20 }
0x23ef   :  { %7068 = vmatpush1.bf16.msra.mxu1 %v8260_v8  ;;  %7111 = vmatpush1.bf16.msra.mxu0 %v8262_v57  ;;  %v8319_v8 = vcombine.low %v10160_v30, %v10164_v36  ;;  %v8320_v57 = vcombine.high %v10160_v30, %v10164_v36 }
0x23f0   :  { %7151 = vmatprep.subr.bf16.mxu1 %v8281_v1  ;;  %7194 = vmatprep.subr.bf16.mxu0 %v8283_v4  ;;  %v10175_v1 = vld [vmem:[%s10308_s5 + $0x1] ss:$2 sm:$0xff] }
0x23f1   :  { %v6731_v6 = vrot.slane %v10175_v1, %v9446_v44  ;;  %v6739_v24 = vrot.slane %v10175_v1, %v9449_v45  ;;  %v6727_v53 = vrot.slane %v10175_v1, %v9452_v46  ;;  %v6755_v2 = vrot.slane %v10175_v1, %v9474_v61 }
0x23f2   :  { %8290 = vmatmul.mubr.msk.bf16.vlgmr.msra.gmra.mxu1 %vm87_vm1, %v10132_v62  ;;  %8291 = vmatmul.mubr.msk.bf16.vlgmr.msra.gmra.mxu0 %vm87_vm1, %v10132_v62 }
0x23f3   :  { %7152 = vmatpush1.bf16.msra.mxu1 %v8280_v13  ;;  %7195 = vmatpush1.bf16.msra.mxu0 %v8282_v29  ;;  %v6735_v13 = vrot.slane %v10175_v1, %v9455_v47 }
0x23f4   :  { %7153 = vmatprep.subr.bf16.mxu1 %v8265_v49  ;;  %7196 = vmatprep.subr.bf16.mxu0 %v8267_v51 }
0x23f5   :  { %7171 = vmatprep.mubr.bf16.mxu1 %v9079_v16  ;;  %7214 = vmatprep.mubr.bf16.mxu0 %v9079_v16 }
0x23f7   :  { %7154 = vmatpush1.bf16.msra.mxu1 %v8264_v11  ;;  %7197 = vmatpush1.bf16.msra.mxu0 %v8266_v14 }
0x23f8   :  { %7237 = vmatprep.subr.bf16.mxu1 %v8285_v56  ;;  %7280 = vmatprep.subr.bf16.mxu0 %v8287_v63 }
0x23fa   :  { %8292 = vmatmul.mubr.msk.bf16.vlgmr.msra.gmra.mxu1 %vm87_vm1, %v10132_v62  ;;  %8293 = vmatmul.mubr.msk.bf16.vlgmr.msra.gmra.mxu0 %vm87_vm1, %v10132_v62 }
0x23fb   :  { %7238 = vmatpush1.bf16.msra.mxu1 %v8284_v58  ;;  %7281 = vmatpush1.bf16.msra.mxu0 %v8286_v39 }
0x23fc   :  { %7239 = vmatprep.subr.bf16.mxu1 %v8269_v41  ;;  %7282 = vmatprep.subr.bf16.mxu0 %v8271_v43  ;;  %v6747_v43 = vrot.slane %v10175_v1, %v9471_v60 }
0x23fd   :  { %7257 = vmatprep.mubr.bf16.mxu1 %v9079_v16  ;;  %7300 = vmatprep.mubr.bf16.mxu0 %v9079_v16  ;;  %v8297_v16 = vcombine.low %v6684_v34, %v6692_v37 }
0x23ff   :  { %7240 = vmatpush1.bf16.msra.mxu1 %v8268_v22  ;;  %7283 = vmatpush1.bf16.msra.mxu0 %v8270_v23 }
0x2400   :  { %7535 = vmatprep.subr.bf16.mxu1 %v8314_v32  ;;  %7576 = vmatprep.subr.bf16.mxu0 %v8316_v33  ;;  %v10197_v33 = vld [vmem:[#allocation2 + $0x318] sm:$0xff] }
0x2402   :  { %8294 = vmatmul.mubr.msk.bf16.vlgmr.msra.gmra.mxu1 %vm87_vm1, %v10132_v62  ;;  %8295 = vmatmul.mubr.msk.bf16.vlgmr.msra.gmra.mxu0 %vm87_vm1, %v10132_v62  ;;  %v8318_v62 = vcombine.high %v10156_v28, %v10158_v20  ;;  %v8302_v20 = vcombine.high %v10193_v9, %v10195_v7 }
0x2403   :  { %7536 = vmatpush1.bf16.xpose.msra.mxu1 %v8313_v38  ;;  %7577 = vmatpush1.bf16.xpose.msra.mxu0 %v8315_v42  ;;  %v10199_v38 = vld [vmem:[#allocation2 + $0x358] sm:$0xff] }
0x2404   :  { %7537 = vmatprep.subr.bf16.mxu1 %v8298_v19  ;;  %7578 = vmatprep.subr.bf16.mxu0 %v8300_v12  ;;  %v8304_v30 = vcombine.high %v10197_v33, %v10199_v38 }
0x240b   :  { %7538 = vmatpush1.bf16.xpose.msra.mxu1 %v8297_v16  ;;  %7579 = vmatpush1.bf16.xpose.msra.mxu0 %v8299_v21 }
0x240c   :  { %7617 = vmatprep.subr.bf16.mxu1 %v8318_v62  ;;  %7658 = vmatprep.subr.bf16.mxu0 %v8320_v57 }
0x24aa   :  { %v7001_v4 = vpop.f32.mrf.mxu1  ;;  %v7044_v17 = vpop.f32.mrf.mxu0 }
0x24ab   :  { %v7002_v14 = vadd.f32 %v7001_v4, %v6727_v53  ;;  %v7045_v56 = vadd.f32 %v7044_v17, %v6735_v13 }
0x24ac   :  { %v7003_v29 = vpop.f32.mrf.mxu1  ;;  %v7046_v49 = vpop.f32.mrf.mxu0 }
0x24ad   :  { %v7004_v50 = vadd.f32 %v7003_v29, %v6731_v6  ;;  %v7047_v55 = vadd.f32 %v7046_v49, %v6739_v24  ;;  %v7311_v42 = vmax.f32 %v7002_v14, 0.0  ;;  %v7313_v34 = vmax.f32 %v7045_v56, 0.0  ;;  %v10216_v49 = vld [vmem:[#allocation2 + $0x3a0] sm:$0xff] }
0x24ae   :  { %v7005_v51 = vpop.f32.mrf.mxu1  ;;  %v7048_v31 = vpop.f32.mrf.mxu0  ;;  %v6751_v14 = vrot.slane %v10175_v1, %v9500_v54 }
0x24af   :  { %v7006_v40 = vadd.f32 %v7005_v51, %v6727_v53  ;;  %v7049_v11 = vadd.f32 %v7048_v31, %v6735_v13  ;;  %v7312_v59 = vmax.f32 %v7004_v50, 0.0  ;;  %v7314_v22 = vmax.f32 %v7047_v55, 0.0  ;;  %v10218_v51 = vld [vmem:[#allocation2 + $0x3e0] sm:$0xff]  ;;  %v6705_v55 = vld [vmem:[#allocation2 + $0x3a8] sm:$0xff] }
0x24b0   :  { %v7007_v63 = vpop.f32.mrf.mxu1  ;;  %v7050_v15 = vpop.f32.mrf.mxu0 }
0x24b1   :  { %v7008_v18 = vadd.f32 %v7007_v63, %v6731_v6  ;;  %v7051_v10 = vadd.f32 %v7050_v15, %v6739_v24  ;;  %v7327_v0 = vmax.f32 %v7006_v40, 0.0  ;;  %v7329_v58 = vmax.f32 %v7049_v11, 0.0  ;;  %v10208_v24 = vld [vmem:[%s10308_s5 + $0x11] ss:$2 sm:$0xff]  ;;  %v6713_v40 = vld [vmem:[#allocation2 + $0x3e8] sm:$0xff] }
0x24b2   :  { %v10185_v39 = vpop.f32.mrf.mxu1  ;;  %v10187_v41 = vpop.f32.mrf.mxu0  ;;  %v6763_v29 = vrot.slane %v10208_v24, %v9446_v44  ;;  %v6743_v11 = vrot.slane %v10175_v1, %v9497_v5  ;;  %v6771_v44 = vrot.slane %v10208_v24, %v9449_v45  ;;  %v8322_v1 = vcombine.high %v10216_v49, %v10218_v51 }
0x24b3   :  { %v7328_v23 = vmax.f32 %v7008_v18, 0.0  ;;  %v7330_v32 = vmax.f32 %v7051_v10, 0.0  ;;  %v7343_v16 = vpack.c.bf16 %v7327_v0, %v7311_v42  ;;  %v7345_v21 = vpack.c.bf16 %v7329_v58, %v7313_v34 }
0x24b4   :  { %v7089_v37 = vpop.f32.mrf.mxu1  ;;  %v7132_v3 = vpop.f32.mrf.mxu0  ;;  %v8301_v10 = vcombine.low %v10193_v9, %v10195_v7  ;;  %v8303_v0 = vcombine.low %v10197_v33, %v10199_v38  ;;  %v7088_v45 = vadd.f32 %v10185_v39, %v6743_v11 }
0x24b5   :  { %v7344_v19 = vpack.c.bf16 %v7328_v23, %v7312_v59  ;;  %v7346_v35 = vpack.c.bf16 %v7330_v32, %v7314_v22  ;;  %v7090_v62 = vadd.f32 %v7089_v37, %v6747_v43  ;;  %v7133_v36 = vadd.f32 %v7132_v3, %v6755_v2 }
0x24b6   :  { %v7091_v12 = vpop.f32.mrf.mxu1  ;;  %v7134_v28 = vpop.f32.mrf.mxu0  ;;  %v8324_v22 = vcombine.high %v6705_v55, %v6713_v40  ;;  %v7131_v32 = vadd.f32 %v10187_v41, %v6751_v14  ;;  %v7315_v41 = vmax.f32 %v7088_v45, 0.0 }
0x24b7   :  { %7555 = vmatprep.mubr.bf16.mxu1 %v7344_v19  ;;  %7596 = vmatprep.mubr.bf16.mxu0 %v7346_v35  ;;  %v7092_v58 = vadd.f32 %v7091_v12, %v6743_v11 }
0x24b8   :  { %v7093_v57 = vpop.f32.mrf.mxu1  ;;  %v7136_v4 = vpop.f32.mrf.mxu0  ;;  %7556 = vmatmul.mubr.bf16.vlgmr.msra.gmra.mxu1 %v7343_v16  ;;  %7597 = vmatmul.mubr.bf16.vlgmr.msra.gmra.mxu0 %v7345_v21  ;;  %v6688_v21 = vld [vmem:[#allocation2 + $0x320] sm:$0xff]  ;;  %v7317_v12 = vmax.f32 %v7131_v32, 0.0 }
0x24b9   :  { %v7094_v17 = vadd.f32 %v7093_v57, %v6747_v43  ;;  %v7137_v6 = vadd.f32 %v7136_v4, %v6755_v2  ;;  %7618 = vmatpush1.bf16.xpose.msra.mxu1 %v8317_v52  ;;  %7659 = vmatpush1.bf16.xpose.msra.mxu0 %v8319_v8  ;;  %v7316_v52 = vmax.f32 %v7090_v62, 0.0  ;;  %v7318_v8 = vmax.f32 %v7133_v36, 0.0  ;;  %v6697_v62 = vld [vmem:[#allocation2 + $0x368] sm:$0xff] }
0x24ba   :  { %v10210_v53 = vpop.f32.mrf.mxu1  ;;  %v10212_v13 = vpop.f32.mrf.mxu0  ;;  %7619 = vmatprep.subr.bf16.mxu1 %v8302_v20  ;;  %7660 = vmatprep.subr.bf16.mxu0 %v8304_v30  ;;  %v7135_v43 = vadd.f32 %v7134_v28, %v6751_v14  ;;  %v7331_v34 = vmax.f32 %v7092_v58, 0.0  ;;  %v6696_v20 = vld [vmem:[#allocation2 + $0x360] sm:$0xff]  ;;  %v6689_v30 = vld [vmem:[#allocation2 + $0x328] sm:$0xff]  ;;  %v8321_v4 = vcombine.low %v10216_v49, %v10218_v51  ;;  %v6706_v49 = vld [vmem:[#allocation2 + $0x3b0] sm:$0xff] }
0x24bb   :  { %v7332_v31 = vmax.f32 %v7094_v17, 0.0  ;;  %v7334_v50 = vmax.f32 %v7137_v6, 0.0  ;;  %v6714_v51 = vld [vmem:[#allocation2 + $0x3f0] sm:$0xff]  ;;  %v8307_v58 = vcombine.low %v6689_v30, %v6697_v62 }
0x24bc   :  { %v7175_v56 = vpop.f32.mrf.mxu1  ;;  %v7218_v63 = vpop.f32.mrf.mxu0  ;;  %v7333_v37 = vmax.f32 %v7135_v43, 0.0  ;;  %v7347_v17 = vpack.c.bf16 %v7331_v34, %v7315_v41  ;;  %v8326_v43 = vcombine.high %v6706_v49, %v6714_v51 }
0x24bd   :  { %v7348_v15 = vpack.c.bf16 %v7332_v31, %v7316_v52  ;;  %v7350_v18 = vpack.c.bf16 %v7334_v50, %v7318_v8  ;;  %v7176_v23 = vadd.f32 %v7175_v56, %v6763_v29  ;;  %v7219_v9 = vadd.f32 %v7218_v63, %v6771_v44 }
0x24be   :  { %v7177_v2 = vpop.f32.mrf.mxu1  ;;  %v10230_v59 = vpop.f32.mrf.mxu0  ;;  %v7349_v6 = vpack.c.bf16 %v7333_v37, %v7317_v12  ;;  %v8323_v8 = vcombine.low %v6705_v55, %v6713_v40  ;;  %v8306_v31 = vcombine.high %v6688_v21, %v6696_v20  ;;  %v8308_v50 = vcombine.high %v6689_v30, %v6697_v62  ;;  %v6707_v55 = vld [vmem:[#allocation2 + $0x3b8] sm:$0xff] }
0x24bf   :  { %7637 = vmatprep.mubr.bf16.mxu1 %v7348_v15  ;;  %7678 = vmatprep.mubr.bf16.mxu0 %v7350_v18  ;;  %v7320_v35 = vmax.f32 %v7176_v23, 0.0  ;;  %v7322_v28 = vmax.f32 %v7219_v9, 0.0  ;;  %v6759_v56 = vrot.slane %v10208_v24, %v9452_v46  ;;  %v6715_v40 = vld [vmem:[#allocation2 + $0x3f8] sm:$0xff]  ;;  %v8305_v15 = vcombine.low %v6688_v21, %v6696_v20 }
0x24c0   :  { %v7179_v7 = vpop.f32.mrf.mxu1  ;;  %v7222_v42 = vpop.f32.mrf.mxu0  ;;  %v8328_v46 = vcombine.high %v6707_v55, %v6715_v40  ;;  %v8325_v37 = vcombine.low %v6706_v49, %v6714_v51  ;;  %v6775_v62 = vrot.slane %v10208_v24, %v9497_v5 }
0x24c1   :  { %v7180_v33 = vadd.f32 %v7179_v7, %v6763_v29  ;;  %v7223_v38 = vadd.f32 %v7222_v42, %v6771_v44  ;;  %7620 = vmatpush1.bf16.xpose.msra.mxu1 %v8301_v10  ;;  %7661 = vmatpush1.bf16.xpose.msra.mxu0 %v8303_v0  ;;  %v6767_v44 = vrot.slane %v10208_v24, %v9455_v47 }
0x24c2   :  { %v10236_v3 = vpop.f32.mrf.mxu1  ;;  %v10238_v19 = vpop.f32.mrf.mxu0  ;;  %7699 = vmatprep.subr.bf16.mxu1 %v8322_v1  ;;  %7740 = vmatprep.subr.bf16.mxu0 %v8324_v22  ;;  %v7178_v18 = vadd.f32 %v7177_v2, %v6759_v56  ;;  %v6779_v10 = vrot.slane %v10208_v24, %v9471_v60  ;;  %v6787_v22 = vrot.slane %v10208_v24, %v9474_v61 }
0x24c3   :  { %v7336_v16 = vmax.f32 %v7180_v33, 0.0  ;;  %v7338_v39 = vmax.f32 %v7223_v38, 0.0  ;;  %v7221_v1 = vadd.f32 %v10230_v59, %v6767_v44  ;;  %v7174_v23 = vadd.f32 %v10210_v53, %v6759_v56  ;;  %v6690_v33 = vld [vmem:[#allocation2 + $0x330] sm:$0xff]  ;;  %v6691_v53 = vld [vmem:[#allocation2 + $0x338] sm:$0xff] }
0x24c4   :  { %v7261_v57 = vpop.f32.mrf.mxu1  ;;  %v7304_v52 = vpop.f32.mrf.mxu0  ;;  %v7217_v47 = vadd.f32 %v10212_v13, %v6767_v44  ;;  %v7335_v2 = vmax.f32 %v7178_v18, 0.0  ;;  %v6698_v38 = vld [vmem:[#allocation2 + $0x370] sm:$0xff] }
0x24c5   :  { %v7352_v36 = vpack.c.bf16 %v7336_v16, %v7320_v35  ;;  %v7354_v29 = vpack.c.bf16 %v7338_v39, %v7322_v28  ;;  %v7262_v9 = vadd.f32 %v7261_v57, %v6779_v10  ;;  %v7337_v60 = vmax.f32 %v7221_v1, 0.0  ;;  %v6699_v35 = vld [vmem:[#allocation2 + $0x378] sm:$0xff] }
0x24c6   :  { %v10242_v11 = vpop.f32.mrf.mxu1  ;;  %v10244_v14 = vpop.f32.mrf.mxu0  ;;  %v7305_v7 = vadd.f32 %v7304_v52, %v6787_v22  ;;  %v7319_v42 = vmax.f32 %v7174_v23, 0.0  ;;  %v7321_v61 = vmax.f32 %v7217_v47, 0.0  ;;  %v8327_v39 = vcombine.low %v6707_v55, %v6715_v40 }
0x24c7   :  { %v7324_v13 = vmax.f32 %v7262_v9, 0.0  ;;  %v8310_v12 = vcombine.high %v6690_v33, %v6698_v38  ;;  %v8312_v20 = vcombine.high %v6691_v53, %v6699_v35  ;;  %v8309_v57 = vcombine.low %v6690_v33, %v6698_v38 }
0x24c8   :  { %7638 = vmatmul.mubr.bf16.vlgmr.msra.gmra.mxu1 %v7347_v17  ;;  %7679 = vmatmul.mubr.bf16.vlgmr.msra.gmra.mxu0 %v7349_v6  ;;  %v7265_v63 = vpop.f32.mrf.mxu1  ;;  %v7308_v0 = vpop.f32.mrf.mxu0  ;;  %v7351_v16 = vpack.c.bf16 %v7335_v2, %v7319_v42  ;;  %v7353_v21 = vpack.c.bf16 %v7337_v60, %v7321_v61  ;;  %v7326_v41 = vmax.f32 %v7305_v7, 0.0  ;;  %v8311_v17 = vcombine.low %v6691_v53, %v6699_v35 }
0x24c9   :  { %7700 = vmatpush1.bf16.xpose.msra.mxu1 %v8321_v4  ;;  %7719 = vmatprep.mubr.bf16.mxu1 %v7352_v36  ;;  %v7266_v45 = vadd.f32 %v7265_v63, %v6779_v10  ;;  %v7309_v32 = vadd.f32 %v7308_v0, %v6787_v22  ;;  %v6783_v36 = vrot.slane %v10208_v24, %v9500_v54 }
0x24ca   :  { %7741 = vmatpush1.bf16.xpose.msra.mxu0 %v8323_v8  ;;  %7760 = vmatprep.mubr.bf16.mxu0 %v7354_v29  ;;  %v7264_v4 = vadd.f32 %v10242_v11, %v6775_v62  ;;  %v7260_v29 = vadd.f32 %v10236_v3, %v6775_v62 }
0x24cb   :  { %7701 = vmatprep.subr.bf16.mxu1 %v8306_v31  ;;  %7742 = vmatprep.subr.bf16.mxu0 %v8308_v50  ;;  %v7340_v59 = vmax.f32 %v7266_v45, 0.0  ;;  %v7342_v34 = vmax.f32 %v7309_v32, 0.0  ;;  %v7307_v6 = vadd.f32 %v10244_v14, %v6783_v36  ;;  %v7303_v52 = vadd.f32 %v10238_v19, %v6783_v36 }
0x24cc   :  { %v7339_v8 = vmax.f32 %v7264_v4, 0.0  ;;  %v7323_v50 = vmax.f32 %v7260_v29, 0.0 }
0x24cd   :  { %v7356_v28 = vpack.c.bf16 %v7340_v59, %v7324_v13  ;;  %v7358_v30 = vpack.c.bf16 %v7342_v34, %v7326_v41  ;;  %v7341_v31 = vmax.f32 %v7307_v6, 0.0  ;;  %v7325_v5 = vmax.f32 %v7303_v52, 0.0 }
0x24ce   :  { %v7355_v49 = vpack.c.bf16 %v7339_v8, %v7323_v50 }
0x24cf   :  { %v7357_v51 = vpack.c.bf16 %v7341_v31, %v7325_v5 }
0x24d1   :  { %7702 = vmatpush1.bf16.xpose.msra.mxu1 %v8305_v15 }
0x24d2   :  { %7743 = vmatpush1.bf16.xpose.msra.mxu0 %v8307_v58  ;;  %7781 = vmatprep.subr.bf16.mxu1 %v8326_v43  ;;  %v8296_v43 = vld [vmem:[%s10307_s4 + $0x17] ss:$0 sm:$0xff] }
0x24d3   :  { %7822 = vmatprep.subr.bf16.mxu0 %v8328_v46 }
0x24d8   :  { %7720 = vmatmul.mubr.bf16.vlgmr.msra.gmra.mxu1 %v7351_v16 }
0x24d9   :  { %7761 = vmatmul.mubr.bf16.vlgmr.msra.gmra.mxu0 %v7353_v21  ;;  %7782 = vmatpush1.bf16.xpose.msra.mxu1 %v8325_v37 }
0x24da   :  { %7801 = vmatprep.mubr.bf16.mxu1 %v7356_v28  ;;  %7823 = vmatpush1.bf16.xpose.msra.mxu0 %v8327_v39 }
0x24db   :  { %7842 = vmatprep.mubr.bf16.mxu0 %v7358_v30  ;;  %7783 = vmatprep.subr.bf16.mxu1 %v8310_v12 }
0x24dc   :  { %7824 = vmatprep.subr.bf16.mxu0 %v8312_v20 }
0x24e1   :  { %7784 = vmatpush1.bf16.xpose.msra.mxu1 %v8309_v57 }
0x24e2   :  { %7825 = vmatpush1.bf16.xpose.msra.mxu0 %v8311_v17 }
0x24e8   :  { %7802 = vmatmul.mubr.bf16.vlgmr.msra.gmra.mxu1 %v7355_v49 }
0x24e9   :  { %7843 = vmatmul.mubr.bf16.vlgmr.msra.gmra.mxu0 %v7357_v51 }
0x2578   :  { %v7557_v54 = vpop.f32.mrf.mxu1  ;;  %v7598_v24 = vpop.f32.mrf.mxu0 }
0x2579   :  { %v7558_v1 = vadd.f32 %v8296_v43, %v7557_v54 }
0x257a   :  { %v7559_v11 = vpop.f32.mrf.mxu1  ;;  %v7600_v56 = vpop.f32.mrf.mxu0 }
0x257b   :  { %v7599_v45 = vadd.f32 %v7598_v24, %v7558_v1 }
0x257c   :  { %v7560_v55 = vpop.f32.mrf.mxu1  ;;  %v7601_v14 = vpop.f32.mrf.mxu0 }
0x257d   :  { %v7561_v47 = vadd.f32 %v8296_v43, %v7560_v55 }
0x257e   :  { %v7562_v40 = vpop.f32.mrf.mxu1  ;;  %v7603_v3 = vpop.f32.mrf.mxu0 }
0x257f   :  { %v7602_v42 = vadd.f32 %v7601_v14, %v7561_v47 }
0x2588   :  { %v7639_v44 = vpop.f32.mrf.mxu1  ;;  %v7680_v19 = vpop.f32.mrf.mxu0 }
0x2589   :  { %v7640_v9 = vadd.f32 %v7639_v44, %v7599_v45  ;;  %v8329_v44 = vld [vmem:[%s10307_s4 + $0x18] ss:$0 sm:$0xff] }
0x258a   :  { %v7641_v63 = vpop.f32.mrf.mxu1  ;;  %v7682_v15 = vpop.f32.mrf.mxu0 }
0x258b   :  { %v7681_v33 = vadd.f32 %v7680_v19, %v7640_v9  ;;  %v8330_v63 = vld [vmem:[%s10307_s4 + $0x19] ss:$0 sm:$0xff] }
0x258c   :  { %v7642_v18 = vpop.f32.mrf.mxu1  ;;  %v7683_v10 = vpop.f32.mrf.mxu0 }
0x258d   :  { %v7643_v38 = vadd.f32 %v7642_v18, %v7602_v42 }
0x258e   :  { %v7644_v0 = vpop.f32.mrf.mxu1  ;;  %v7685_v58 = vpop.f32.mrf.mxu0 }
0x258f   :  { %v7684_v34 = vadd.f32 %v7683_v10, %v7643_v38 }
0x2598   :  { %v7721_v22 = vpop.f32.mrf.mxu1 }
0x2599   :  { %v7762_v46 = vpop.f32.mrf.mxu0  ;;  %v7722_v61 = vadd.f32 %v7721_v22, %v7681_v33 }
0x259a   :  { %v7723_v23 = vpop.f32.mrf.mxu1 }
0x259b   :  { %v7764_v32 = vpop.f32.mrf.mxu0  ;;  %v7763_v37 = vadd.f32 %v7762_v46, %v7722_v61 }
0x259c   :  { %v7724_v2 = vpop.f32.mrf.mxu1 }
0x259d   :  { %v7765_v60 = vpop.f32.mrf.mxu0  ;;  %v7725_v53 = vadd.f32 %v7724_v2, %v7684_v34 }
0x259e   :  { %v7726_v7 = vpop.f32.mrf.mxu1 }
0x259f   :  { %v7767_v59 = vpop.f32.mrf.mxu0  ;;  %v7766_v21 = vadd.f32 %v7765_v60, %v7725_v53 }
0x25a0   :  { %v7934_v59 = vld [vmem:[%s10307_s4 + $0x1d] sm:$0x1] }
0x25a1   :  { %8865 = vpush %v7934_v59 }
0x25a8   :  { %v7803_v35 = vpop.f32.mrf.mxu1 }
0x25a9   :  { %v7804_v16 = vadd.f32 %v7803_v35, %v7763_v37  ;;  %v7844_v13 = vpop.f32.mrf.mxu0 }
0x25aa   :  { %v7805_v39 = vpop.f32.mrf.mxu1 }
0x25ab   :  { %v7845_v41 = vadd.f32 %v7844_v13, %v7804_v16  ;;  %v7846_v12 = vpop.f32.mrf.mxu0  ;;  %v8331_v16 = vld [vmem:[%s10307_s4 + $0x1a] ss:$0 sm:$0xff]  ;;  %v8332_v39 = vld [vmem:[%s10307_s4 + $0x1b] ss:$0 sm:$0xff] }
0x25ac   :  { %v7806_v28 = vpop.f32.mrf.mxu1  ;;  %v8333_v12 = vld [vmem:[%s10307_s4 + $0x1c] ss:$0 sm:$0xff]  ;;  %s9080_s4 = smov [#allocation5]  }
0x25ad   :  { %v7851_v20 = vadd.f32 %v7845_v41, %v10126_v27  ;;  %v7807_v30 = vadd.f32 %v7806_v28, %v7766_v21  ;;  %v7847_v62 = vpop.f32.mrf.mxu0  ;;  %s7994_s25 = sshll.u32 %s9080_s4, 4  ;;  %s7995_s25 = int_to_ptr.vmem [resolvable:$true] %s7994_s25 }
0x25ae   :  { %v7808_v36 = vpop.f32.mrf.mxu1  ;;  %s9047_s0 = scalar_lea.vmem %s7995_s25, 32  ;;  %p9052_p6 = scmp.lt.s32.totalorder %s7995_s25, %s7995_s25 }
0x25af   :  { %v7848_v57 = vadd.f32 %v7847_v62, %v7807_v30  ;;  %v7849_v4 = vpop.f32.mrf.mxu0  ;;  %v7855_v17 = vsel %vm87_vm1, %v7851_v20, 0.0  ;;  %p9048_p5 = scmp.ne.s32.totalorder %s7995_s25, %s9047_s0  ;;  %p9053_p7 = scmp.lt.s32.totalorder %s9047_s0, %s9047_s0 }
0x25b0   :  { %7856 = vadd.xlane.f32.xlu0 %v7855_v17 }
0x25b1   :  { %v7852_v6 = vadd.f32 %v7848_v57, %v10128_v48  ;;  %p9054_p8 = por %p9053_p7, %p9052_p6 }
0x25b3   :  { %v7858_v29 = vsel %vm87_vm1, %v7852_v6, 0.0  ;;  %p9055_p9 = pnand %p9054_p8, %p9048_p5 }
0x25b4   :  { %7859 = vadd.xlane.f32.xlu0 %v7858_v29 }
0x25d2   :  { %s8866_s14 = spop %8865 }
0x2639   :  { %v7857_v52 = vpop.xlane.xlu0 %7856 }
0x263a   :  { %v7861_v8 = vmul.f32 0.03125, %v7857_v52 }
0x263c   :  { %v7863_v31 = vsub.f32 %v7851_v20, %v7861_v8 }
0x263d   :  { %v7860_v50 = vpop.xlane.xlu0 %7859 }
0x263e   :  { %v7862_v5 = vmul.f32 0.03125, %v7860_v50  ;;  %v7865_v49 = vmul.f32 %v7863_v31, %v7863_v31 }
0x2640   :  { %v7864_v27 = vsub.f32 %v7852_v6, %v7862_v5  ;;  %v7867_v51 = vsel %vm87_vm1, %v7865_v49, 0.0  ;;  %v7949_v6 = vstv %s8866_s14 }
0x2641   :  { %7868 = vadd.xlane.f32.xlu0 %v7867_v51 }
0x2642   :  { %v7866_v54 = vmul.f32 %v7864_v27, %v7864_v27 }
0x2644   :  { %v7870_v24 = vsel %vm87_vm1, %v7866_v54, 0.0 }
0x2645   :  { %7871 = vadd.xlane.f32.xlu1 %v7870_v24 }
0x26ca   :  { %v7869_v11 = vpop.xlane.xlu0 %7868 }
0x26cb   :  { %v7873_v56 = vmul.f32 0.03125, %v7869_v11 }
0x26cd   :  { %v7875_v48 = vadd.f32 1e-05, %v7873_v56 }
0x26ce   :  { %v7872_v55 = vpop.xlane.xlu1 %7871 }
0x26cf   :  { %9011 = vrsqrt.f32 %v7875_v48  ;;  %v7874_v14 = vmul.f32 0.03125, %v7872_v55 }
0x26d1   :  { %v7876_v40 = vadd.f32 1e-05, %v7874_v14 }
0x26d3   :  { %9013 = vrsqrt.f32 %v7876_v40 }
0x26dc   :  { %v9012_v3 = vpop.eup %9011 }
0x26dd   :  { %v7879_v19 = vmul.f32 %v9012_v3, %v7863_v31  ;;  %v7977_v3 = vsub.s32 %v9204_v26, %v9202_v25 }
0x26df   :  { %v7885_v15 = vmul.f32 %v8329_v44, %v7879_v19 }
0x26e0   :  { %v9014_v18 = vpop.eup %9013 }
0x26e1   :  { %v7891_v10 = vadd.f32 %v8330_v63, %v7885_v15  ;;  %v7880_v0 = vmul.f32 %v9014_v18, %v7864_v27 }
0x26e3   :  { %v7895_v58 = vsel %vm87_vm1, %v7891_v10, 0.0  ;;  %v7886_v43 = vmul.f32 %v8329_v44, %v7880_v0 }
0x26e4   :  { %7896 = vadd.xlane.f32.xlu0 %v7895_v58 }
0x26e5   :  { %v7892_v1 = vadd.f32 %v8330_v63, %v7886_v43 }
0x26e7   :  { %v7898_v22 = vsel %vm87_vm1, %v7892_v1, 0.0 }
0x26e8   :  { %7899 = vadd.xlane.f32.xlu1 %v7898_v22 }
0x276d   :  { %v7897_v46 = vpop.xlane.xlu0 %7896 }
0x276e   :  { %v7901_v23 = vmul.f32 0.03125, %v7897_v46 }
0x2770   :  { %v7903_v45 = vsub.f32 %v7891_v10, %v7901_v23 }
0x2771   :  { %v7900_v47 = vpop.xlane.xlu1 %7899 }
0x2772   :  { %v7902_v32 = vmul.f32 0.03125, %v7900_v47  ;;  %v7905_v2 = vmul.f32 %v7903_v45, %v7903_v45 }
0x2774   :  { %v7904_v9 = vsub.f32 %v7892_v1, %v7902_v32  ;;  %v7907_v60 = vsel %vm87_vm1, %v7905_v2, 0.0 }
0x2775   :  { %7908 = vadd.xlane.f32.xlu0 %v7907_v60 }
0x2776   :  { %v7906_v7 = vmul.f32 %v7904_v9, %v7904_v9 }
0x2778   :  { %v7910_v42 = vsel %vm87_vm1, %v7906_v7, 0.0 }
0x2779   :  { %7911 = vadd.xlane.f32.xlu1 %v7910_v42 }
0x27fe   :  { %v7909_v33 = vpop.xlane.xlu0 %7908 }
0x27ff   :  { %v7913_v38 = vmul.f32 0.03125, %v7909_v33 }
0x2801   :  { %v7915_v61 = vadd.f32 1e-05, %v7913_v38 }
0x2802   :  { %v7912_v34 = vpop.xlane.xlu1 %7911 }
0x2803   :  { %9015 = vrsqrt.f32 %v7915_v61  ;;  %v7914_v37 = vmul.f32 0.03125, %v7912_v34 }
0x2805   :  { %v7916_v53 = vadd.f32 1e-05, %v7914_v37 }
0x2807   :  { %9017 = vrsqrt.f32 %v7916_v53 }
0x2810   :  { %v9016_v35 = vpop.eup %9015 }
0x2811   :  { %v7919_v13 = vmul.f32 %v9016_v35, %v7903_v45 }
0x2813   :  { %v7925_v21 = vmul.f32 %v8331_v16, %v7919_v13 }
0x2814   :  { %v9018_v41 = vpop.eup %9017 }
0x2815   :  { %v7931_v28 = vadd.f32 %v8332_v39, %v7925_v21  ;;  %v7920_v20 = vmul.f32 %v9018_v41, %v7904_v9 }
0x2817   :  { %v7939_v30 = vmul.f32 %v8333_v12, %v7931_v28  ;;  %v7926_v62 = vmul.f32 %v8331_v16, %v7920_v20 }
0x2819   :  { %v7941_v36 = vsel %vm87_vm1, %v7939_v30, 0.0  ;;  %v7932_v57 = vadd.f32 %v8332_v39, %v7926_v62 }
0x281a   :  { %7942 = vadd.xlane.f32.xlu0 %v7941_v36 }
0x281b   :  { %v7940_v4 = vmul.f32 %v8333_v12, %v7932_v57 }
0x281d   :  { %v7944_v17 = vsel %vm87_vm1, %v7940_v4, 0.0 }
0x281e   :  { %7945 = vadd.xlane.f32.xlu1 %v7944_v17 }
0x28a3   :  { %v7943_v29 = vpop.xlane.xlu0 %7942 }
0x28a4   :  { %v7951_v52 = vadd.f32 %v7949_v6, %v7943_v29 }
0x28a6   :  { %v7953_v8 = vand.u32 2147483647, %v7951_v52  ;;  %vm7967_vm5 = vcmp.ge.f32.partialorder %v7951_v52, 0.0 }
0x28a7   :  { %v7946_v31 = vpop.xlane.xlu1 %7945 }
0x28a8   :  { %v7955_v50 = vsub.f32 0.0, %v7953_v8  ;;  %v7952_v5 = vadd.f32 %v7949_v6, %v7946_v31 }
0x28aa   :  { %v7957_v49 = vmul.f32 1.442695, %v7955_v50  ;;  %v7954_v27 = vand.u32 2147483647, %v7952_v5  ;;  %vm7968_vm6 = vcmp.ge.f32.partialorder %v7952_v5, 0.0 }
0x28ac   :  { %9019 = vpow2.f32 %v7957_v49  ;;  %v7956_v51 = vsub.f32 0.0, %v7954_v27 }
0x28ae   :  { %v7959_v54 = vmul.f32 1.442695, %v7956_v51 }
0x28b0   :  { %9021 = vpow2.f32 %v7959_v54 }
0x28b9   :  { %v9020_v24 = vpop.eup %9019 }
0x28ba   :  { %v7961_v11 = vadd.f32 1.0, %v9020_v24 }
0x28bc   :  { %9023 = vrcp.f32 %v7961_v11 }
0x28bd   :  { %v9022_v56 = vpop.eup %9021 }
0x28be   :  { %v7962_v48 = vadd.f32 1.0, %v9022_v56 }
0x28c0   :  { %9025 = vrcp.f32 %v7962_v48 }
0x28c9   :  { %v9024_v55 = vpop.eup %9023 }
0x28ca   :  { %v7969_v14 = vmul.f32 %v9024_v55, %v9020_v24 }
0x28cc   :  { %v7971_v44 = vsel %vm7967_vm5, %v9024_v55, %v7969_v14 }
0x28cd   :  { %v9026_v40 = vpop.eup %9025  ;;  %v7978_v15 = vrot.slane %v7971_v44, %v7977_v3 }
0x28ce   :  { %v7970_v19 = vmul.f32 %v9026_v40, %v9022_v56 }
0x28d0   :  { %v7972_v63 = vsel %vm7968_vm6, %v9026_v40, %v7970_v19 }
0x28d1   :  { %v7982_v18 = vrot.slane %v7972_v63, %v7977_v3 }
0x28d3   :  { %v7984_v10 = vsel %vm7983_vm7, %v7982_v18, %v7978_v15 }
0x28d4   :  { %7987 = vst.msk [vmem:[#allocation5] sm:$0x3] %vm7986_vm8, %v7984_v10 }
0x28d5   :  { %9058 = shalt.err (!%p9055_p9)
}
0x28d6   :  { %7997 = dma.vmem_to_hbm [thread:$0]  %s7995_s25, 32, %s10309_s6, [#allocation4]  }
0x28d7   :  { %9069 = dma.done.wait [#allocation4], 32  }
0x28d8   :  { %9070 = vsyncadd [#allocation4], 4294967264 }
0x28d9   :  { %8001 = vsyncpa [#allocation3], 1 }
0x28da   :  { %8002 = vsyncpa [#allocation4], 1 }

</bundles_post_ra>
